<compile_context>
chip_gen: v6e
topology: v6e:2x2x1
jax: 0.10.0
libtpu: 0.0.40
codegen_flags: <defaults>
</compile_context>

<pallas_src>
import functools

import jax
import jax.numpy as jnp
from jax.experimental import pallas as pl
from jax.experimental.pallas import tpu as pltpu

_BN_EPS = 1e-5
_LANE = 128
_MAX_TILE_M = 512


def _round_up(x, m):
    return (x + m - 1) // m * m


# ----------------------------------------------------------------------------
# Pallas kernels
# ----------------------------------------------------------------------------
def _phase_mm_act_kernel(p_ref, w_ref, o_ref, *, act):
    # One (phase, M-tile) grid step: patch tile @ resident phase weight on the
    # MXU (f32 accumulation), fused elementwise activation on VPU/EUP.
    y = jnp.dot(p_ref[0], w_ref[0], preferred_element_type=jnp.float32)
    if act == "relu":
        y = jnp.maximum(y, 0.0)
    elif act == "tanh":
        y = jnp.tanh(y)
    o_ref[0] = y.astype(o_ref.dtype)


def phase_matmul_act(patches, weights, act, tile_m):
    """patches (P, Mp, K) @ weights (P, K, N) -> (P, Mp, N) with fused act."""
    P, Mp, K = patches.shape
    _, _, N = weights.shape
    grid = (P, Mp // tile_m)
    return pl.pallas_call(
        functools.partial(_phase_mm_act_kernel, act=act),
        out_shape=jax.ShapeDtypeStruct((P, Mp, N), jnp.float32),
        grid=grid,
        in_specs=[
            pl.BlockSpec((1, tile_m, K), lambda ph, i: (ph, i, 0)),
            pl.BlockSpec((1, K, N), lambda ph, i: (ph, 0, 0)),
        ],
        out_specs=pl.BlockSpec((1, tile_m, N), lambda ph, i: (ph, i, 0)),
        compiler_params=pltpu.CompilerParams(
            dimension_semantics=("parallel", "parallel")),
    )(patches, weights)


def _phase_mm_stats_kernel(p_ref, w_ref, o_ref, sum_ref, sq_ref):
    # Matmul + per-phase partial channel sums / sums-of-squares (BN stats).
    y = jnp.dot(p_ref[0], w_ref[0], preferred_element_type=jnp.float32)
    o_ref[0] = y
    sum_ref[0] = jnp.sum(y, axis=0, keepdims=True)
    sq_ref[0] = jnp.sum(y * y, axis=0, keepdims=True)


def phase_matmul_stats(patches, weights):
    """Per-phase matmul (grid over phases) + partial BN statistics."""
    P, M, K = patches.shape
    _, _, N = weights.shape
    return pl.pallas_call(
        _phase_mm_stats_kernel,
        out_shape=(
            jax.ShapeDtypeStruct((P, M, N), jnp.float32),
            jax.ShapeDtypeStruct((P, 1, N), jnp.float32),
            jax.ShapeDtypeStruct((P, 1, N), jnp.float32),
        ),
        grid=(P,),
        in_specs=[
            pl.BlockSpec((1, M, K), lambda ph: (ph, 0, 0)),
            pl.BlockSpec((1, K, N), lambda ph: (ph, 0, 0)),
        ],
        out_specs=(
            pl.BlockSpec((1, M, N), lambda ph: (ph, 0, 0)),
            pl.BlockSpec((1, 1, N), lambda ph: (ph, 0, 0)),
            pl.BlockSpec((1, 1, N), lambda ph: (ph, 0, 0)),
        ),
        compiler_params=pltpu.CompilerParams(
            dimension_semantics=("parallel",)),
    )(patches, weights)


def _affine_relu_kernel(y_ref, s_ref, b_ref, o_ref):
    # BatchNorm apply (per-channel scale/shift) + ReLU on the VPU.
    o_ref[0] = jnp.maximum(y_ref[0] * s_ref[...] + b_ref[...], 0.0)


def phase_affine_relu(y, scale, shift):
    P, M, N = y.shape
    return pl.pallas_call(
        _affine_relu_kernel,
        out_shape=jax.ShapeDtypeStruct((P, M, N), jnp.float32),
        grid=(P,),
        in_specs=[
            pl.BlockSpec((1, M, N), lambda ph: (ph, 0, 0)),
            pl.BlockSpec((1, N), lambda ph: (0, 0)),
            pl.BlockSpec((1, N), lambda ph: (0, 0)),
        ],
        out_specs=pl.BlockSpec((1, M, N), lambda ph: (ph, 0, 0)),
        compiler_params=pltpu.CompilerParams(
            dimension_semantics=("parallel",)),
    )(y, scale.reshape(1, N), shift.reshape(1, N))


# ----------------------------------------------------------------------------
# JAX glue: sub-pixel phase decomposition of ConvTranspose2d(k=4, s=2, p=1)
# ----------------------------------------------------------------------------
def phase_patches_s2(x):
    """x (B,H,W,C) -> (4, B*H*W, 4*C): each output phase is a dense 2x2 conv
    over the 1-padded input (no zero-dilation, no structural zeros)."""
    B, H, W, C = x.shape
    xp = jnp.pad(x, ((0, 0), (1, 1), (1, 1), (0, 0)))
    phases = []
    for rh in (0, 1):
        for rw in (0, 1):
            taps = []
            for dh in (0, 1):
                for dw in (0, 1):
                    taps.append(
                        xp[:, dh + rh:dh + rh + H, dw + rw:dw + rw + W, :])
            p = jnp.concatenate(taps, axis=-1)            # (B, H, W, 4C)
            phases.append(p.reshape(B * H * W, 4 * C))
    return jnp.stack(phases, axis=0)                      # (4, B*H*W, 4C)


def phase_weight_s2(w, n_pad=None):
    """PyTorch ConvTranspose2d weight (Cin, Cout, 4, 4) -> (4, 4*Cin, Npad).

    Output phase (rh, rw), tap (dh, dw) uses kernel element
    (kh, kw) = (3 - 2*dh - rh, 3 - 2*dw - rw)."""
    Cin, Cout = w.shape[0], w.shape[1]
    phases = []
    for rh in (0, 1):
        for rw in (0, 1):
            taps = []
            for dh in (0, 1):
                for dw in (0, 1):
                    taps.append(w[:, :, 3 - 2 * dh - rh, 3 - 2 * dw - rw])
            phases.append(jnp.stack(taps, axis=0).reshape(4 * Cin, Cout))
    wm = jnp.stack(phases, axis=0)                        # (4, 4Cin, Cout)
    if n_pad is not None and n_pad > Cout:
        wm = jnp.pad(wm, ((0, 0), (0, 0), (0, n_pad - Cout)))
    return wm


def assemble_phases(y, B, H, W, C):
    """(4, B*H*W, C) phase-major -> (B, 2H, 2W, C) interleaved output."""
    y = y.reshape(2, 2, B, H, W, C)
    y = jnp.transpose(y, (2, 3, 0, 4, 1, 5))
    return y.reshape(B, 2 * H, 2 * W, C)


def bn_apply_relu(y, sums, sqs, gamma, beta):
    """Combine per-phase partial sums (tiny) and apply BN affine + ReLU."""
    count = y.shape[0] * y.shape[1]
    mean = jnp.sum(sums[:, 0, :], axis=0) / count
    msq = jnp.sum(sqs[:, 0, :], axis=0) / count
    var = jnp.maximum(msq - mean * mean, 0.0)             # biased (PyTorch BN fwd)
    scale = gamma / jnp.sqrt(var + _BN_EPS)
    shift = beta - mean * scale
    return phase_affine_relu(y, scale, shift)


def deconv_phase_act(x, w_phases, cout, act):
    """ConvTranspose2d(k=4,s=2,p=1) + activation via phase-decomposed GEMMs."""
    B, H, W, _ = x.shape
    patches = phase_patches_s2(x.astype(w_phases.dtype))   # bf16 for layers 3-5
    M = B * H * W
    if M <= _MAX_TILE_M:
        mp = _round_up(M, 8)
        tile_m = mp
    else:
        mp = _round_up(M, _MAX_TILE_M)
        tile_m = _MAX_TILE_M
    if mp != M:
        patches = jnp.pad(patches, ((0, 0), (0, mp - M), (0, 0)))
    y = phase_matmul_act(patches, w_phases, act, tile_m)    # (4, mp, Npad)
    y = y[:, :M, :cout]                                     # drop M / lane padding
    return assemble_phases(y, B, H, W, cout)


# ----------------------------------------------------------------------------
# Parameter preparation (hoisted out of the per-forward path)
# ----------------------------------------------------------------------------
def prepare_params(params):
    return {
        "emb": params["emb"],
        "g1": params["g1"], "b1": params["b1"],
        "g2": params["g2"], "b2": params["b2"],
        # Layer 1 (k=2,s=1,p=0 on a 1x1 input): one matmul per output position.
        "w1p": jnp.transpose(params["w1"], (2, 3, 0, 1)).reshape(4, 168, 448),
        # Layer 2 (BN layer, tiny at this batch): keep f32.
        "w2p": phase_weight_s2(params["w2"]),
        # Layers 3-5: bf16 inputs, Cout zero-padded to a lane-dense 128.
        "w3p": phase_weight_s2(params["w3"], n_pad=_LANE).astype(jnp.bfloat16),
        "w4p": phase_weight_s2(params["w4"], n_pad=_LANE).astype(jnp.bfloat16),
        "w5p": phase_weight_s2(params["w5"], n_pad=_LANE).astype(jnp.bfloat16),
    }


# ----------------------------------------------------------------------------
# G_SVHN forward
# ----------------------------------------------------------------------------
@functools.partial(jax.jit, static_argnames=("channels",))
def g_svhn_forward(prep, noise, label, code, *, channels):
    emb = prep["emb"][label]                               # nn.Embedding lookup
    inp = jnp.concatenate([noise, emb, code], axis=-1)     # (B, 168)
    B = inp.shape[0]

    # Layer 1: ConvTranspose2d(168,448,k=2,s=1) + BN + ReLU -> (B,2,2,448)
    p1 = jnp.broadcast_to(inp[None], (4, B, 168))
    y1, s1, q1 = phase_matmul_stats(p1, prep["w1p"])
    a1 = bn_apply_relu(y1, s1, q1, prep["g1"], prep["b1"])
    x = assemble_phases(a1, B, 1, 1, 448)

    # Layer 2: ConvTranspose2d(448,256,k=4,s=2,p=1) + BN + ReLU -> (B,4,4,256)
    p2 = phase_patches_s2(x)
    y2, s2, q2 = phase_matmul_stats(p2, prep["w2p"])
    a2 = bn_apply_relu(y2, s2, q2, prep["g2"], prep["b2"])
    x = assemble_phases(a2, B, 2, 2, 256)

    # Layers 3-5: deconv + ReLU / Tanh (bf16 MXU, lane-padded outputs).
    x = deconv_phase_act(x, prep["w3p"], 128, "relu")      # (B, 8, 8,128)
    x = deconv_phase_act(x, prep["w4p"], 64, "relu")       # (B,16,16, 64)
    x = deconv_phase_act(x, prep["w5p"], channels, "tanh")  # (B,32,32, C)

    return jnp.transpose(x, (0, 3, 1, 2))                  # NCHW like PyTorch


# ----------------------------------------------------------------------------
# Pure-JAX reference (zero-dilate + flip im2col, HIGHEST precision)
# ----------------------------------------------------------------------------
def _ref_deconv_patches(x_nhwc, k, s, p):
    B, H, W, C = x_nhwc.shape
    Hd, Wd = (H - 1) * s + 1, (W - 1) * s + 1
    pad = k - 1 - p
    Ho = (H - 1) * s + k - 2 * p
    Wo = (W - 1) * s + k - 2 * p
    xp = jnp.zeros((B, Hd + 2 * pad, Wd + 2 * pad, C), x_nhwc.dtype)
    xp = xp.at[:, pad:pad + Hd:s, pad:pad + Wd:s, :].set(x_nhwc)
    cols = []
    for kh in range(k):
        for kw in range(k):
            cols.append(xp[:, kh:kh + Ho, kw:kw + Wo, :])
    patches = jnp.concatenate(cols, axis=-1)
    return patches.reshape(B * Ho * Wo, k * k * C), (B, Ho, Wo)


def _ref_weight_matrix(w, k):
    Cin = w.shape[0]
    wf = w[:, :, ::-1, ::-1]
    wm = jnp.transpose(wf, (2, 3, 0, 1))
    return wm.reshape(k * k * Cin, w.shape[1])


def ref_forward(params, noise, label, code):
    def deconv(x, w, k, s, p):
        patches, (B, Ho, Wo) = _ref_deconv_patches(x, k, s, p)
        wm = _ref_weight_matrix(w, k)
        y = jnp.dot(patches, wm, precision=jax.lax.Precision.HIGHEST)
        return y.reshape(B, Ho, Wo, -1)

    def bn_relu(y, gamma, beta):
        mean = y.mean(axis=(0, 1, 2))
        var = y.var(axis=(0, 1, 2))
        yn = (y - mean) / jnp.sqrt(var + _BN_EPS)
        return jnp.maximum(yn * gamma + beta, 0.0)

    emb = params["emb"][label]
    inp = jnp.concatenate([noise, emb, code], axis=-1)
    x = inp.reshape(inp.shape[0], 1, 1, 168)
    x = bn_relu(deconv(x, params["w1"], 2, 1, 0), params["g1"], params["b1"])
    x = bn_relu(deconv(x, params["w2"], 4, 2, 1), params["g2"], params["b2"])
    x = jnp.maximum(deconv(x, params["w3"], 4, 2, 1), 0.0)
    x = jnp.maximum(deconv(x, params["w4"], 4, 2, 1), 0.0)
    x = jnp.tanh(deconv(x, params["w5"], 4, 2, 1))
    return jnp.transpose(x, (0, 3, 1, 2))


# ----------------------------------------------------------------------------
# Deterministic parameter init (synthetic; no checkpoint load)
# ----------------------------------------------------------------------------
def init_params(key, n_classes, channels):
    ks = jax.random.split(key, 6)

    def w(k, shape, std=0.05):
        return jax.random.normal(k, shape, jnp.float32) * std

    return {
        "emb": jax.random.normal(ks[0], (n_classes, n_classes), jnp.float32),
        "w1": w(ks[1], (168, 448, 2, 2)),
        "g1": jnp.ones((448,), jnp.float32), "b1": jnp.zeros((448,), jnp.float32),
        "w2": w(ks[2], (448, 256, 4, 4)),
        "g2": jnp.ones((256,), jnp.float32), "b2": jnp.zeros((256,), jnp.float32),
        "w3": w(ks[3], (256, 128, 4, 4)),
        "w4": w(ks[4], (128, 64, 4, 4)),
        "w5": w(ks[5], (64, channels, 4, 4)),
    }


if __name__ == "__main__":
    n_classes, channels = 10, 3
    noise_dim, code_dim = 128, 30          # 128 + 10 + 30 = 168
    B = 2

    key = jax.random.PRNGKey(0)
    kp, kn, kl, kc = jax.random.split(key, 4)
    params = init_params(kp, n_classes, channels)
    noise = jax.random.normal(kn, (B, noise_dim), jnp.float32)
    label = jax.random.randint(kl, (B,), 0, n_classes)
    code = jax.random.normal(kc, (B, code_dim), jnp.float32)

    prep = prepare_params(params)          # weight layout prep done once
    out = jax.block_until_ready(
        g_svhn_forward(prep, noise, label, code, channels=channels))
    assert out.shape == (B, channels, 32, 32), out.shape

    ref = jax.block_until_ready(ref_forward(params, noise, label, code))
    err = float(jnp.max(jnp.abs(out - ref)))
    if err < 5e-2:
        print("KERNEL_OK")
    else:
        print(f"MAX_ABS_ERR={err}")
</pallas_src>

<mosaic_0001>
module attributes {stable_mosaic.version = 11 : i64} {
  func.func @_phase_mm_stats_kernel(%arg0: i32, %arg1: memref<1x8x1792xf32, #tpu.memory_space<vmem>>, %arg2: memref<1x1792x256xf32, #tpu.memory_space<vmem>>, %arg3: memref<1x8x256xf32, #tpu.memory_space<vmem>>, %arg4: memref<1x1x256xf32, #tpu.memory_space<vmem>>, %arg5: memref<1x1x256xf32, #tpu.memory_space<vmem>>) attributes {dimension_semantics = [#tpu.dimension_semantics<parallel>], iteration_bounds = array<i64: 4>, scalar_prefetch = 0 : i64, scratch_operands = 0 : i64, tpu.core_type = #tpu.core_type<tc>, window_params = [{transform_indices = @transform_0, window_bounds = array<i64: 1, 8, 1792>}, {transform_indices = @transform_1, window_bounds = array<i64: 1, 1792, 256>}, {transform_indices = @transform_2, window_bounds = array<i64: 1, 8, 256>}, {transform_indices = @transform_3, window_bounds = array<i64: 1, 1, 256>}, {transform_indices = @transform_4, window_bounds = array<i64: 1, 1, 256>}]} {
    %c0 = arith.constant 0 : index
    %c0_0 = arith.constant 0 : index
    %c0_1 = arith.constant 0 : index
    %0 = vector.load %arg1[%c0, %c0_0, %c0_1] : memref<1x8x1792xf32, #tpu.memory_space<vmem>>, vector<1x8x1792xf32>
    %1 = vector.shape_cast %0 : vector<1x8x1792xf32> to vector<8x1792xf32>
    %c0_2 = arith.constant 0 : index
    %c0_3 = arith.constant 0 : index
    %c0_4 = arith.constant 0 : index
    %2 = vector.load %arg2[%c0_2, %c0_3, %c0_4] : memref<1x1792x256xf32, #tpu.memory_space<vmem>>, vector<1x1792x256xf32>
    %3 = vector.shape_cast %2 : vector<1x1792x256xf32> to vector<1792x256xf32>
    %cst = arith.constant dense<0.000000e+00> : vector<8x256xf32>
    %4 = tpu.matmul %1, %3, %cst {dimension_numbers = #tpu.dot_dimension_numbers<[1], [0], [0], [1], [0, 0, 1, 1], [], []>} : vector<8x1792xf32>, vector<1792x256xf32>, vector<8x256xf32> -> vector<8x256xf32>
    %c0_5 = arith.constant 0 : index
    %c0_6 = arith.constant 0 : index
    %c0_7 = arith.constant 0 : index
    %5 = vector.load %arg3[%c0_5, %c0_6, %c0_7] : memref<1x8x256xf32, #tpu.memory_space<vmem>>, vector<1x8x256xf32>
    %6 = vector.shape_cast %5 : vector<1x8x256xf32> to vector<8x256xf32>
    %7 = vector.shape_cast %4 : vector<8x256xf32> to vector<1x8x256xf32>
    tpu.vector_store %arg3[%c0_5, %c0_6, %c0_7], %7 {strides = array<i32>} : memref<1x8x256xf32, #tpu.memory_space<vmem>>, vector<1x8x256xf32>,
    %cst_8 = arith.constant dense<0.000000e+00> : vector<256xf32>
    %8 = vector.multi_reduction <add>, %4, %cst_8 [0] : vector<8x256xf32> to vector<256xf32>
    %9 = vector.shape_cast %8 : vector<256xf32> to vector<1x256xf32>
    %c0_9 = arith.constant 0 : index
    %c0_10 = arith.constant 0 : index
    %c0_11 = arith.constant 0 : index
    %10 = vector.load %arg4[%c0_9, %c0_10, %c0_11] : memref<1x1x256xf32, #tpu.memory_space<vmem>>, vector<1x1x256xf32>
    %11 = vector.shape_cast %10 : vector<1x1x256xf32> to vector<1x256xf32>
    %12 = vector.shape_cast %9 : vector<1x256xf32> to vector<1x1x256xf32>
    tpu.vector_store %arg4[%c0_9, %c0_10, %c0_11], %12 {strides = array<i32>} : memref<1x1x256xf32, #tpu.memory_space<vmem>>, vector<1x1x256xf32>,
    %13 = arith.mulf %4, %4 : vector<8x256xf32>
    %cst_12 = arith.constant dense<0.000000e+00> : vector<256xf32>
    %14 = vector.multi_reduction <add>, %13, %cst_12 [0] : vector<8x256xf32> to vector<256xf32>
    %15 = vector.shape_cast %14 : vector<256xf32> to vector<1x256xf32>
    %c0_13 = arith.constant 0 : index
    %c0_14 = arith.constant 0 : index
    %c0_15 = arith.constant 0 : index
    %16 = vector.load %arg5[%c0_13, %c0_14, %c0_15] : memref<1x1x256xf32, #tpu.memory_space<vmem>>, vector<1x1x256xf32>
    %17 = vector.shape_cast %16 : vector<1x1x256xf32> to vector<1x256xf32>
    %18 = vector.shape_cast %15 : vector<1x256xf32> to vector<1x1x256xf32>
    tpu.vector_store %arg5[%c0_13, %c0_14, %c0_15], %18 {strides = array<i32>} : memref<1x1x256xf32, #tpu.memory_space<vmem>>, vector<1x1x256xf32>,
    return
  }
  func.func @transform_0(%arg0: i32) -> (i32, i32, i32) {
    %c0_i32 = arith.constant 0 : i32
    %c0_i32_0 = arith.constant 0 : i32
    %c0_i32_1 = arith.constant 0 : i32
    return %arg0, %c0_i32, %c0_i32_0 : i32, i32, i32
  }
  func.func @transform_1(%arg0: i32) -> (i32, i32, i32) {
    %c0_i32 = arith.constant 0 : i32
    %c0_i32_0 = arith.constant 0 : i32
    %c0_i32_1 = arith.constant 0 : i32
    return %arg0, %c0_i32, %c0_i32_0 : i32, i32, i32
  }
  func.func @transform_2(%arg0: i32) -> (i32, i32, i32) {
    %c0_i32 = arith.constant 0 : i32
    %c0_i32_0 = arith.constant 0 : i32
    %c0_i32_1 = arith.constant 0 : i32
    return %arg0, %c0_i32, %c0_i32_0 : i32, i32, i32
  }
  func.func @transform_3(%arg0: i32) -> (i32, i32, i32) {
    %c0_i32 = arith.constant 0 : i32
    %c0_i32_0 = arith.constant 0 : i32
    %c0_i32_1 = arith.constant 0 : i32
    return %arg0, %c0_i32, %c0_i32_0 : i32, i32, i32
  }
  func.func @transform_4(%arg0: i32) -> (i32, i32, i32) {
    %c0_i32 = arith.constant 0 : i32
    %c0_i32_0 = arith.constant 0 : i32
    %c0_i32_1 = arith.constant 0 : i32
    return %arg0, %c0_i32, %c0_i32_0 : i32, i32, i32
  }
}

module attributes {stable_mosaic.version = 11 : i64} {
  func.func @_affine_relu_kernel(%arg0: i32, %arg1: memref<1x2x448xf32, #tpu.memory_space<vmem>>, %arg2: memref<1x448xf32, #tpu.memory_space<vmem>>, %arg3: memref<1x448xf32, #tpu.memory_space<vmem>>, %arg4: memref<1x2x448xf32, #tpu.memory_space<vmem>>) attributes {dimension_semantics = [#tpu.dimension_semantics<parallel>], iteration_bounds = array<i64: 4>, scalar_prefetch = 0 : i64, scratch_operands = 0 : i64, tpu.core_type = #tpu.core_type<tc>, window_params = [{transform_indices = @transform_0, window_bounds = array<i64: 1, 2, 448>}, {pipeline_mode = #tpu.pipeline_mode<synchronous>, transform_indices = @transform_1, window_bounds = array<i64: 1, 448>}, {pipeline_mode = #tpu.pipeline_mode<synchronous>, transform_indices = @transform_2, window_bounds = array<i64: 1, 448>}, {transform_indices = @transform_3, window_bounds = array<i64: 1, 2, 448>}]} {
    %c0 = arith.constant 0 : index
    %c0_0 = arith.constant 0 : index
    %c0_1 = arith.constant 0 : index
    %0 = vector.load %arg1[%c0, %c0_0, %c0_1] : memref<1x2x448xf32, #tpu.memory_space<vmem>>, vector<1x2x448xf32>
    %1 = vector.shape_cast %0 : vector<1x2x448xf32> to vector<2x448xf32>
    %c0_2 = arith.constant 0 : index
    %c0_3 = arith.constant 0 : index
    %2 = vector.load %arg2[%c0_2, %c0_3] : memref<1x448xf32, #tpu.memory_space<vmem>>, vector<1x448xf32>
    %3 = vector.broadcast %2 : vector<1x448xf32> to vector<2x448xf32>
    %4 = arith.mulf %1, %3 : vector<2x448xf32>
    %c0_4 = arith.constant 0 : index
    %c0_5 = arith.constant 0 : index
    %5 = vector.load %arg3[%c0_4, %c0_5] : memref<1x448xf32, #tpu.memory_space<vmem>>, vector<1x448xf32>
    %6 = vector.broadcast %5 : vector<1x448xf32> to vector<2x448xf32>
    %7 = arith.addf %4, %6 : vector<2x448xf32>
    %cst = arith.constant 0.000000e+00 : f32
    %8 = vector.broadcast %cst : f32 to vector<2x448xf32>
    %9 = arith.maximumf %7, %8 : vector<2x448xf32>
    %c0_6 = arith.constant 0 : index
    %c0_7 = arith.constant 0 : index
    %c0_8 = arith.constant 0 : index
    %10 = vector.load %arg4[%c0_6, %c0_7, %c0_8] : memref<1x2x448xf32, #tpu.memory_space<vmem>>, vector<1x2x448xf32>
    %11 = vector.shape_cast %10 : vector<1x2x448xf32> to vector<2x448xf32>
    %12 = vector.shape_cast %9 : vector<2x448xf32> to vector<1x2x448xf32>
    tpu.vector_store %arg4[%c0_6, %c0_7, %c0_8], %12 {strides = array<i32>} : memref<1x2x448xf32, #tpu.memory_space<vmem>>, vector<1x2x448xf32>,
    return
  }
  func.func @transform_0(%arg0: i32) -> (i32, i32, i32) {
    %c0_i32 = arith.constant 0 : i32
    %c0_i32_0 = arith.constant 0 : i32
    %c0_i32_1 = arith.constant 0 : i32
    return %arg0, %c0_i32, %c0_i32_0 : i32, i32, i32
  }
  func.func @transform_1(%arg0: i32) -> (i32, i32) {
    %c0_i32 = arith.constant 0 : i32
    %c0_i32_0 = arith.constant 0 : i32
    %c0_i32_1 = arith.constant 0 : i32
    return %c0_i32, %c0_i32_0 : i32, i32
  }
  func.func @transform_2(%arg0: i32) -> (i32, i32) {
    %c0_i32 = arith.constant 0 : i32
    %c0_i32_0 = arith.constant 0 : i32
    %c0_i32_1 = arith.constant 0 : i32
    return %c0_i32, %c0_i32_0 : i32, i32
  }
  func.func @transform_3(%arg0: i32) -> (i32, i32, i32) {
    %c0_i32 = arith.constant 0 : i32
    %c0_i32_0 = arith.constant 0 : i32
    %c0_i32_1 = arith.constant 0 : i32
    return %arg0, %c0_i32, %c0_i32_0 : i32, i32, i32
  }
}

module attributes {stable_mosaic.version = 11 : i64} {
  func.func @_phase_mm_stats_kernel(%arg0: i32, %arg1: memref<1x2x168xf32, #tpu.memory_space<vmem>>, %arg2: memref<1x168x448xf32, #tpu.memory_space<vmem>>, %arg3: memref<1x2x448xf32, #tpu.memory_space<vmem>>, %arg4: memref<1x1x448xf32, #tpu.memory_space<vmem>>, %arg5: memref<1x1x448xf32, #tpu.memory_space<vmem>>) attributes {dimension_semantics = [#tpu.dimension_semantics<parallel>], iteration_bounds = array<i64: 4>, scalar_prefetch = 0 : i64, scratch_operands = 0 : i64, tpu.core_type = #tpu.core_type<tc>, window_params = [{transform_indices = @transform_0, window_bounds = array<i64: 1, 2, 168>}, {transform_indices = @transform_1, window_bounds = array<i64: 1, 168, 448>}, {transform_indices = @transform_2, window_bounds = array<i64: 1, 2, 448>}, {transform_indices = @transform_3, window_bounds = array<i64: 1, 1, 448>}, {transform_indices = @transform_4, window_bounds = array<i64: 1, 1, 448>}]} {
    %c0 = arith.constant 0 : index
    %c0_0 = arith.constant 0 : index
    %c0_1 = arith.constant 0 : index
    %0 = vector.load %arg1[%c0, %c0_0, %c0_1] : memref<1x2x168xf32, #tpu.memory_space<vmem>>, vector<1x2x168xf32>
    %1 = vector.shape_cast %0 : vector<1x2x168xf32> to vector<2x168xf32>
    %c0_2 = arith.constant 0 : index
    %c0_3 = arith.constant 0 : index
    %c0_4 = arith.constant 0 : index
    %2 = vector.load %arg2[%c0_2, %c0_3, %c0_4] : memref<1x168x448xf32, #tpu.memory_space<vmem>>, vector<1x168x448xf32>
    %3 = vector.shape_cast %2 : vector<1x168x448xf32> to vector<168x448xf32>
    %cst = arith.constant dense<0.000000e+00> : vector<2x448xf32>
    %4 = tpu.matmul %1, %3, %cst {dimension_numbers = #tpu.dot_dimension_numbers<[1], [0], [0], [1], [0, 0, 1, 1], [], []>} : vector<2x168xf32>, vector<168x448xf32>, vector<2x448xf32> -> vector<2x448xf32>
    %c0_5 = arith.constant 0 : index
    %c0_6 = arith.constant 0 : index
    %c0_7 = arith.constant 0 : index
    %5 = vector.load %arg3[%c0_5, %c0_6, %c0_7] : memref<1x2x448xf32, #tpu.memory_space<vmem>>, vector<1x2x448xf32>
    %6 = vector.shape_cast %5 : vector<1x2x448xf32> to vector<2x448xf32>
    %7 = vector.shape_cast %4 : vector<2x448xf32> to vector<1x2x448xf32>
    tpu.vector_store %arg3[%c0_5, %c0_6, %c0_7], %7 {strides = array<i32>} : memref<1x2x448xf32, #tpu.memory_space<vmem>>, vector<1x2x448xf32>,
    %cst_8 = arith.constant dense<0.000000e+00> : vector<448xf32>
    %8 = vector.multi_reduction <add>, %4, %cst_8 [0] : vector<2x448xf32> to vector<448xf32>
    %9 = vector.shape_cast %8 : vector<448xf32> to vector<1x448xf32>
    %c0_9 = arith.constant 0 : index
    %c0_10 = arith.constant 0 : index
    %c0_11 = arith.constant 0 : index
    %10 = vector.load %arg4[%c0_9, %c0_10, %c0_11] : memref<1x1x448xf32, #tpu.memory_space<vmem>>, vector<1x1x448xf32>
    %11 = vector.shape_cast %10 : vector<1x1x448xf32> to vector<1x448xf32>
    %12 = vector.shape_cast %9 : vector<1x448xf32> to vector<1x1x448xf32>
    tpu.vector_store %arg4[%c0_9, %c0_10, %c0_11], %12 {strides = array<i32>} : memref<1x1x448xf32, #tpu.memory_space<vmem>>, vector<1x1x448xf32>,
    %13 = arith.mulf %4, %4 : vector<2x448xf32>
    %cst_12 = arith.constant dense<0.000000e+00> : vector<448xf32>
    %14 = vector.multi_reduction <add>, %13, %cst_12 [0] : vector<2x448xf32> to vector<448xf32>
    %15 = vector.shape_cast %14 : vector<448xf32> to vector<1x448xf32>
    %c0_13 = arith.constant 0 : index
    %c0_14 = arith.constant 0 : index
    %c0_15 = arith.constant 0 : index
    %16 = vector.load %arg5[%c0_13, %c0_14, %c0_15] : memref<1x1x448xf32, #tpu.memory_space<vmem>>, vector<1x1x448xf32>
    %17 = vector.shape_cast %16 : vector<1x1x448xf32> to vector<1x448xf32>
    %18 = vector.shape_cast %15 : vector<1x448xf32> to vector<1x1x448xf32>
    tpu.vector_store %arg5[%c0_13, %c0_14, %c0_15], %18 {strides = array<i32>} : memref<1x1x448xf32, #tpu.memory_space<vmem>>, vector<1x1x448xf32>,
    return
  }
  func.func @transform_0(%arg0: i32) -> (i32, i32, i32) {
    %c0_i32 = arith.constant 0 : i32
    %c0_i32_0 = arith.constant 0 : i32
    %c0_i32_1 = arith.constant 0 : i32
    return %arg0, %c0_i32, %c0_i32_0 : i32, i32, i32
  }
  func.func @transform_1(%arg0: i32) -> (i32, i32, i32) {
    %c0_i32 = arith.constant 0 : i32
    %c0_i32_0 = arith.constant 0 : i32
    %c0_i32_1 = arith.constant 0 : i32
    return %arg0, %c0_i32, %c0_i32_0 : i32, i32, i32
  }
  func.func @transform_2(%arg0: i32) -> (i32, i32, i32) {
    %c0_i32 = arith.constant 0 : i32
    %c0_i32_0 = arith.constant 0 : i32
    %c0_i32_1 = arith.constant 0 : i32
    return %arg0, %c0_i32, %c0_i32_0 : i32, i32, i32
  }
  func.func @transform_3(%arg0: i32) -> (i32, i32, i32) {
    %c0_i32 = arith.constant 0 : i32
    %c0_i32_0 = arith.constant 0 : i32
    %c0_i32_1 = arith.constant 0 : i32
    return %arg0, %c0_i32, %c0_i32_0 : i32, i32, i32
  }
  func.func @transform_4(%arg0: i32) -> (i32, i32, i32) {
    %c0_i32 = arith.constant 0 : i32
    %c0_i32_0 = arith.constant 0 : i32
    %c0_i32_1 = arith.constant 0 : i32
    return %arg0, %c0_i32, %c0_i32_0 : i32, i32, i32
  }
}

module attributes {stable_mosaic.version = 11 : i64} {
  func.func @_affine_relu_kernel(%arg0: i32, %arg1: memref<1x8x256xf32, #tpu.memory_space<vmem>>, %arg2: memref<1x256xf32, #tpu.memory_space<vmem>>, %arg3: memref<1x256xf32, #tpu.memory_space<vmem>>, %arg4: memref<1x8x256xf32, #tpu.memory_space<vmem>>) attributes {dimension_semantics = [#tpu.dimension_semantics<parallel>], iteration_bounds = array<i64: 4>, scalar_prefetch = 0 : i64, scratch_operands = 0 : i64, tpu.core_type = #tpu.core_type<tc>, window_params = [{transform_indices = @transform_0, window_bounds = array<i64: 1, 8, 256>}, {pipeline_mode = #tpu.pipeline_mode<synchronous>, transform_indices = @transform_1, window_bounds = array<i64: 1, 256>}, {pipeline_mode = #tpu.pipeline_mode<synchronous>, transform_indices = @transform_2, window_bounds = array<i64: 1, 256>}, {transform_indices = @transform_3, window_bounds = array<i64: 1, 8, 256>}]} {
    %c0 = arith.constant 0 : index
    %c0_0 = arith.constant 0 : index
    %c0_1 = arith.constant 0 : index
    %0 = vector.load %arg1[%c0, %c0_0, %c0_1] : memref<1x8x256xf32, #tpu.memory_space<vmem>>, vector<1x8x256xf32>
    %1 = vector.shape_cast %0 : vector<1x8x256xf32> to vector<8x256xf32>
    %c0_2 = arith.constant 0 : index
    %c0_3 = arith.constant 0 : index
    %2 = vector.load %arg2[%c0_2, %c0_3] : memref<1x256xf32, #tpu.memory_space<vmem>>, vector<1x256xf32>
    %3 = vector.broadcast %2 : vector<1x256xf32> to vector<8x256xf32>
    %4 = arith.mulf %1, %3 : vector<8x256xf32>
    %c0_4 = arith.constant 0 : index
    %c0_5 = arith.constant 0 : index
    %5 = vector.load %arg3[%c0_4, %c0_5] : memref<1x256xf32, #tpu.memory_space<vmem>>, vector<1x256xf32>
    %6 = vector.broadcast %5 : vector<1x256xf32> to vector<8x256xf32>
    %7 = arith.addf %4, %6 : vector<8x256xf32>
    %cst = arith.constant 0.000000e+00 : f32
    %8 = vector.broadcast %cst : f32 to vector<8x256xf32>
    %9 = arith.maximumf %7, %8 : vector<8x256xf32>
    %c0_6 = arith.constant 0 : index
    %c0_7 = arith.constant 0 : index
    %c0_8 = arith.constant 0 : index
    %10 = vector.load %arg4[%c0_6, %c0_7, %c0_8] : memref<1x8x256xf32, #tpu.memory_space<vmem>>, vector<1x8x256xf32>
    %11 = vector.shape_cast %10 : vector<1x8x256xf32> to vector<8x256xf32>
    %12 = vector.shape_cast %9 : vector<8x256xf32> to vector<1x8x256xf32>
    tpu.vector_store %arg4[%c0_6, %c0_7, %c0_8], %12 {strides = array<i32>} : memref<1x8x256xf32, #tpu.memory_space<vmem>>, vector<1x8x256xf32>,
    return
  }
  func.func @transform_0(%arg0: i32) -> (i32, i32, i32) {
    %c0_i32 = arith.constant 0 : i32
    %c0_i32_0 = arith.constant 0 : i32
    %c0_i32_1 = arith.constant 0 : i32
    return %arg0, %c0_i32, %c0_i32_0 : i32, i32, i32
  }
  func.func @transform_1(%arg0: i32) -> (i32, i32) {
    %c0_i32 = arith.constant 0 : i32
    %c0_i32_0 = arith.constant 0 : i32
    %c0_i32_1 = arith.constant 0 : i32
    return %c0_i32, %c0_i32_0 : i32, i32
  }
  func.func @transform_2(%arg0: i32) -> (i32, i32) {
    %c0_i32 = arith.constant 0 : i32
    %c0_i32_0 = arith.constant 0 : i32
    %c0_i32_1 = arith.constant 0 : i32
    return %c0_i32, %c0_i32_0 : i32, i32
  }
  func.func @transform_3(%arg0: i32) -> (i32, i32, i32) {
    %c0_i32 = arith.constant 0 : i32
    %c0_i32_0 = arith.constant 0 : i32
    %c0_i32_1 = arith.constant 0 : i32
    return %arg0, %c0_i32, %c0_i32_0 : i32, i32, i32
  }
}

module attributes {stable_mosaic.version = 11 : i64} {
  func.func @_phase_mm_act_kernel(%arg0: i32, %arg1: i32, %arg2: memref<1x32x1024xbf16, #tpu.memory_space<vmem>>, %arg3: memref<1x1024x128xbf16, #tpu.memory_space<vmem>>, %arg4: memref<1x32x128xf32, #tpu.memory_space<vmem>>) attributes {dimension_semantics = [#tpu.dimension_semantics<parallel>, #tpu.dimension_semantics<parallel>], iteration_bounds = array<i64: 4, 1>, scalar_prefetch = 0 : i64, scratch_operands = 0 : i64, tpu.core_type = #tpu.core_type<tc>, window_params = [{transform_indices = @transform_0, window_bounds = array<i64: 1, 32, 1024>}, {transform_indices = @transform_1, window_bounds = array<i64: 1, 1024, 128>}, {transform_indices = @transform_2, window_bounds = array<i64: 1, 32, 128>}]} {
    %c0 = arith.constant 0 : index
    %c0_0 = arith.constant 0 : index
    %c0_1 = arith.constant 0 : index
    %0 = vector.load %arg2[%c0, %c0_0, %c0_1] : memref<1x32x1024xbf16, #tpu.memory_space<vmem>>, vector<1x32x1024xbf16>
    %1 = vector.shape_cast %0 : vector<1x32x1024xbf16> to vector<32x1024xbf16>
    %c0_2 = arith.constant 0 : index
    %c0_3 = arith.constant 0 : index
    %c0_4 = arith.constant 0 : index
    %2 = vector.load %arg3[%c0_2, %c0_3, %c0_4] : memref<1x1024x128xbf16, #tpu.memory_space<vmem>>, vector<1x1024x128xbf16>
    %3 = vector.shape_cast %2 : vector<1x1024x128xbf16> to vector<1024x128xbf16>
    %cst = arith.constant dense<0.000000e+00> : vector<32x128xf32>
    %4 = tpu.matmul %1, %3, %cst {dimension_numbers = #tpu.dot_dimension_numbers<[1], [0], [0], [1], [0, 0, 1, 1], [], []>} : vector<32x1024xbf16>, vector<1024x128xbf16>, vector<32x128xf32> -> vector<32x128xf32>
    %cst_5 = arith.constant 0.000000e+00 : f32
    %5 = vector.broadcast %cst_5 : f32 to vector<32x128xf32>
    %6 = arith.maximumf %4, %5 : vector<32x128xf32>
    %c0_6 = arith.constant 0 : index
    %c0_7 = arith.constant 0 : index
    %c0_8 = arith.constant 0 : index
    %7 = vector.load %arg4[%c0_6, %c0_7, %c0_8] : memref<1x32x128xf32, #tpu.memory_space<vmem>>, vector<1x32x128xf32>
    %8 = vector.shape_cast %7 : vector<1x32x128xf32> to vector<32x128xf32>
    %9 = vector.shape_cast %6 : vector<32x128xf32> to vector<1x32x128xf32>
    tpu.vector_store %arg4[%c0_6, %c0_7, %c0_8], %9 {strides = array<i32>} : memref<1x32x128xf32, #tpu.memory_space<vmem>>, vector<1x32x128xf32>,
    return
  }
  func.func @transform_0(%arg0: i32, %arg1: i32) -> (i32, i32, i32) {
    %c0_i32 = arith.constant 0 : i32
    %c0_i32_0 = arith.constant 0 : i32
    return %arg0, %arg1, %c0_i32 : i32, i32, i32
  }
  func.func @transform_1(%arg0: i32, %arg1: i32) -> (i32, i32, i32) {
    %c0_i32 = arith.constant 0 : i32
    %c0_i32_0 = arith.constant 0 : i32
    %c0_i32_1 = arith.constant 0 : i32
    return %arg0, %c0_i32, %c0_i32_0 : i32, i32, i32
  }
  func.func @transform_2(%arg0: i32, %arg1: i32) -> (i32, i32, i32) {
    %c0_i32 = arith.constant 0 : i32
    %c0_i32_0 = arith.constant 0 : i32
    return %arg0, %arg1, %c0_i32 : i32, i32, i32
  }
}

module attributes {stable_mosaic.version = 11 : i64} {
  func.func @_phase_mm_act_kernel(%arg0: i32, %arg1: i32, %arg2: memref<1x128x512xbf16, #tpu.memory_space<vmem>>, %arg3: memref<1x512x128xbf16, #tpu.memory_space<vmem>>, %arg4: memref<1x128x128xf32, #tpu.memory_space<vmem>>) attributes {dimension_semantics = [#tpu.dimension_semantics<parallel>, #tpu.dimension_semantics<parallel>], iteration_bounds = array<i64: 4, 1>, scalar_prefetch = 0 : i64, scratch_operands = 0 : i64, tpu.core_type = #tpu.core_type<tc>, window_params = [{transform_indices = @transform_0, window_bounds = array<i64: 1, 128, 512>}, {transform_indices = @transform_1, window_bounds = array<i64: 1, 512, 128>}, {transform_indices = @transform_2, window_bounds = array<i64: 1, 128, 128>}]} {
    %c0 = arith.constant 0 : index
    %c0_0 = arith.constant 0 : index
    %c0_1 = arith.constant 0 : index
    %0 = vector.load %arg2[%c0, %c0_0, %c0_1] : memref<1x128x512xbf16, #tpu.memory_space<vmem>>, vector<1x128x512xbf16>
    %1 = vector.shape_cast %0 : vector<1x128x512xbf16> to vector<128x512xbf16>
    %c0_2 = arith.constant 0 : index
    %c0_3 = arith.constant 0 : index
    %c0_4 = arith.constant 0 : index
    %2 = vector.load %arg3[%c0_2, %c0_3, %c0_4] : memref<1x512x128xbf16, #tpu.memory_space<vmem>>, vector<1x512x128xbf16>
    %3 = vector.shape_cast %2 : vector<1x512x128xbf16> to vector<512x128xbf16>
    %cst = arith.constant dense<0.000000e+00> : vector<128x128xf32>
    %4 = tpu.matmul %1, %3, %cst {dimension_numbers = #tpu.dot_dimension_numbers<[1], [0], [0], [1], [0, 0, 1, 1], [], []>} : vector<128x512xbf16>, vector<512x128xbf16>, vector<128x128xf32> -> vector<128x128xf32>
    %cst_5 = arith.constant 0.000000e+00 : f32
    %5 = vector.broadcast %cst_5 : f32 to vector<128x128xf32>
    %6 = arith.maximumf %4, %5 : vector<128x128xf32>
    %c0_6 = arith.constant 0 : index
    %c0_7 = arith.constant 0 : index
    %c0_8 = arith.constant 0 : index
    %7 = vector.load %arg4[%c0_6, %c0_7, %c0_8] : memref<1x128x128xf32, #tpu.memory_space<vmem>>, vector<1x128x128xf32>
    %8 = vector.shape_cast %7 : vector<1x128x128xf32> to vector<128x128xf32>
    %9 = vector.shape_cast %6 : vector<128x128xf32> to vector<1x128x128xf32>
    tpu.vector_store %arg4[%c0_6, %c0_7, %c0_8], %9 {strides = array<i32>} : memref<1x128x128xf32, #tpu.memory_space<vmem>>, vector<1x128x128xf32>,
    return
  }
  func.func @transform_0(%arg0: i32, %arg1: i32) -> (i32, i32, i32) {
    %c0_i32 = arith.constant 0 : i32
    %c0_i32_0 = arith.constant 0 : i32
    return %arg0, %arg1, %c0_i32 : i32, i32, i32
  }
  func.func @transform_1(%arg0: i32, %arg1: i32) -> (i32, i32, i32) {
    %c0_i32 = arith.constant 0 : i32
    %c0_i32_0 = arith.constant 0 : i32
    %c0_i32_1 = arith.constant 0 : i32
    return %arg0, %c0_i32, %c0_i32_0 : i32, i32, i32
  }
  func.func @transform_2(%arg0: i32, %arg1: i32) -> (i32, i32, i32) {
    %c0_i32 = arith.constant 0 : i32
    %c0_i32_0 = arith.constant 0 : i32
    return %arg0, %arg1, %c0_i32 : i32, i32, i32
  }
}

module attributes {stable_mosaic.version = 11 : i64} {
  func.func @_phase_mm_act_kernel(%arg0: i32, %arg1: i32, %arg2: memref<1x512x256xbf16, #tpu.memory_space<vmem>>, %arg3: memref<1x256x128xbf16, #tpu.memory_space<vmem>>, %arg4: memref<1x512x128xf32, #tpu.memory_space<vmem>>) attributes {dimension_semantics = [#tpu.dimension_semantics<parallel>, #tpu.dimension_semantics<parallel>], iteration_bounds = array<i64: 4, 1>, scalar_prefetch = 0 : i64, scratch_operands = 0 : i64, tpu.core_type = #tpu.core_type<tc>, window_params = [{transform_indices = @transform_0, window_bounds = array<i64: 1, 512, 256>}, {transform_indices = @transform_1, window_bounds = array<i64: 1, 256, 128>}, {transform_indices = @transform_2, window_bounds = array<i64: 1, 512, 128>}]} {
    %c0 = arith.constant 0 : index
    %c0_0 = arith.constant 0 : index
    %c0_1 = arith.constant 0 : index
    %0 = vector.load %arg2[%c0, %c0_0, %c0_1] : memref<1x512x256xbf16, #tpu.memory_space<vmem>>, vector<1x512x256xbf16>
    %1 = vector.shape_cast %0 : vector<1x512x256xbf16> to vector<512x256xbf16>
    %c0_2 = arith.constant 0 : index
    %c0_3 = arith.constant 0 : index
    %c0_4 = arith.constant 0 : index
    %2 = vector.load %arg3[%c0_2, %c0_3, %c0_4] : memref<1x256x128xbf16, #tpu.memory_space<vmem>>, vector<1x256x128xbf16>
    %3 = vector.shape_cast %2 : vector<1x256x128xbf16> to vector<256x128xbf16>
    %cst = arith.constant dense<0.000000e+00> : vector<512x128xf32>
    %4 = tpu.matmul %1, %3, %cst {dimension_numbers = #tpu.dot_dimension_numbers<[1], [0], [0], [1], [0, 0, 1, 1], [], []>} : vector<512x256xbf16>, vector<256x128xbf16>, vector<512x128xf32> -> vector<512x128xf32>
    %5 = math.tanh %4 : vector<512x128xf32>
    %c0_5 = arith.constant 0 : index
    %c0_6 = arith.constant 0 : index
    %c0_7 = arith.constant 0 : index
    %6 = vector.load %arg4[%c0_5, %c0_6, %c0_7] : memref<1x512x128xf32, #tpu.memory_space<vmem>>, vector<1x512x128xf32>
    %7 = vector.shape_cast %6 : vector<1x512x128xf32> to vector<512x128xf32>
    %8 = vector.shape_cast %5 : vector<512x128xf32> to vector<1x512x128xf32>
    tpu.vector_store %arg4[%c0_5, %c0_6, %c0_7], %8 {strides = array<i32>} : memref<1x512x128xf32, #tpu.memory_space<vmem>>, vector<1x512x128xf32>,
    return
  }
  func.func @transform_0(%arg0: i32, %arg1: i32) -> (i32, i32, i32) {
    %c0_i32 = arith.constant 0 : i32
    %c0_i32_0 = arith.constant 0 : i32
    return %arg0, %arg1, %c0_i32 : i32, i32, i32
  }
  func.func @transform_1(%arg0: i32, %arg1: i32) -> (i32, i32, i32) {
    %c0_i32 = arith.constant 0 : i32
    %c0_i32_0 = arith.constant 0 : i32
    %c0_i32_1 = arith.constant 0 : i32
    return %arg0, %c0_i32, %c0_i32_0 : i32, i32, i32
  }
  func.func @transform_2(%arg0: i32, %arg1: i32) -> (i32, i32, i32) {
    %c0_i32 = arith.constant 0 : i32
    %c0_i32_0 = arith.constant 0 : i32
    return %arg0, %arg1, %c0_i32 : i32, i32, i32
  }
}

</mosaic_0001>

<bundles_post_ra>
// kernel: g_svhn_forward.8
= control target key start
LH: loop header
LB: loop body
LE: loop exit
PB: predicated region body
PF: predicated region fallthrough
CT: control target
= control target key end

     0   :  { %s361_s12 = smov 0   ;;  %s391_s0 = inlined_call_operand.vmem [shape: f32[4,2,448], index: 0, kind: input, shape index: {}]   ;;  %s392_s1 = inlined_call_operand.vmem [shape: f32[1,448], index: 1, kind: input, shape index: {}]   ;;  %s393_s2 = inlined_call_operand.vmem [shape: f32[1,448], index: 2, kind: input, shape index: {}]   ;;  %s394_s3 = inlined_call_operand.vmem [shape: f32[4,2,448], index: 3, kind: output, shape index: {}]  }
   0x1 LB: > { %s310_s13 = sadd.s32 4294967295, %s338_s12   ;;  %p314_p0 = scmp.ge.s32.totalorder %s338_s12, 1  ;;  %s338_s12 = sphi %s361_s12, %s13_s12  }
   0x2   : > { %p137_p1 = scmp.lt.s32.totalorder %s338_s12, 5 }
   0x4   : > { %p138_p2 = pnand %p314_p0, %p137_p1 }
   0x5   : > { %p161_p3 = scmp.lt.s32.totalorder (!%p138_p2), %s310_s13, 3 }
   0x6   : > { %141 = sbr.rel (%p138_p2) target bundleno = 32 (0x20), region = 32 }
   0xb   : > { %v174_v0 = vlaneseq  ;;  %v340_v1 = vmov 1983009808   ;;  %s396_s13 = smov (!%p161_p3, %s310_s13), 3  ;;  %v172_v4 = vld [vmem:[%s392_s1] sm:$0xf]  ;;  %vm247_vm0 = vcmask 1041408  }
   0xc   : > { %v193_v2 = vunpack.c.l.s4 %v340_v1  ;;  %v209_v10 = vld [vmem:[%s393_s2] sm:$0xf]  ;;  %s321_s18 = sshll.u32 %s396_s13, 3  ;;  %vm248_vm1 = vcmask 1043458   ;;  %vm250_vm3 = vcmask 1045508   ;;  %vm252_vm5 = vcmask 523270  }
   0xd   : > { %v175_v3 = vshrl.u32 %v174_v0, 7  ;;  %s165_s21 = scalar_lea.vmem %s391_s0, %s321_s18  ;;  %vm249_vm2 = vmor %vm248_vm1, %vm247_vm0  ;;  %s170_s24 = scalar_lea.vmem %s394_s3, %s321_s18 }
   0xe   : > { %v194_v5 = vunpack.c.0.s8 %v193_v2  ;;  %v171_v26 = vld [vmem:[%s165_s21] sm:$0xff]  ;;  %vm251_vm4 = vmor %vm250_vm3, %vm249_vm2 }
   0xf   : > { %v176_v6 = vsub.s32 0, %v175_v3  ;;  %v180_v7 = vsub.s32 1, %v175_v3  ;;  %v184_v8 = vsub.s32 2, %v175_v3  ;;  %v188_v9 = vsub.s32 3, %v175_v3  ;;  %vm253_vm6 = vmor %vm252_vm5, %vm251_vm4 }
  0x10   : > { %v197_v11 = vsub.s32 %v194_v5, %v175_v3 }
  0x11   : > { %v177_v12 = vrot.slane %v172_v4, %v176_v6  ;;  %v181_v13 = vrot.slane %v172_v4, %v180_v7  ;;  %v185_v14 = vrot.slane %v172_v4, %v184_v8  ;;  %v189_v15 = vrot.slane %v172_v4, %v188_v9 }
  0x12   : > { %v214_v16 = vrot.slane %v209_v10, %v176_v6  ;;  %v218_v17 = vrot.slane %v209_v10, %v180_v7  ;;  %v222_v18 = vrot.slane %v209_v10, %v184_v8  ;;  %v226_v19 = vrot.slane %v209_v10, %v188_v9 }
  0x13   : > { %v190_v20 = vcombine.low %v177_v12, %v181_v13  ;;  %v191_v21 = vcombine.low %v185_v14, %v189_v15 }
  0x14   : > { %v227_v22 = vcombine.low %v214_v16, %v218_v17  ;;  %v228_v23 = vcombine.low %v222_v18, %v226_v19 }
  0x15   : > { %v198_v24 = vrot.slane %v190_v20, %v197_v11  ;;  %v205_v25 = vrot.slane %v191_v21, %v197_v11 }
  0x16   : > { %v235_v27 = vrot.slane %v227_v22, %v197_v11  ;;  %v242_v28 = vrot.slane %v228_v23, %v197_v11 }
  0x17   : > { %v206_v29 = vcombine.low %v198_v24, %v205_v25 }
  0x18   : > { %v243_v30 = vcombine.low %v235_v27, %v242_v28 }
  0x19   : > { %v208_v31 = vmul.f32 %v206_v29, %v171_v26 }
  0x1b   : > { %v245_v32 = vadd.f32 %v243_v30, %v208_v31 }
  0x1d   : > { %v246_v33 = vmax.f32 %v245_v32, 0.0 }
  0x1f   : > { %254 = vst.msk [vmem:[%s170_s24] sm:$0xff] %vm253_vm6, %v246_v33 }
  0x20 PF: > { %s13_s12 = sadd.s32 1, %s338_s12  }
  0x21   : > { %p10_p4 = scmp.ge.s32.totalorder %s13_s12, 6  }
  0x23   :  { %12 = sbr.rel (!%p10_p4) target bundleno = 1 (0x1), region = 62 }

// kernel: g_svhn_forward.9
= control target key start
LH: loop header
LB: loop body
LE: loop exit
PB: predicated region body
PF: predicated region fallthrough
CT: control target
= control target key end

     0   :  { %10 = vsyncpa [#allocation3], 0  ;;  %s2164_s0 = inlined_call_operand.vmem [shape: f32[4,8,1792], index: 0, kind: input, shape index: {}]   ;;  %s2165_s1 = inlined_call_operand.hbm [shape: f32[4,1792,256], index: 1, kind: input, shape index: {}]   ;;  %s2166_s2 = inlined_call_operand.vmem [shape: f32[4,8,256], index: 2, kind: output, shape index: {0}]   ;;  %s2167_s3 = inlined_call_operand.vmem [shape: f32[4,1,256], index: 3, kind: output, shape index: {1}]   ;;  %s2168_s4 = inlined_call_operand.vmem [shape: f32[4,1,256], index: 4, kind: output, shape index: {2}]  }
   0x1   :  { %12 = vsyncpa [#allocation3 + $0x1], 0  ;;  %s1581_s15 = smov 0   ;;  %s1583_s16 = smov 0  }
   0x2   :  { %s1585_s17 = smov 0   ;;  %s1587_s18 = smov 0  }
   0x3 LB: > { %s1600_s19 = sadd.s32 4294967295, %s1550_s18   ;;  %s1603_s20 = sadd.s32 1, %s1550_s18   ;;  %s1550_s18 = sphi %s1587_s18, %s2177_s18   ;;  %s1546_s17 = sphi %s1585_s17, %s2176_s17   ;;  %s1542_s16 = sphi %s1583_s16, %s2175_s16   ;;  %s1538_s15 = sphi %s1581_s15, %s2174_s15  }
   0x4   : > { %s48_s21 = ssub.s32 %s1550_s18, %s1603_s20  ;;  %s51_s22 = sadd.s32 1, %s1546_s17 }
   0x5   : > { %p49_p0 = scmp.eq.s32.totalorder %s48_s21, 0  ;;  %p58_p1 = scmp.ne.s32.totalorder %s1546_s17, %s1542_s16 }
   0x6   : > { %p59_p2 = scmp.eq.s32.totalorder %s1550_s18, 0  ;;  %p64_p3 = scmp.ne.s32.totalorder %s1542_s16, %s1538_s15 }
   0x7   : > { %s1613_s23 = scalar_select %p49_p0, %s1546_s17, %s51_s22  }
   0x8   : > { %p60_p4 = por %p59_p2, %p58_p1  ;;  %p65_p5 = scmp.eq.s32.totalorder %s1600_s19, 0 }
   0x9   : > { %p1452_p6 = scmp.lt.s32.totalorder %s1550_s18, 4  ;;  %s174_s25 = sand.u32 1, %s1546_s17  }
   0xa   : > { %p1617_p7 = por %p65_p5, %p64_p3  ;;  %s1442_s26 = smul.u32 3584, %s174_s25 }
   0xb   : > { %s1443_s27 = smul.u32 57344, %s1550_s18  ;;  %p1623_p8 = pnand %p1452_p6, %p60_p4 }
   0xc   : > { %s2170_s24 = scalar_select %p1617_p7, 1, 0 }
   0xd   : > { %s1630_s5 = scalar_lea.hbm %s2165_s1, %s1443_s27  ;;  %s178_s6 = scalar_lea.vmem [#allocation2], %s1442_s26 }
   0xe   : > { %s185_s7 = sshll.u32 %s178_s6, 4  ;;  %s1635_s8 = scalar_lea.sflag [#allocation3], %s174_s25  ;;  %s1632_s7 = int_to_ptr.vmem [resolvable:$true] %s185_s7 }
   0xf   : > { %s1488_s9 = scalar_lea.hbm %s1630_s5, 57344  ;;  %p1490_p11 = pneg %p1623_p8 }
  0x10   : > { %p1489_p10 = scmp.ne.s32.totalorder %s1630_s5, %s1488_s9  ;;  %s1493_s12 = scalar_lea.hbm %s2165_s1, 229376 }
  0x11   : > { %p1494_p0 = scmp.lt.s32.totalorder %s1630_s5, %s2165_s1  ;;  %p1495_p1 = scmp.lt.s32.totalorder %s1493_s12, %s1488_s9 }
  0x12   : > { %p1491_p12 = pnand %p1490_p11, %p1489_p10 }
  0x13   : > { %p1496_p2 = por %p1495_p1, %p1494_p0 }
  0x14   : > { %p1492_p13 = pneg %p1491_p12 }
  0x16   : > { %p1497_p3 = pnand %p1496_p2, %p1492_p13 }
  0x18   : > { %1500 = shalt.err (!%p1497_p3)
}
  0x19   : > { %s1501_s15 = scalar_lea.vmem %s1632_s7, 57344  ;;  %s1552_s21 = smov [#allocation2]  }
  0x1a   : > { %p1502_p4 = scmp.ne.s32.totalorder %s1632_s7, %s1501_s15  ;;  %s1506_s22 = sshll.u32 %s1552_s21, 4  ;;  %s1507_s22 = int_to_ptr.vmem [resolvable:$false] %s1506_s22 }
  0x1b   : > { %s1508_s25 = scalar_lea.vmem %s1507_s22, 114688  ;;  %p1509_p10 = scmp.lt.s32.totalorder %s1632_s7, %s1507_s22 }
  0x1c   : > { %p1504_p5 = pnand %p1502_p4, %p1490_p11  ;;  %p1510_p12 = scmp.lt.s32.totalorder %s1508_s25, %s1501_s15 }
  0x1e   : > { %p1505_p6 = pneg %p1504_p5  ;;  %p1511_p9 = por %p1510_p12, %p1509_p10 }
  0x20   : > { %p1512_p7 = pnand %p1511_p9, %p1505_p6 }
  0x22   : > { %1515 = shalt.err (!%p1512_p7)
}
  0x23   : > { %s1553_s26 = smov 256   ;;  %s1554_s27 = smov 16  }
  0x24   : > { %1451 = dma.hbm_to_vmem [thread:$0]  (!%p1623_p8), %s1630_s5, 57344, %s1632_s7, %s1635_s8, %s1553_s26, %s1553_s26, %s1554_s27  }
  0x25   : > { %p193_p11 = scmp.lt.s32.totalorder %s1550_s18, 5  ;;  %p2172_p13 = scmp.ge.s32.totalorder %s1550_s18, 1 }
  0x27   : > { %p194_p0 = pnand %p2172_p13, %p193_p11 }
  0x28   : > { %s199_s29 = sand.u32 (!%p194_p0), 1, %s1542_s16   ;;  %p2173_p7 = scmp.ne.s32.totalorder (!%p194_p0), %s2170_s24, 0 }
  0x29   : > { %197 = sbr.rel (%p194_p0) target bundleno = 527 (0x20f), region = 28  ;;  %s200_s6 = scalar_lea.sflag (!%p194_p0), [#allocation3], %s199_s29 }
  0x2a   : > { %s1444_s30 = smul.u32 (!%p194_p0), 3584, %s199_s29 }
  0x2c   : > { %s1660_s9 = scalar_lea.vmem (!%p194_p0), [#allocation2], %s1444_s30 }
  0x2e   : > { %1533 = dma.done.wait (%p2173_p7), %s200_s6, 57344  }
  0x2f   : > { %1535 = vsyncadd (%p2173_p7), %s200_s6, 4294909952  ;;  %v304_v0 = vld [vmem:[%s1660_s9 + $0xf8] sm:$0xff]  ;;  %v303_v2 = vld [vmem:[%s1660_s9 + $0xf0] sm:$0xff]  ;;  %p241_p8 = scmp.lt.s32.totalorder %s1600_s19, 3 }
  0x30   : > { %v368_v1 = vld [vmem:[%s1660_s9 + $0x2f8] sm:$0xff]  ;;  %721 = vmatprep.subr.mxu0 %v304_v0  ;;  %v367_v3 = vld [vmem:[%s1660_s9 + $0x2f0] sm:$0xff]  ;;  %v302_v4 = vld [vmem:[%s1660_s9 + $0xe8] sm:$0xff] }
  0x31   : > { %792 = vmatprep.subr.mxu1 %v368_v1  ;;  %v366_v5 = vld [vmem:[%s1660_s9 + $0x2e8] sm:$0xff]  ;;  %722 = vmatpush1.msra.mxu0 %v303_v2  ;;  %v301_v6 = vld [vmem:[%s1660_s9 + $0xe0] sm:$0xff]  ;;  %v300_v8 = vld [vmem:[%s1660_s9 + $0xd8] sm:$0xff]  ;;  %s2179_s19 = smov (!%p241_p8, %s1600_s19), 3 }
  0x32   : > { %793 = vmatpush1.msra.mxu1 %v367_v3  ;;  %v365_v7 = vld [vmem:[%s1660_s9 + $0x2e0] sm:$0xff]  ;;  %723 = vmatprep.subr.mxu0 %v302_v4  ;;  %v364_v9 = vld [vmem:[%s1660_s9 + $0x2d8] sm:$0xff]  ;;  %v299_v10 = vld [vmem:[%s1660_s9 + $0xd0] sm:$0xff]  ;;  %s1445_s18 = smul.u32 112, %s2179_s19  ;;  %s1441_s7 = sshll.u32 %s2179_s19, 4 }
  0x33   : > { %794 = vmatprep.subr.mxu1 %v366_v5  ;;  %v363_v11 = vld [vmem:[%s1660_s9 + $0x2d0] sm:$0xff]  ;;  %724 = vmatpush1.msra.mxu0 %v301_v6  ;;  %v298_v12 = vld [vmem:[%s1660_s9 + $0xc8] sm:$0xff]  ;;  %v297_v14 = vld [vmem:[%s1660_s9 + $0xc0] sm:$0xff]  ;;  %s250_s11 = scalar_lea.vmem %s2166_s2, %s1441_s7  ;;  %s1437_s12 = sshll.u32 %s2179_s19, 1 }
  0x34   : > { %795 = vmatpush1.msra.mxu1 %v365_v7  ;;  %v362_v13 = vld [vmem:[%s1660_s9 + $0x2c8] sm:$0xff]  ;;  %725 = vmatprep.subr.mxu0 %v300_v8  ;;  %v361_v15 = vld [vmem:[%s1660_s9 + $0x2c0] sm:$0xff]  ;;  %v296_v16 = vld [vmem:[%s1660_s9 + $0xb8] sm:$0xff]  ;;  %s1798_s5 = scalar_lea.vmem %s2164_s0, %s1445_s18  ;;  %s254_s15 = scalar_lea.vmem %s2167_s3, %s1437_s12 }
  0x35   : > { %796 = vmatprep.subr.mxu1 %v364_v9  ;;  %726 = vmatpush1.msra.mxu0 %v299_v10  ;;  %v360_v17 = vld [vmem:[%s1660_s9 + $0x2b8] sm:$0xff]  ;;  %v295_v18 = vld [vmem:[%s1660_s9 + $0xb0] sm:$0xff]  ;;  %v294_v20 = vld [vmem:[%s1660_s9 + $0xa8] sm:$0xff]  ;;  %s258_s25 = scalar_lea.vmem %s2168_s4, %s1437_s12 }
  0x36   : > { %797 = vmatpush1.msra.mxu1 %v363_v11  ;;  %727 = vmatprep.subr.mxu0 %v298_v12  ;;  %v359_v19 = vld [vmem:[%s1660_s9 + $0x2b0] sm:$0xff]  ;;  %v358_v21 = vld [vmem:[%s1660_s9 + $0x2a8] sm:$0xff]  ;;  %v293_v22 = vld [vmem:[%s1660_s9 + $0xa0] sm:$0xff] }
  0x37   : > { %798 = vmatprep.subr.mxu1 %v362_v13  ;;  %728 = vmatpush1.msra.mxu0 %v297_v14  ;;  %v357_v23 = vld [vmem:[%s1660_s9 + $0x2a0] sm:$0xff]  ;;  %v292_v24 = vld [vmem:[%s1660_s9 + $0x98] sm:$0xff]  ;;  %v291_v26 = vld [vmem:[%s1660_s9 + $0x90] sm:$0xff] }
  0x38   : > { %799 = vmatpush1.msra.mxu1 %v361_v15  ;;  %729 = vmatprep.subr.mxu0 %v296_v16  ;;  %v356_v25 = vld [vmem:[%s1660_s9 + $0x298] sm:$0xff]  ;;  %v355_v27 = vld [vmem:[%s1660_s9 + $0x290] sm:$0xff]  ;;  %v290_v28 = vld [vmem:[%s1660_s9 + $0x88] sm:$0xff] }
  0x39   : > { %800 = vmatprep.subr.mxu1 %v360_v17  ;;  %730 = vmatpush1.msra.mxu0 %v295_v18  ;;  %v354_v29 = vld [vmem:[%s1660_s9 + $0x288] sm:$0xff]  ;;  %v289_v30 = vld [vmem:[%s1660_s9 + $0x80] sm:$0xff]  ;;  %v288_v32 = vld [vmem:[%s1660_s9 + $0x78] sm:$0xff] }
  0x3a   : > { %801 = vmatpush1.msra.mxu1 %v359_v19  ;;  %731 = vmatprep.subr.mxu0 %v294_v20  ;;  %v353_v31 = vld [vmem:[%s1660_s9 + $0x280] sm:$0xff]  ;;  %v352_v33 = vld [vmem:[%s1660_s9 + $0x278] sm:$0xff]  ;;  %v287_v34 = vld [vmem:[%s1660_s9 + $0x70] sm:$0xff] }
  0x3b   : > { %802 = vmatprep.subr.mxu1 %v358_v21  ;;  %732 = vmatpush1.msra.mxu0 %v293_v22  ;;  %v351_v35 = vld [vmem:[%s1660_s9 + $0x270] sm:$0xff]  ;;  %v286_v36 = vld [vmem:[%s1660_s9 + $0x68] sm:$0xff]  ;;  %v285_v38 = vld [vmem:[%s1660_s9 + $0x60] sm:$0xff] }
  0x3c   : > { %803 = vmatpush1.msra.mxu1 %v357_v23  ;;  %733 = vmatprep.subr.mxu0 %v292_v24  ;;  %v350_v37 = vld [vmem:[%s1660_s9 + $0x268] sm:$0xff]  ;;  %v349_v39 = vld [vmem:[%s1660_s9 + $0x260] sm:$0xff]  ;;  %v284_v40 = vld [vmem:[%s1660_s9 + $0x58] sm:$0xff] }
  0x3d   : > { %804 = vmatprep.subr.mxu1 %v356_v25  ;;  %734 = vmatpush1.msra.mxu0 %v291_v26  ;;  %v348_v41 = vld [vmem:[%s1660_s9 + $0x258] sm:$0xff]  ;;  %v283_v42 = vld [vmem:[%s1660_s9 + $0x50] sm:$0xff]  ;;  %v282_v44 = vld [vmem:[%s1660_s9 + $0x48] sm:$0xff] }
  0x3e   : > { %805 = vmatpush1.msra.mxu1 %v355_v27  ;;  %735 = vmatprep.subr.mxu0 %v290_v28  ;;  %v347_v43 = vld [vmem:[%s1660_s9 + $0x250] sm:$0xff]  ;;  %v346_v45 = vld [vmem:[%s1660_s9 + $0x248] sm:$0xff]  ;;  %v281_v46 = vld [vmem:[%s1660_s9 + $0x40] sm:$0xff] }
  0x3f   : > { %806 = vmatprep.subr.mxu1 %v354_v29  ;;  %736 = vmatpush1.msra.mxu0 %v289_v30  ;;  %v345_v47 = vld [vmem:[%s1660_s9 + $0x240] sm:$0xff]  ;;  %v280_v48 = vld [vmem:[%s1660_s9 + $0x38] sm:$0xff]  ;;  %v279_v50 = vld [vmem:[%s1660_s9 + $0x30] sm:$0xff] }
  0x40   : > { %807 = vmatpush1.msra.mxu1 %v353_v31  ;;  %737 = vmatprep.subr.mxu0 %v288_v32  ;;  %v344_v49 = vld [vmem:[%s1660_s9 + $0x238] sm:$0xff]  ;;  %v343_v51 = vld [vmem:[%s1660_s9 + $0x230] sm:$0xff]  ;;  %v278_v52 = vld [vmem:[%s1660_s9 + $0x28] sm:$0xff] }
  0x41   : > { %808 = vmatprep.subr.mxu1 %v352_v33  ;;  %738 = vmatpush1.msra.mxu0 %v287_v34  ;;  %v342_v53 = vld [vmem:[%s1660_s9 + $0x228] sm:$0xff]  ;;  %v277_v54 = vld [vmem:[%s1660_s9 + $0x20] sm:$0xff]  ;;  %v276_v56 = vld [vmem:[%s1660_s9 + $0x18] sm:$0xff] }
  0x42   : > { %809 = vmatpush1.msra.mxu1 %v351_v35  ;;  %739 = vmatprep.subr.mxu0 %v286_v36  ;;  %v341_v55 = vld [vmem:[%s1660_s9 + $0x220] sm:$0xff]  ;;  %v340_v57 = vld [vmem:[%s1660_s9 + $0x218] sm:$0xff]  ;;  %v275_v58 = vld [vmem:[%s1660_s9 + $0x10] sm:$0xff] }
  0x43   : > { %810 = vmatprep.subr.mxu1 %v350_v37  ;;  %740 = vmatpush1.msra.mxu0 %v285_v38  ;;  %v339_v59 = vld [vmem:[%s1660_s9 + $0x210] sm:$0xff]  ;;  %v274_v60 = vld [vmem:[%s1660_s9 + $0x8] sm:$0xff]  ;;  %v273_v62 = vld [vmem:[%s1660_s9] sm:$0xff] }
  0x44   : > { %811 = vmatpush1.msra.mxu1 %v349_v39  ;;  %741 = vmatprep.subr.mxu0 %v284_v40  ;;  %v338_v61 = vld [vmem:[%s1660_s9 + $0x208] sm:$0xff]  ;;  %v337_v63 = vld [vmem:[%s1660_s9 + $0x200] sm:$0xff]  ;;  %v336_v0 = vld [vmem:[%s1660_s9 + $0x1f8] sm:$0xff] }
  0x45   : > { %812 = vmatprep.subr.mxu1 %v348_v41  ;;  %742 = vmatpush1.msra.mxu0 %v283_v42  ;;  %v400_v1 = vld [vmem:[%s1660_s9 + $0x3f8] sm:$0xff]  ;;  %v335_v2 = vld [vmem:[%s1660_s9 + $0x1f0] sm:$0xff]  ;;  %v334_v4 = vld [vmem:[%s1660_s9 + $0x1e8] sm:$0xff] }
  0x46   : > { %813 = vmatpush1.msra.mxu1 %v347_v43  ;;  %743 = vmatprep.subr.mxu0 %v282_v44  ;;  %v399_v3 = vld [vmem:[%s1660_s9 + $0x3f0] sm:$0xff]  ;;  %v398_v5 = vld [vmem:[%s1660_s9 + $0x3e8] sm:$0xff]  ;;  %v333_v6 = vld [vmem:[%s1660_s9 + $0x1e0] sm:$0xff] }
  0x47   : > { %814 = vmatprep.subr.mxu1 %v346_v45  ;;  %744 = vmatpush1.msra.mxu0 %v281_v46  ;;  %v397_v7 = vld [vmem:[%s1660_s9 + $0x3e0] sm:$0xff]  ;;  %v332_v8 = vld [vmem:[%s1660_s9 + $0x1d8] sm:$0xff]  ;;  %v331_v10 = vld [vmem:[%s1660_s9 + $0x1d0] sm:$0xff] }
  0x48   : > { %815 = vmatpush1.msra.mxu1 %v345_v47  ;;  %745 = vmatprep.subr.mxu0 %v280_v48  ;;  %v396_v9 = vld [vmem:[%s1660_s9 + $0x3d8] sm:$0xff]  ;;  %v395_v11 = vld [vmem:[%s1660_s9 + $0x3d0] sm:$0xff]  ;;  %v330_v12 = vld [vmem:[%s1660_s9 + $0x1c8] sm:$0xff] }
  0x49   : > { %816 = vmatprep.subr.mxu1 %v344_v49  ;;  %746 = vmatpush1.msra.mxu0 %v279_v50  ;;  %v394_v13 = vld [vmem:[%s1660_s9 + $0x3c8] sm:$0xff]  ;;  %v329_v14 = vld [vmem:[%s1660_s9 + $0x1c0] sm:$0xff]  ;;  %v328_v16 = vld [vmem:[%s1660_s9 + $0x1b8] sm:$0xff] }
  0x4a   : > { %817 = vmatpush1.msra.mxu1 %v343_v51  ;;  %747 = vmatprep.subr.mxu0 %v278_v52  ;;  %v393_v15 = vld [vmem:[%s1660_s9 + $0x3c0] sm:$0xff]  ;;  %v392_v17 = vld [vmem:[%s1660_s9 + $0x3b8] sm:$0xff]  ;;  %v327_v18 = vld [vmem:[%s1660_s9 + $0x1b0] sm:$0xff] }
  0x4b   : > { %818 = vmatprep.subr.mxu1 %v342_v53  ;;  %748 = vmatpush1.msra.mxu0 %v277_v54  ;;  %v391_v19 = vld [vmem:[%s1660_s9 + $0x3b0] sm:$0xff]  ;;  %v326_v20 = vld [vmem:[%s1660_s9 + $0x1a8] sm:$0xff]  ;;  %v325_v22 = vld [vmem:[%s1660_s9 + $0x1a0] sm:$0xff] }
  0x4c   : > { %819 = vmatpush1.msra.mxu1 %v341_v55  ;;  %749 = vmatprep.subr.mxu0 %v276_v56  ;;  %v390_v21 = vld [vmem:[%s1660_s9 + $0x3a8] sm:$0xff]  ;;  %v389_v23 = vld [vmem:[%s1660_s9 + $0x3a0] sm:$0xff]  ;;  %v324_v24 = vld [vmem:[%s1660_s9 + $0x198] sm:$0xff] }
  0x4d   : > { %820 = vmatprep.subr.mxu1 %v340_v57  ;;  %750 = vmatpush1.msra.mxu0 %v275_v58  ;;  %v388_v25 = vld [vmem:[%s1660_s9 + $0x398] sm:$0xff]  ;;  %v323_v26 = vld [vmem:[%s1660_s9 + $0x190] sm:$0xff]  ;;  %v322_v28 = vld [vmem:[%s1660_s9 + $0x188] sm:$0xff] }
  0x4e   : > { %821 = vmatpush1.msra.mxu1 %v339_v59  ;;  %751 = vmatprep.subr.mxu0 %v274_v60  ;;  %v387_v27 = vld [vmem:[%s1660_s9 + $0x390] sm:$0xff]  ;;  %v386_v29 = vld [vmem:[%s1660_s9 + $0x388] sm:$0xff]  ;;  %v321_v30 = vld [vmem:[%s1660_s9 + $0x180] sm:$0xff] }
  0x4f   : > { %822 = vmatprep.subr.mxu1 %v338_v61  ;;  %752 = vmatpush1.msra.mxu0 %v273_v62  ;;  %v385_v31 = vld [vmem:[%s1660_s9 + $0x380] sm:$0xff]  ;;  %v320_v32 = vld [vmem:[%s1660_s9 + $0x178] sm:$0xff]  ;;  %v319_v34 = vld [vmem:[%s1660_s9 + $0x170] sm:$0xff] }
  0x50   : > { %823 = vmatpush1.msra.mxu1 %v337_v63  ;;  %753 = vmatprep.subr.mxu0 %v336_v0  ;;  %v384_v33 = vld [vmem:[%s1660_s9 + $0x378] sm:$0xff]  ;;  %v383_v35 = vld [vmem:[%s1660_s9 + $0x370] sm:$0xff]  ;;  %v318_v36 = vld [vmem:[%s1660_s9 + $0x168] sm:$0xff] }
  0x51   : > { %824 = vmatprep.subr.mxu1 %v400_v1  ;;  %754 = vmatpush2.msra.mxu0 %v335_v2  ;;  %v382_v37 = vld [vmem:[%s1660_s9 + $0x368] sm:$0xff]  ;;  %v317_v38 = vld [vmem:[%s1660_s9 + $0x160] sm:$0xff]  ;;  %v316_v40 = vld [vmem:[%s1660_s9 + $0x158] sm:$0xff] }
  0x52   : > { %825 = vmatpush2.msra.mxu1 %v399_v3  ;;  %755 = vmatprep.subr.mxu0 %v334_v4  ;;  %v381_v39 = vld [vmem:[%s1660_s9 + $0x360] sm:$0xff]  ;;  %v380_v41 = vld [vmem:[%s1660_s9 + $0x358] sm:$0xff]  ;;  %v315_v42 = vld [vmem:[%s1660_s9 + $0x150] sm:$0xff] }
  0x53   : > { %826 = vmatprep.subr.mxu1 %v398_v5  ;;  %756 = vmatpush2.msra.mxu0 %v333_v6  ;;  %v379_v43 = vld [vmem:[%s1660_s9 + $0x350] sm:$0xff]  ;;  %v314_v44 = vld [vmem:[%s1660_s9 + $0x148] sm:$0xff]  ;;  %v313_v46 = vld [vmem:[%s1660_s9 + $0x140] sm:$0xff] }
  0x54   : > { %827 = vmatpush2.msra.mxu1 %v397_v7  ;;  %757 = vmatprep.subr.mxu0 %v332_v8  ;;  %v378_v45 = vld [vmem:[%s1660_s9 + $0x348] sm:$0xff]  ;;  %v377_v47 = vld [vmem:[%s1660_s9 + $0x340] sm:$0xff]  ;;  %v312_v48 = vld [vmem:[%s1660_s9 + $0x138] sm:$0xff] }
  0x55   : > { %828 = vmatprep.subr.mxu1 %v396_v9  ;;  %758 = vmatpush2.msra.mxu0 %v331_v10  ;;  %v376_v49 = vld [vmem:[%s1660_s9 + $0x338] sm:$0xff]  ;;  %v311_v50 = vld [vmem:[%s1660_s9 + $0x130] sm:$0xff]  ;;  %v310_v52 = vld [vmem:[%s1660_s9 + $0x128] sm:$0xff] }
  0x56   : > { %829 = vmatpush2.msra.mxu1 %v395_v11  ;;  %759 = vmatprep.subr.mxu0 %v330_v12  ;;  %v375_v51 = vld [vmem:[%s1660_s9 + $0x330] sm:$0xff]  ;;  %v374_v53 = vld [vmem:[%s1660_s9 + $0x328] sm:$0xff]  ;;  %v309_v54 = vld [vmem:[%s1660_s9 + $0x120] sm:$0xff] }
  0x57   : > { %830 = vmatprep.subr.mxu1 %v394_v13  ;;  %760 = vmatpush2.msra.mxu0 %v329_v14  ;;  %v373_v55 = vld [vmem:[%s1660_s9 + $0x320] sm:$0xff]  ;;  %v308_v56 = vld [vmem:[%s1660_s9 + $0x118] sm:$0xff]  ;;  %v307_v58 = vld [vmem:[%s1660_s9 + $0x110] sm:$0xff] }
  0x58   : > { %831 = vmatpush2.msra.mxu1 %v393_v15  ;;  %761 = vmatprep.subr.mxu0 %v328_v16  ;;  %v372_v57 = vld [vmem:[%s1660_s9 + $0x318] sm:$0xff]  ;;  %v371_v59 = vld [vmem:[%s1660_s9 + $0x310] sm:$0xff]  ;;  %v306_v60 = vld [vmem:[%s1660_s9 + $0x108] sm:$0xff] }
  0x59   : > { %832 = vmatprep.subr.mxu1 %v392_v17  ;;  %762 = vmatpush2.msra.mxu0 %v327_v18  ;;  %v370_v61 = vld [vmem:[%s1660_s9 + $0x308] sm:$0xff]  ;;  %v305_v62 = vld [vmem:[%s1660_s9 + $0x100] sm:$0xff]  ;;  %v262_v1 = vld [vmem:[%s1798_s5 + $0x18] sm:$0xff] }
  0x5a   : > { %833 = vmatpush2.msra.mxu1 %v391_v19  ;;  %763 = vmatprep.subr.mxu0 %v326_v20  ;;  %v260_v63 = vld [vmem:[%s1798_s5 + $0x8] sm:$0xff]  ;;  %v369_v0 = vld [vmem:[%s1660_s9 + $0x300] sm:$0xff]  ;;  %v261_v3 = vld [vmem:[%s1798_s5 + $0x10] sm:$0xff] }
  0x5b   : > { %834 = vmatprep.subr.mxu1 %v390_v21  ;;  %764 = vmatpush2.msra.mxu0 %v325_v22  ;;  %v259_v2 = vld [vmem:[%s1798_s5] sm:$0xff]  ;;  %v432_v4 = vld [vmem:[%s1660_s9 + $0x4f8] sm:$0xff]  ;;  %v431_v6 = vld [vmem:[%s1660_s9 + $0x4f0] sm:$0xff] }
  0x5c   : > { %835 = vmatpush2.msra.mxu1 %v389_v23  ;;  %765 = vmatprep.subr.mxu0 %v324_v24  ;;  %v496_v5 = vld [vmem:[%s1660_s9 + $0x6f8] sm:$0xff]  ;;  %v495_v7 = vld [vmem:[%s1660_s9 + $0x6f0] sm:$0xff]  ;;  %v430_v8 = vld [vmem:[%s1660_s9 + $0x4e8] sm:$0xff] }
  0x5d   : > { %836 = vmatprep.subr.mxu1 %v388_v25  ;;  %766 = vmatpush2.msra.mxu0 %v323_v26  ;;  %v494_v9 = vld [vmem:[%s1660_s9 + $0x6e8] sm:$0xff]  ;;  %v429_v10 = vld [vmem:[%s1660_s9 + $0x4e0] sm:$0xff]  ;;  %v428_v12 = vld [vmem:[%s1660_s9 + $0x4d8] sm:$0xff] }
  0x5e   : > { %837 = vmatpush2.msra.mxu1 %v387_v27  ;;  %767 = vmatprep.subr.mxu0 %v322_v28  ;;  %v493_v11 = vld [vmem:[%s1660_s9 + $0x6e0] sm:$0xff]  ;;  %v492_v13 = vld [vmem:[%s1660_s9 + $0x6d8] sm:$0xff]  ;;  %v427_v14 = vld [vmem:[%s1660_s9 + $0x4d0] sm:$0xff] }
  0x5f   : > { %838 = vmatprep.subr.mxu1 %v386_v29  ;;  %768 = vmatpush2.msra.mxu0 %v321_v30  ;;  %v491_v15 = vld [vmem:[%s1660_s9 + $0x6d0] sm:$0xff]  ;;  %v426_v16 = vld [vmem:[%s1660_s9 + $0x4c8] sm:$0xff]  ;;  %v425_v18 = vld [vmem:[%s1660_s9 + $0x4c0] sm:$0xff] }
  0x60   : > { %839 = vmatpush2.msra.mxu1 %v385_v31  ;;  %769 = vmatprep.subr.mxu0 %v320_v32  ;;  %v490_v17 = vld [vmem:[%s1660_s9 + $0x6c8] sm:$0xff]  ;;  %v489_v19 = vld [vmem:[%s1660_s9 + $0x6c0] sm:$0xff]  ;;  %v424_v20 = vld [vmem:[%s1660_s9 + $0x4b8] sm:$0xff] }
  0x61   : > { %840 = vmatprep.subr.mxu1 %v384_v33  ;;  %770 = vmatpush2.msra.mxu0 %v319_v34  ;;  %v488_v21 = vld [vmem:[%s1660_s9 + $0x6b8] sm:$0xff]  ;;  %v423_v22 = vld [vmem:[%s1660_s9 + $0x4b0] sm:$0xff]  ;;  %v422_v24 = vld [vmem:[%s1660_s9 + $0x4a8] sm:$0xff] }
  0x62   : > { %841 = vmatpush2.msra.mxu1 %v383_v35  ;;  %771 = vmatprep.subr.mxu0 %v318_v36  ;;  %v487_v23 = vld [vmem:[%s1660_s9 + $0x6b0] sm:$0xff]  ;;  %v486_v25 = vld [vmem:[%s1660_s9 + $0x6a8] sm:$0xff]  ;;  %v421_v26 = vld [vmem:[%s1660_s9 + $0x4a0] sm:$0xff] }
  0x63   : > { %842 = vmatprep.subr.mxu1 %v382_v37  ;;  %772 = vmatpush2.msra.mxu0 %v317_v38  ;;  %v485_v27 = vld [vmem:[%s1660_s9 + $0x6a0] sm:$0xff]  ;;  %v420_v28 = vld [vmem:[%s1660_s9 + $0x498] sm:$0xff]  ;;  %v419_v30 = vld [vmem:[%s1660_s9 + $0x490] sm:$0xff] }
  0x64   : > { %843 = vmatpush2.msra.mxu1 %v381_v39  ;;  %773 = vmatprep.subr.mxu0 %v316_v40  ;;  %v484_v29 = vld [vmem:[%s1660_s9 + $0x698] sm:$0xff]  ;;  %v483_v31 = vld [vmem:[%s1660_s9 + $0x690] sm:$0xff]  ;;  %v418_v32 = vld [vmem:[%s1660_s9 + $0x488] sm:$0xff] }
  0x65   : > { %844 = vmatprep.subr.mxu1 %v380_v41  ;;  %774 = vmatpush2.msra.mxu0 %v315_v42  ;;  %v482_v33 = vld [vmem:[%s1660_s9 + $0x688] sm:$0xff]  ;;  %v417_v34 = vld [vmem:[%s1660_s9 + $0x480] sm:$0xff]  ;;  %v416_v36 = vld [vmem:[%s1660_s9 + $0x478] sm:$0xff] }
  0x66   : > { %845 = vmatpush2.msra.mxu1 %v379_v43  ;;  %775 = vmatprep.subr.mxu0 %v314_v44  ;;  %v481_v35 = vld [vmem:[%s1660_s9 + $0x680] sm:$0xff]  ;;  %v480_v37 = vld [vmem:[%s1660_s9 + $0x678] sm:$0xff]  ;;  %v415_v38 = vld [vmem:[%s1660_s9 + $0x470] sm:$0xff] }
  0x67   : > { %846 = vmatprep.subr.mxu1 %v378_v45  ;;  %776 = vmatpush2.msra.mxu0 %v313_v46  ;;  %v479_v39 = vld [vmem:[%s1660_s9 + $0x670] sm:$0xff]  ;;  %v414_v40 = vld [vmem:[%s1660_s9 + $0x468] sm:$0xff]  ;;  %v413_v42 = vld [vmem:[%s1660_s9 + $0x460] sm:$0xff] }
  0x68   : > { %847 = vmatpush2.msra.mxu1 %v377_v47  ;;  %777 = vmatprep.subr.mxu0 %v312_v48  ;;  %v478_v41 = vld [vmem:[%s1660_s9 + $0x668] sm:$0xff]  ;;  %v477_v43 = vld [vmem:[%s1660_s9 + $0x660] sm:$0xff]  ;;  %v412_v44 = vld [vmem:[%s1660_s9 + $0x458] sm:$0xff] }
  0x69   : > { %848 = vmatprep.subr.mxu1 %v376_v49  ;;  %778 = vmatpush2.msra.mxu0 %v311_v50  ;;  %v476_v45 = vld [vmem:[%s1660_s9 + $0x658] sm:$0xff]  ;;  %v411_v46 = vld [vmem:[%s1660_s9 + $0x450] sm:$0xff]  ;;  %v410_v48 = vld [vmem:[%s1660_s9 + $0x448] sm:$0xff] }
  0x6a   : > { %849 = vmatpush2.msra.mxu1 %v375_v51  ;;  %779 = vmatprep.subr.mxu0 %v310_v52  ;;  %v475_v47 = vld [vmem:[%s1660_s9 + $0x650] sm:$0xff]  ;;  %v474_v49 = vld [vmem:[%s1660_s9 + $0x648] sm:$0xff]  ;;  %v409_v50 = vld [vmem:[%s1660_s9 + $0x440] sm:$0xff] }
  0x6b   : > { %850 = vmatprep.subr.mxu1 %v374_v53  ;;  %780 = vmatpush2.msra.mxu0 %v309_v54  ;;  %v473_v51 = vld [vmem:[%s1660_s9 + $0x640] sm:$0xff]  ;;  %v408_v52 = vld [vmem:[%s1660_s9 + $0x438] sm:$0xff]  ;;  %v407_v54 = vld [vmem:[%s1660_s9 + $0x430] sm:$0xff] }
  0x6c   : > { %851 = vmatpush2.msra.mxu1 %v373_v55  ;;  %781 = vmatprep.subr.mxu0 %v308_v56  ;;  %v472_v53 = vld [vmem:[%s1660_s9 + $0x638] sm:$0xff]  ;;  %v471_v55 = vld [vmem:[%s1660_s9 + $0x630] sm:$0xff]  ;;  %v406_v56 = vld [vmem:[%s1660_s9 + $0x428] sm:$0xff] }
  0x6d   : > { %852 = vmatprep.subr.mxu1 %v372_v57  ;;  %782 = vmatpush2.msra.mxu0 %v307_v58  ;;  %v470_v57 = vld [vmem:[%s1660_s9 + $0x628] sm:$0xff]  ;;  %v405_v58 = vld [vmem:[%s1660_s9 + $0x420] sm:$0xff] }
  0x6e   : > { %853 = vmatpush2.msra.mxu1 %v371_v59  ;;  %783 = vmatprep.subr.mxu0 %v306_v60  ;;  %v469_v59 = vld [vmem:[%s1660_s9 + $0x620] sm:$0xff]  ;;  %v404_v60 = vld [vmem:[%s1660_s9 + $0x418] sm:$0xff] }
  0x6f   : > { %854 = vmatprep.subr.mxu1 %v370_v61  ;;  %784 = vmatpush2.msra.mxu0 %v305_v62  ;;  %v468_v61 = vld [vmem:[%s1660_s9 + $0x618] sm:$0xff]  ;;  %v403_v62 = vld [vmem:[%s1660_s9 + $0x410] sm:$0xff] }
  0x70   : > { %785 = vmatprep.mubr.f32.mxu0 %v260_v63  ;;  %855 = vmatpush2.msra.mxu1 %v369_v0  ;;  %v467_v63 = vld [vmem:[%s1660_s9 + $0x610] sm:$0xff]  ;;  %v402_v0 = vld [vmem:[%s1660_s9 + $0x408] sm:$0xff] }
  0x71   : > { %856 = vmatprep.mubr.f32.mxu1 %v262_v1  ;;  %786 = vmatmul.mubr.f32.vlgmr.msra.gmra.mxu0 %v259_v2  ;;  %v466_v1 = vld [vmem:[%s1660_s9 + $0x608] sm:$0xff]  ;;  %v401_v2 = vld [vmem:[%s1660_s9 + $0x400] sm:$0xff] }
  0x72   : > { %857 = vmatmul.mubr.f32.vlgmr.msra.gmra.mxu1 %v261_v3  ;;  %863 = vmatprep.subr.mxu0 %v432_v4  ;;  %v465_v3 = vld [vmem:[%s1660_s9 + $0x600] sm:$0xff]  ;;  %v464_v4 = vld [vmem:[%s1660_s9 + $0x5f8] sm:$0xff] }
  0x73   : > { %934 = vmatprep.subr.mxu1 %v496_v5  ;;  %864 = vmatpush1.msra.mxu0 %v431_v6  ;;  %v528_v5 = vld [vmem:[%s1660_s9 + $0x7f8] sm:$0xff]  ;;  %v463_v6 = vld [vmem:[%s1660_s9 + $0x5f0] sm:$0xff] }
  0x74   : > { %935 = vmatpush1.msra.mxu1 %v495_v7  ;;  %865 = vmatprep.subr.mxu0 %v430_v8  ;;  %v527_v7 = vld [vmem:[%s1660_s9 + $0x7f0] sm:$0xff]  ;;  %v462_v8 = vld [vmem:[%s1660_s9 + $0x5e8] sm:$0xff] }
  0x75   : > { %936 = vmatprep.subr.mxu1 %v494_v9  ;;  %866 = vmatpush1.msra.mxu0 %v429_v10  ;;  %v526_v9 = vld [vmem:[%s1660_s9 + $0x7e8] sm:$0xff]  ;;  %v461_v10 = vld [vmem:[%s1660_s9 + $0x5e0] sm:$0xff] }
  0x76   : > { %937 = vmatpush1.msra.mxu1 %v493_v11  ;;  %867 = vmatprep.subr.mxu0 %v428_v12  ;;  %v525_v11 = vld [vmem:[%s1660_s9 + $0x7e0] sm:$0xff]  ;;  %v460_v12 = vld [vmem:[%s1660_s9 + $0x5d8] sm:$0xff] }
  0x77   : > { %938 = vmatprep.subr.mxu1 %v492_v13  ;;  %868 = vmatpush1.msra.mxu0 %v427_v14  ;;  %v524_v13 = vld [vmem:[%s1660_s9 + $0x7d8] sm:$0xff]  ;;  %v459_v14 = vld [vmem:[%s1660_s9 + $0x5d0] sm:$0xff] }
  0x78   : > { %939 = vmatpush1.msra.mxu1 %v491_v15  ;;  %869 = vmatprep.subr.mxu0 %v426_v16  ;;  %v523_v15 = vld [vmem:[%s1660_s9 + $0x7d0] sm:$0xff]  ;;  %v458_v16 = vld [vmem:[%s1660_s9 + $0x5c8] sm:$0xff] }
  0x79   : > { %940 = vmatprep.subr.mxu1 %v490_v17  ;;  %870 = vmatpush1.msra.mxu0 %v425_v18  ;;  %v522_v17 = vld [vmem:[%s1660_s9 + $0x7c8] sm:$0xff]  ;;  %v457_v18 = vld [vmem:[%s1660_s9 + $0x5c0] sm:$0xff] }
  0x7a   : > { %941 = vmatpush1.msra.mxu1 %v489_v19  ;;  %871 = vmatprep.subr.mxu0 %v424_v20  ;;  %v521_v19 = vld [vmem:[%s1660_s9 + $0x7c0] sm:$0xff]  ;;  %v456_v20 = vld [vmem:[%s1660_s9 + $0x5b8] sm:$0xff] }
  0x7b   : > { %942 = vmatprep.subr.mxu1 %v488_v21  ;;  %872 = vmatpush1.msra.mxu0 %v423_v22  ;;  %v520_v21 = vld [vmem:[%s1660_s9 + $0x7b8] sm:$0xff]  ;;  %v455_v22 = vld [vmem:[%s1660_s9 + $0x5b0] sm:$0xff] }
  0x7c   : > { %943 = vmatpush1.msra.mxu1 %v487_v23  ;;  %873 = vmatprep.subr.mxu0 %v422_v24  ;;  %v519_v23 = vld [vmem:[%s1660_s9 + $0x7b0] sm:$0xff]  ;;  %v454_v24 = vld [vmem:[%s1660_s9 + $0x5a8] sm:$0xff] }
  0x7d   : > { %944 = vmatprep.subr.mxu1 %v486_v25  ;;  %874 = vmatpush1.msra.mxu0 %v421_v26  ;;  %v518_v25 = vld [vmem:[%s1660_s9 + $0x7a8] sm:$0xff]  ;;  %v453_v26 = vld [vmem:[%s1660_s9 + $0x5a0] sm:$0xff] }
  0x7e   : > { %945 = vmatpush1.msra.mxu1 %v485_v27  ;;  %875 = vmatprep.subr.mxu0 %v420_v28  ;;  %v517_v27 = vld [vmem:[%s1660_s9 + $0x7a0] sm:$0xff]  ;;  %v452_v28 = vld [vmem:[%s1660_s9 + $0x598] sm:$0xff] }
  0x7f   : > { %946 = vmatprep.subr.mxu1 %v484_v29  ;;  %876 = vmatpush1.msra.mxu0 %v419_v30  ;;  %v516_v29 = vld [vmem:[%s1660_s9 + $0x798] sm:$0xff]  ;;  %v451_v30 = vld [vmem:[%s1660_s9 + $0x590] sm:$0xff] }
  0x80   : > { %947 = vmatpush1.msra.mxu1 %v483_v31  ;;  %877 = vmatprep.subr.mxu0 %v418_v32  ;;  %v515_v31 = vld [vmem:[%s1660_s9 + $0x790] sm:$0xff]  ;;  %v450_v32 = vld [vmem:[%s1660_s9 + $0x588] sm:$0xff] }
  0x81   : > { %948 = vmatprep.subr.mxu1 %v482_v33  ;;  %878 = vmatpush1.msra.mxu0 %v417_v34  ;;  %v514_v33 = vld [vmem:[%s1660_s9 + $0x788] sm:$0xff]  ;;  %v449_v34 = vld [vmem:[%s1660_s9 + $0x580] sm:$0xff] }
  0x82   : > { %949 = vmatpush1.msra.mxu1 %v481_v35  ;;  %879 = vmatprep.subr.mxu0 %v416_v36  ;;  %v513_v35 = vld [vmem:[%s1660_s9 + $0x780] sm:$0xff]  ;;  %v448_v36 = vld [vmem:[%s1660_s9 + $0x578] sm:$0xff] }
  0x83   : > { %950 = vmatprep.subr.mxu1 %v480_v37  ;;  %880 = vmatpush1.msra.mxu0 %v415_v38  ;;  %v512_v37 = vld [vmem:[%s1660_s9 + $0x778] sm:$0xff]  ;;  %v447_v38 = vld [vmem:[%s1660_s9 + $0x570] sm:$0xff] }
  0x84   : > { %951 = vmatpush1.msra.mxu1 %v479_v39  ;;  %881 = vmatprep.subr.mxu0 %v414_v40  ;;  %v511_v39 = vld [vmem:[%s1660_s9 + $0x770] sm:$0xff]  ;;  %v446_v40 = vld [vmem:[%s1660_s9 + $0x568] sm:$0xff] }
  0x85   : > { %952 = vmatprep.subr.mxu1 %v478_v41  ;;  %882 = vmatpush1.msra.mxu0 %v413_v42  ;;  %v510_v41 = vld [vmem:[%s1660_s9 + $0x768] sm:$0xff]  ;;  %v445_v42 = vld [vmem:[%s1660_s9 + $0x560] sm:$0xff] }
  0x86   : > { %953 = vmatpush1.msra.mxu1 %v477_v43  ;;  %883 = vmatprep.subr.mxu0 %v412_v44  ;;  %v509_v43 = vld [vmem:[%s1660_s9 + $0x760] sm:$0xff]  ;;  %v444_v44 = vld [vmem:[%s1660_s9 + $0x558] sm:$0xff] }
  0x87   : > { %954 = vmatprep.subr.mxu1 %v476_v45  ;;  %884 = vmatpush1.msra.mxu0 %v411_v46  ;;  %v508_v45 = vld [vmem:[%s1660_s9 + $0x758] sm:$0xff]  ;;  %v443_v46 = vld [vmem:[%s1660_s9 + $0x550] sm:$0xff] }
  0x88   : > { %955 = vmatpush1.msra.mxu1 %v475_v47  ;;  %885 = vmatprep.subr.mxu0 %v410_v48  ;;  %v507_v47 = vld [vmem:[%s1660_s9 + $0x750] sm:$0xff]  ;;  %v442_v48 = vld [vmem:[%s1660_s9 + $0x548] sm:$0xff] }
  0x89   : > { %956 = vmatprep.subr.mxu1 %v474_v49  ;;  %886 = vmatpush1.msra.mxu0 %v409_v50  ;;  %v506_v49 = vld [vmem:[%s1660_s9 + $0x748] sm:$0xff]  ;;  %v441_v50 = vld [vmem:[%s1660_s9 + $0x540] sm:$0xff] }
  0x8a   : > { %957 = vmatpush1.msra.mxu1 %v473_v51  ;;  %887 = vmatprep.subr.mxu0 %v408_v52  ;;  %v505_v51 = vld [vmem:[%s1660_s9 + $0x740] sm:$0xff]  ;;  %v440_v52 = vld [vmem:[%s1660_s9 + $0x538] sm:$0xff] }
  0x8b   : > { %958 = vmatprep.subr.mxu1 %v472_v53  ;;  %888 = vmatpush1.msra.mxu0 %v407_v54  ;;  %v504_v53 = vld [vmem:[%s1660_s9 + $0x738] sm:$0xff]  ;;  %v439_v54 = vld [vmem:[%s1660_s9 + $0x530] sm:$0xff] }
  0x8c   : > { %959 = vmatpush1.msra.mxu1 %v471_v55  ;;  %889 = vmatprep.subr.mxu0 %v406_v56  ;;  %v503_v55 = vld [vmem:[%s1660_s9 + $0x730] sm:$0xff]  ;;  %v438_v56 = vld [vmem:[%s1660_s9 + $0x528] sm:$0xff] }
  0x8d   : > { %960 = vmatprep.subr.mxu1 %v470_v57  ;;  %890 = vmatpush1.msra.mxu0 %v405_v58  ;;  %v502_v57 = vld [vmem:[%s1660_s9 + $0x728] sm:$0xff]  ;;  %v437_v58 = vld [vmem:[%s1660_s9 + $0x520] sm:$0xff] }
  0x8e   : > { %961 = vmatpush1.msra.mxu1 %v469_v59  ;;  %891 = vmatprep.subr.mxu0 %v404_v60  ;;  %v501_v59 = vld [vmem:[%s1660_s9 + $0x720] sm:$0xff]  ;;  %v436_v60 = vld [vmem:[%s1660_s9 + $0x518] sm:$0xff] }
  0x8f   : > { %962 = vmatprep.subr.mxu1 %v468_v61  ;;  %892 = vmatpush1.msra.mxu0 %v403_v62  ;;  %v500_v61 = vld [vmem:[%s1660_s9 + $0x718] sm:$0xff]  ;;  %v435_v62 = vld [vmem:[%s1660_s9 + $0x510] sm:$0xff] }
  0x90   : > { %963 = vmatpush1.msra.mxu1 %v467_v63  ;;  %893 = vmatprep.subr.mxu0 %v402_v0  ;;  %v264_v63 = vld [vmem:[%s1798_s5 + $0x28] sm:$0xff] }
  0x91   : > { %964 = vmatprep.subr.mxu1 %v466_v1  ;;  %894 = vmatpush1.msra.mxu0 %v401_v2  ;;  %v434_v0 = vld [vmem:[%s1660_s9 + $0x508] sm:$0xff]  ;;  %v499_v1 = vld [vmem:[%s1660_s9 + $0x710] sm:$0xff]  ;;  %v433_v2 = vld [vmem:[%s1660_s9 + $0x500] sm:$0xff] }
  0x92   : > { %965 = vmatpush1.msra.mxu1 %v465_v3  ;;  %895 = vmatprep.subr.mxu0 %v464_v4  ;;  %v498_v3 = vld [vmem:[%s1660_s9 + $0x708] sm:$0xff]  ;;  %v263_v4 = vld [vmem:[%s1798_s5 + $0x20] sm:$0xff] }
  0x93   : > { %966 = vmatprep.subr.mxu1 %v528_v5  ;;  %896 = vmatpush2.msra.mxu0 %v463_v6  ;;  %v560_v5 = vld [vmem:[%s1660_s9 + $0x8f8] sm:$0xff]  ;;  %v497_v6 = vld [vmem:[%s1660_s9 + $0x700] sm:$0xff] }
  0x94   : > { %967 = vmatpush2.msra.mxu1 %v527_v7  ;;  %897 = vmatprep.subr.mxu0 %v462_v8  ;;  %v266_v7 = vld [vmem:[%s1798_s5 + $0x38] sm:$0xff]  ;;  %v559_v8 = vld [vmem:[%s1660_s9 + $0x8f0] sm:$0xff] }
  0x95   : > { %968 = vmatprep.subr.mxu1 %v526_v9  ;;  %898 = vmatpush2.msra.mxu0 %v461_v10  ;;  %v265_v9 = vld [vmem:[%s1798_s5 + $0x30] sm:$0xff]  ;;  %v558_v10 = vld [vmem:[%s1660_s9 + $0x8e8] sm:$0xff] }
  0x96   : > { %969 = vmatpush2.msra.mxu1 %v525_v11  ;;  %899 = vmatprep.subr.mxu0 %v460_v12  ;;  %v624_v11 = vld [vmem:[%s1660_s9 + $0xaf8] sm:$0xff]  ;;  %v557_v12 = vld [vmem:[%s1660_s9 + $0x8e0] sm:$0xff] }
  0x97   : > { %970 = vmatprep.subr.mxu1 %v524_v13  ;;  %900 = vmatpush2.msra.mxu0 %v459_v14  ;;  %v623_v13 = vld [vmem:[%s1660_s9 + $0xaf0] sm:$0xff]  ;;  %v556_v14 = vld [vmem:[%s1660_s9 + $0x8d8] sm:$0xff] }
  0x98   : > { %971 = vmatpush2.msra.mxu1 %v523_v15  ;;  %901 = vmatprep.subr.mxu0 %v458_v16  ;;  %v622_v15 = vld [vmem:[%s1660_s9 + $0xae8] sm:$0xff]  ;;  %v555_v16 = vld [vmem:[%s1660_s9 + $0x8d0] sm:$0xff] }
  0x99   : > { %972 = vmatprep.subr.mxu1 %v522_v17  ;;  %902 = vmatpush2.msra.mxu0 %v457_v18  ;;  %v621_v17 = vld [vmem:[%s1660_s9 + $0xae0] sm:$0xff]  ;;  %v554_v18 = vld [vmem:[%s1660_s9 + $0x8c8] sm:$0xff] }
  0x9a   : > { %973 = vmatpush2.msra.mxu1 %v521_v19  ;;  %903 = vmatprep.subr.mxu0 %v456_v20  ;;  %v620_v19 = vld [vmem:[%s1660_s9 + $0xad8] sm:$0xff]  ;;  %v553_v20 = vld [vmem:[%s1660_s9 + $0x8c0] sm:$0xff] }
  0x9b   : > { %974 = vmatprep.subr.mxu1 %v520_v21  ;;  %904 = vmatpush2.msra.mxu0 %v455_v22  ;;  %v619_v21 = vld [vmem:[%s1660_s9 + $0xad0] sm:$0xff]  ;;  %v552_v22 = vld [vmem:[%s1660_s9 + $0x8b8] sm:$0xff] }
  0x9c   : > { %975 = vmatpush2.msra.mxu1 %v519_v23  ;;  %905 = vmatprep.subr.mxu0 %v454_v24  ;;  %v618_v23 = vld [vmem:[%s1660_s9 + $0xac8] sm:$0xff]  ;;  %v551_v24 = vld [vmem:[%s1660_s9 + $0x8b0] sm:$0xff] }
  0x9d   : > { %976 = vmatprep.subr.mxu1 %v518_v25  ;;  %906 = vmatpush2.msra.mxu0 %v453_v26  ;;  %v617_v25 = vld [vmem:[%s1660_s9 + $0xac0] sm:$0xff]  ;;  %v550_v26 = vld [vmem:[%s1660_s9 + $0x8a8] sm:$0xff] }
  0x9e   : > { %977 = vmatpush2.msra.mxu1 %v517_v27  ;;  %907 = vmatprep.subr.mxu0 %v452_v28  ;;  %v616_v27 = vld [vmem:[%s1660_s9 + $0xab8] sm:$0xff]  ;;  %v549_v28 = vld [vmem:[%s1660_s9 + $0x8a0] sm:$0xff] }
  0x9f   : > { %978 = vmatprep.subr.mxu1 %v516_v29  ;;  %908 = vmatpush2.msra.mxu0 %v451_v30  ;;  %v615_v29 = vld [vmem:[%s1660_s9 + $0xab0] sm:$0xff]  ;;  %v548_v30 = vld [vmem:[%s1660_s9 + $0x898] sm:$0xff] }
  0xa0   : > { %979 = vmatpush2.msra.mxu1 %v515_v31  ;;  %909 = vmatprep.subr.mxu0 %v450_v32  ;;  %v614_v31 = vld [vmem:[%s1660_s9 + $0xaa8] sm:$0xff]  ;;  %v547_v32 = vld [vmem:[%s1660_s9 + $0x890] sm:$0xff] }
  0xa1   : > { %980 = vmatprep.subr.mxu1 %v514_v33  ;;  %910 = vmatpush2.msra.mxu0 %v449_v34  ;;  %v613_v33 = vld [vmem:[%s1660_s9 + $0xaa0] sm:$0xff]  ;;  %v546_v34 = vld [vmem:[%s1660_s9 + $0x888] sm:$0xff] }
  0xa2   : > { %981 = vmatpush2.msra.mxu1 %v513_v35  ;;  %911 = vmatprep.subr.mxu0 %v448_v36  ;;  %v612_v35 = vld [vmem:[%s1660_s9 + $0xa98] sm:$0xff]  ;;  %v545_v36 = vld [vmem:[%s1660_s9 + $0x880] sm:$0xff] }
  0xa3   : > { %982 = vmatprep.subr.mxu1 %v512_v37  ;;  %912 = vmatpush2.msra.mxu0 %v447_v38  ;;  %v611_v37 = vld [vmem:[%s1660_s9 + $0xa90] sm:$0xff]  ;;  %v544_v38 = vld [vmem:[%s1660_s9 + $0x878] sm:$0xff] }
  0xa4   : > { %983 = vmatpush2.msra.mxu1 %v511_v39  ;;  %913 = vmatprep.subr.mxu0 %v446_v40  ;;  %v610_v39 = vld [vmem:[%s1660_s9 + $0xa88] sm:$0xff]  ;;  %v543_v40 = vld [vmem:[%s1660_s9 + $0x870] sm:$0xff] }
  0xa5   : > { %984 = vmatprep.subr.mxu1 %v510_v41  ;;  %914 = vmatpush2.msra.mxu0 %v445_v42  ;;  %v609_v41 = vld [vmem:[%s1660_s9 + $0xa80] sm:$0xff]  ;;  %v542_v42 = vld [vmem:[%s1660_s9 + $0x868] sm:$0xff] }
  0xa6   : > { %985 = vmatpush2.msra.mxu1 %v509_v43  ;;  %915 = vmatprep.subr.mxu0 %v444_v44  ;;  %v608_v43 = vld [vmem:[%s1660_s9 + $0xa78] sm:$0xff]  ;;  %v541_v44 = vld [vmem:[%s1660_s9 + $0x860] sm:$0xff] }
  0xa7   : > { %986 = vmatprep.subr.mxu1 %v508_v45  ;;  %916 = vmatpush2.msra.mxu0 %v443_v46  ;;  %v607_v45 = vld [vmem:[%s1660_s9 + $0xa70] sm:$0xff]  ;;  %v540_v46 = vld [vmem:[%s1660_s9 + $0x858] sm:$0xff] }
  0xa8   : > { %987 = vmatpush2.msra.mxu1 %v507_v47  ;;  %917 = vmatprep.subr.mxu0 %v442_v48  ;;  %v606_v47 = vld [vmem:[%s1660_s9 + $0xa68] sm:$0xff]  ;;  %v539_v48 = vld [vmem:[%s1660_s9 + $0x850] sm:$0xff] }
  0xa9   : > { %988 = vmatprep.subr.mxu1 %v506_v49  ;;  %918 = vmatpush2.msra.mxu0 %v441_v50  ;;  %v605_v49 = vld [vmem:[%s1660_s9 + $0xa60] sm:$0xff]  ;;  %v538_v50 = vld [vmem:[%s1660_s9 + $0x848] sm:$0xff] }
  0xaa   : > { %989 = vmatpush2.msra.mxu1 %v505_v51  ;;  %919 = vmatprep.subr.mxu0 %v440_v52  ;;  %v604_v51 = vld [vmem:[%s1660_s9 + $0xa58] sm:$0xff]  ;;  %v537_v52 = vld [vmem:[%s1660_s9 + $0x840] sm:$0xff] }
  0xab   : > { %990 = vmatprep.subr.mxu1 %v504_v53  ;;  %920 = vmatpush2.msra.mxu0 %v439_v54  ;;  %v603_v53 = vld [vmem:[%s1660_s9 + $0xa50] sm:$0xff]  ;;  %v536_v54 = vld [vmem:[%s1660_s9 + $0x838] sm:$0xff] }
  0xac   : > { %991 = vmatpush2.msra.mxu1 %v503_v55  ;;  %921 = vmatprep.subr.mxu0 %v438_v56  ;;  %v602_v55 = vld [vmem:[%s1660_s9 + $0xa48] sm:$0xff]  ;;  %v535_v56 = vld [vmem:[%s1660_s9 + $0x830] sm:$0xff] }
  0xad   : > { %992 = vmatprep.subr.mxu1 %v502_v57  ;;  %922 = vmatpush2.msra.mxu0 %v437_v58  ;;  %v601_v57 = vld [vmem:[%s1660_s9 + $0xa40] sm:$0xff]  ;;  %v534_v58 = vld [vmem:[%s1660_s9 + $0x828] sm:$0xff] }
  0xae   : > { %993 = vmatpush2.msra.mxu1 %v501_v59  ;;  %923 = vmatprep.subr.mxu0 %v436_v60  ;;  %v600_v59 = vld [vmem:[%s1660_s9 + $0xa38] sm:$0xff]  ;;  %v533_v60 = vld [vmem:[%s1660_s9 + $0x820] sm:$0xff] }
  0xaf   : > { %994 = vmatprep.subr.mxu1 %v500_v61  ;;  %924 = vmatpush2.msra.mxu0 %v435_v62  ;;  %v599_v61 = vld [vmem:[%s1660_s9 + $0xa30] sm:$0xff]  ;;  %v532_v62 = vld [vmem:[%s1660_s9 + $0x818] sm:$0xff] }
  0xb0   : > { %927 = vmatprep.mubr.f32.mxu0 %v264_v63  ;;  %925 = vmatprep.subr.mxu0 %v434_v0  ;;  %v598_v63 = vld [vmem:[%s1660_s9 + $0xa28] sm:$0xff]  ;;  %v531_v0 = vld [vmem:[%s1660_s9 + $0x810] sm:$0xff] }
  0xb1   : > { %995 = vmatpush2.msra.mxu1 %v499_v1  ;;  %926 = vmatpush2.msra.mxu0 %v433_v2  ;;  %v597_v1 = vld [vmem:[%s1660_s9 + $0xa20] sm:$0xff]  ;;  %v530_v2 = vld [vmem:[%s1660_s9 + $0x808] sm:$0xff] }
  0xb2   : > { %996 = vmatprep.subr.mxu1 %v498_v3  ;;  %928 = vmatmul.mubr.f32.vlgmr.msra.gmra.mxu0 %v263_v4  ;;  %v596_v3 = vld [vmem:[%s1660_s9 + $0xa18] sm:$0xff]  ;;  %v529_v4 = vld [vmem:[%s1660_s9 + $0x800] sm:$0xff] }
  0xb3   : > { %1005 = vmatprep.subr.mxu0 %v560_v5  ;;  %997 = vmatpush2.msra.mxu1 %v497_v6  ;;  %v595_v5 = vld [vmem:[%s1660_s9 + $0xa10] sm:$0xff]  ;;  %v592_v6 = vld [vmem:[%s1660_s9 + $0x9f8] sm:$0xff] }
  0xb4   : > { %998 = vmatprep.mubr.f32.mxu1 %v266_v7  ;;  %1006 = vmatpush1.msra.mxu0 %v559_v8  ;;  %v594_v7 = vld [vmem:[%s1660_s9 + $0xa08] sm:$0xff]  ;;  %v591_v8 = vld [vmem:[%s1660_s9 + $0x9f0] sm:$0xff] }
  0xb5   : > { %999 = vmatmul.mubr.f32.vlgmr.msra.gmra.mxu1 %v265_v9  ;;  %1007 = vmatprep.subr.mxu0 %v558_v10  ;;  %v593_v9 = vld [vmem:[%s1660_s9 + $0xa00] sm:$0xff]  ;;  %v590_v10 = vld [vmem:[%s1660_s9 + $0x9e8] sm:$0xff] }
  0xb6   : > { %1076 = vmatprep.subr.mxu1 %v624_v11  ;;  %1008 = vmatpush1.msra.mxu0 %v557_v12  ;;  %v656_v11 = vld [vmem:[%s1660_s9 + $0xbf8] sm:$0xff]  ;;  %v589_v12 = vld [vmem:[%s1660_s9 + $0x9e0] sm:$0xff] }
  0xb7   : > { %1077 = vmatpush1.msra.mxu1 %v623_v13  ;;  %1009 = vmatprep.subr.mxu0 %v556_v14  ;;  %v655_v13 = vld [vmem:[%s1660_s9 + $0xbf0] sm:$0xff]  ;;  %v588_v14 = vld [vmem:[%s1660_s9 + $0x9d8] sm:$0xff] }
  0xb8   : > { %1078 = vmatprep.subr.mxu1 %v622_v15  ;;  %1010 = vmatpush1.msra.mxu0 %v555_v16  ;;  %v654_v15 = vld [vmem:[%s1660_s9 + $0xbe8] sm:$0xff]  ;;  %v587_v16 = vld [vmem:[%s1660_s9 + $0x9d0] sm:$0xff] }
  0xb9   : > { %1079 = vmatpush1.msra.mxu1 %v621_v17  ;;  %1011 = vmatprep.subr.mxu0 %v554_v18  ;;  %v653_v17 = vld [vmem:[%s1660_s9 + $0xbe0] sm:$0xff]  ;;  %v586_v18 = vld [vmem:[%s1660_s9 + $0x9c8] sm:$0xff] }
  0xba   : > { %1080 = vmatprep.subr.mxu1 %v620_v19  ;;  %1012 = vmatpush1.msra.mxu0 %v553_v20  ;;  %v652_v19 = vld [vmem:[%s1660_s9 + $0xbd8] sm:$0xff]  ;;  %v585_v20 = vld [vmem:[%s1660_s9 + $0x9c0] sm:$0xff] }
  0xbb   : > { %1081 = vmatpush1.msra.mxu1 %v619_v21  ;;  %1013 = vmatprep.subr.mxu0 %v552_v22  ;;  %v651_v21 = vld [vmem:[%s1660_s9 + $0xbd0] sm:$0xff]  ;;  %v584_v22 = vld [vmem:[%s1660_s9 + $0x9b8] sm:$0xff] }
  0xbc   : > { %1082 = vmatprep.subr.mxu1 %v618_v23  ;;  %1014 = vmatpush1.msra.mxu0 %v551_v24  ;;  %v650_v23 = vld [vmem:[%s1660_s9 + $0xbc8] sm:$0xff]  ;;  %v583_v24 = vld [vmem:[%s1660_s9 + $0x9b0] sm:$0xff] }
  0xbd   : > { %1083 = vmatpush1.msra.mxu1 %v617_v25  ;;  %1015 = vmatprep.subr.mxu0 %v550_v26  ;;  %v649_v25 = vld [vmem:[%s1660_s9 + $0xbc0] sm:$0xff]  ;;  %v582_v26 = vld [vmem:[%s1660_s9 + $0x9a8] sm:$0xff] }
  0xbe   : > { %1084 = vmatprep.subr.mxu1 %v616_v27  ;;  %1016 = vmatpush1.msra.mxu0 %v549_v28  ;;  %v648_v27 = vld [vmem:[%s1660_s9 + $0xbb8] sm:$0xff]  ;;  %v581_v28 = vld [vmem:[%s1660_s9 + $0x9a0] sm:$0xff] }
  0xbf   : > { %1085 = vmatpush1.msra.mxu1 %v615_v29  ;;  %1017 = vmatprep.subr.mxu0 %v548_v30  ;;  %v647_v29 = vld [vmem:[%s1660_s9 + $0xbb0] sm:$0xff]  ;;  %v580_v30 = vld [vmem:[%s1660_s9 + $0x998] sm:$0xff] }
  0xc0   : > { %1086 = vmatprep.subr.mxu1 %v614_v31  ;;  %1018 = vmatpush1.msra.mxu0 %v547_v32  ;;  %v646_v31 = vld [vmem:[%s1660_s9 + $0xba8] sm:$0xff]  ;;  %v579_v32 = vld [vmem:[%s1660_s9 + $0x990] sm:$0xff] }
  0xc1   : > { %1087 = vmatpush1.msra.mxu1 %v613_v33  ;;  %1019 = vmatprep.subr.mxu0 %v546_v34  ;;  %v645_v33 = vld [vmem:[%s1660_s9 + $0xba0] sm:$0xff]  ;;  %v578_v34 = vld [vmem:[%s1660_s9 + $0x988] sm:$0xff] }
  0xc2   : > { %1088 = vmatprep.subr.mxu1 %v612_v35  ;;  %1020 = vmatpush1.msra.mxu0 %v545_v36  ;;  %v644_v35 = vld [vmem:[%s1660_s9 + $0xb98] sm:$0xff]  ;;  %v577_v36 = vld [vmem:[%s1660_s9 + $0x980] sm:$0xff] }
  0xc3   : > { %1089 = vmatpush1.msra.mxu1 %v611_v37  ;;  %1021 = vmatprep.subr.mxu0 %v544_v38  ;;  %v643_v37 = vld [vmem:[%s1660_s9 + $0xb90] sm:$0xff]  ;;  %v576_v38 = vld [vmem:[%s1660_s9 + $0x978] sm:$0xff] }
  0xc4   : > { %1090 = vmatprep.subr.mxu1 %v610_v39  ;;  %1022 = vmatpush1.msra.mxu0 %v543_v40  ;;  %v642_v39 = vld [vmem:[%s1660_s9 + $0xb88] sm:$0xff]  ;;  %v575_v40 = vld [vmem:[%s1660_s9 + $0x970] sm:$0xff] }
  0xc5   : > { %1091 = vmatpush1.msra.mxu1 %v609_v41  ;;  %1023 = vmatprep.subr.mxu0 %v542_v42  ;;  %v641_v41 = vld [vmem:[%s1660_s9 + $0xb80] sm:$0xff]  ;;  %v574_v42 = vld [vmem:[%s1660_s9 + $0x968] sm:$0xff] }
  0xc6   : > { %1092 = vmatprep.subr.mxu1 %v608_v43  ;;  %1024 = vmatpush1.msra.mxu0 %v541_v44  ;;  %v640_v43 = vld [vmem:[%s1660_s9 + $0xb78] sm:$0xff]  ;;  %v573_v44 = vld [vmem:[%s1660_s9 + $0x960] sm:$0xff] }
  0xc7   : > { %1093 = vmatpush1.msra.mxu1 %v607_v45  ;;  %1025 = vmatprep.subr.mxu0 %v540_v46  ;;  %v639_v45 = vld [vmem:[%s1660_s9 + $0xb70] sm:$0xff]  ;;  %v572_v46 = vld [vmem:[%s1660_s9 + $0x958] sm:$0xff] }
  0xc8   : > { %1094 = vmatprep.subr.mxu1 %v606_v47  ;;  %1026 = vmatpush1.msra.mxu0 %v539_v48  ;;  %v638_v47 = vld [vmem:[%s1660_s9 + $0xb68] sm:$0xff]  ;;  %v571_v48 = vld [vmem:[%s1660_s9 + $0x950] sm:$0xff] }
  0xc9   : > { %1095 = vmatpush1.msra.mxu1 %v605_v49  ;;  %1027 = vmatprep.subr.mxu0 %v538_v50  ;;  %v637_v49 = vld [vmem:[%s1660_s9 + $0xb60] sm:$0xff]  ;;  %v570_v50 = vld [vmem:[%s1660_s9 + $0x948] sm:$0xff] }
  0xca   : > { %1096 = vmatprep.subr.mxu1 %v604_v51  ;;  %1028 = vmatpush1.msra.mxu0 %v537_v52  ;;  %v636_v51 = vld [vmem:[%s1660_s9 + $0xb58] sm:$0xff]  ;;  %v569_v52 = vld [vmem:[%s1660_s9 + $0x940] sm:$0xff] }
  0xcb   : > { %1097 = vmatpush1.msra.mxu1 %v603_v53  ;;  %1029 = vmatprep.subr.mxu0 %v536_v54  ;;  %v635_v53 = vld [vmem:[%s1660_s9 + $0xb50] sm:$0xff]  ;;  %v568_v54 = vld [vmem:[%s1660_s9 + $0x938] sm:$0xff] }
  0xcc   : > { %1098 = vmatprep.subr.mxu1 %v602_v55  ;;  %1030 = vmatpush1.msra.mxu0 %v535_v56  ;;  %v634_v55 = vld [vmem:[%s1660_s9 + $0xb48] sm:$0xff]  ;;  %v567_v56 = vld [vmem:[%s1660_s9 + $0x930] sm:$0xff] }
  0xcd   : > { %1099 = vmatpush1.msra.mxu1 %v601_v57  ;;  %1031 = vmatprep.subr.mxu0 %v534_v58  ;;  %v633_v57 = vld [vmem:[%s1660_s9 + $0xb40] sm:$0xff]  ;;  %v566_v58 = vld [vmem:[%s1660_s9 + $0x928] sm:$0xff] }
  0xce   : > { %1100 = vmatprep.subr.mxu1 %v600_v59  ;;  %1032 = vmatpush1.msra.mxu0 %v533_v60  ;;  %v632_v59 = vld [vmem:[%s1660_s9 + $0xb38] sm:$0xff]  ;;  %v565_v60 = vld [vmem:[%s1660_s9 + $0x920] sm:$0xff] }
  0xcf   : > { %1101 = vmatpush1.msra.mxu1 %v599_v61  ;;  %1033 = vmatprep.subr.mxu0 %v532_v62  ;;  %v631_v61 = vld [vmem:[%s1660_s9 + $0xb30] sm:$0xff]  ;;  %v564_v62 = vld [vmem:[%s1660_s9 + $0x918] sm:$0xff] }
  0xd0   : > { %1102 = vmatprep.subr.mxu1 %v598_v63  ;;  %1034 = vmatpush1.msra.mxu0 %v531_v0  ;;  %v630_v63 = vld [vmem:[%s1660_s9 + $0xb28] sm:$0xff]  ;;  %v563_v0 = vld [vmem:[%s1660_s9 + $0x910] sm:$0xff] }
  0xd1   : > { %1103 = vmatpush1.msra.mxu1 %v597_v1  ;;  %1035 = vmatprep.subr.mxu0 %v530_v2  ;;  %v629_v1 = vld [vmem:[%s1660_s9 + $0xb20] sm:$0xff]  ;;  %v562_v2 = vld [vmem:[%s1660_s9 + $0x908] sm:$0xff] }
  0xd2   : > { %1104 = vmatprep.subr.mxu1 %v596_v3  ;;  %1036 = vmatpush1.msra.mxu0 %v529_v4  ;;  %v628_v3 = vld [vmem:[%s1660_s9 + $0xb18] sm:$0xff]  ;;  %v561_v4 = vld [vmem:[%s1660_s9 + $0x900] sm:$0xff] }
  0xd3   : > { %1105 = vmatpush1.msra.mxu1 %v595_v5  ;;  %1037 = vmatprep.subr.mxu0 %v592_v6  ;;  %v268_v5 = vld [vmem:[%s1798_s5 + $0x48] sm:$0xff]  ;;  %v627_v6 = vld [vmem:[%s1660_s9 + $0xb10] sm:$0xff] }
  0xd4   : > { %1106 = vmatprep.subr.mxu1 %v594_v7  ;;  %1038 = vmatpush2.msra.mxu0 %v591_v8  ;;  %v267_v7 = vld [vmem:[%s1798_s5 + $0x40] sm:$0xff]  ;;  %v626_v8 = vld [vmem:[%s1660_s9 + $0xb08] sm:$0xff] }
  0xd5   : > { %1107 = vmatpush1.msra.mxu1 %v593_v9  ;;  %1039 = vmatprep.subr.mxu0 %v590_v10  ;;  %v688_v9 = vld [vmem:[%s1660_s9 + $0xcf8] sm:$0xff]  ;;  %v625_v10 = vld [vmem:[%s1660_s9 + $0xb00] sm:$0xff] }
  0xd6   : > { %1108 = vmatprep.subr.mxu1 %v656_v11  ;;  %1040 = vmatpush2.msra.mxu0 %v589_v12  ;;  %v270_v11 = vld [vmem:[%s1798_s5 + $0x58] sm:$0xff]  ;;  %v687_v12 = vld [vmem:[%s1660_s9 + $0xcf0] sm:$0xff] }
  0xd7   : > { %1109 = vmatpush2.msra.mxu1 %v655_v13  ;;  %1041 = vmatprep.subr.mxu0 %v588_v14  ;;  %v269_v13 = vld [vmem:[%s1798_s5 + $0x50] sm:$0xff]  ;;  %v686_v14 = vld [vmem:[%s1660_s9 + $0xce8] sm:$0xff] }
  0xd8   : > { %1110 = vmatprep.subr.mxu1 %v654_v15  ;;  %1042 = vmatpush2.msra.mxu0 %v587_v16  ;;  %v272_v15 = vld [vmem:[%s1798_s5 + $0x68] sm:$0xff]  ;;  %v685_v16 = vld [vmem:[%s1660_s9 + $0xce0] sm:$0xff] }
  0xd9   : > { %1111 = vmatpush2.msra.mxu1 %v653_v17  ;;  %1043 = vmatprep.subr.mxu0 %v586_v18  ;;  %v684_v17 = vld [vmem:[%s1660_s9 + $0xcd8] sm:$0xff]  ;;  %v683_v18 = vld [vmem:[%s1660_s9 + $0xcd0] sm:$0xff] }
  0xda   : > { %1112 = vmatprep.subr.mxu1 %v652_v19  ;;  %1044 = vmatpush2.msra.mxu0 %v585_v20  ;;  %v682_v19 = vld [vmem:[%s1660_s9 + $0xcc8] sm:$0xff]  ;;  %v681_v20 = vld [vmem:[%s1660_s9 + $0xcc0] sm:$0xff] }
  0xdb   : > { %1113 = vmatpush2.msra.mxu1 %v651_v21  ;;  %1045 = vmatprep.subr.mxu0 %v584_v22  ;;  %v680_v21 = vld [vmem:[%s1660_s9 + $0xcb8] sm:$0xff]  ;;  %v679_v22 = vld [vmem:[%s1660_s9 + $0xcb0] sm:$0xff] }
  0xdc   : > { %1114 = vmatprep.subr.mxu1 %v650_v23  ;;  %1046 = vmatpush2.msra.mxu0 %v583_v24  ;;  %v678_v23 = vld [vmem:[%s1660_s9 + $0xca8] sm:$0xff]  ;;  %v677_v24 = vld [vmem:[%s1660_s9 + $0xca0] sm:$0xff] }
  0xdd   : > { %1115 = vmatpush2.msra.mxu1 %v649_v25  ;;  %1047 = vmatprep.subr.mxu0 %v582_v26  ;;  %v676_v25 = vld [vmem:[%s1660_s9 + $0xc98] sm:$0xff]  ;;  %v675_v26 = vld [vmem:[%s1660_s9 + $0xc90] sm:$0xff] }
  0xde   : > { %1116 = vmatprep.subr.mxu1 %v648_v27  ;;  %1048 = vmatpush2.msra.mxu0 %v581_v28  ;;  %v674_v27 = vld [vmem:[%s1660_s9 + $0xc88] sm:$0xff]  ;;  %v673_v28 = vld [vmem:[%s1660_s9 + $0xc80] sm:$0xff] }
  0xdf   : > { %1117 = vmatpush2.msra.mxu1 %v647_v29  ;;  %1049 = vmatprep.subr.mxu0 %v580_v30  ;;  %v672_v29 = vld [vmem:[%s1660_s9 + $0xc78] sm:$0xff]  ;;  %v671_v30 = vld [vmem:[%s1660_s9 + $0xc70] sm:$0xff] }
  0xe0   : > { %1118 = vmatprep.subr.mxu1 %v646_v31  ;;  %1050 = vmatpush2.msra.mxu0 %v579_v32  ;;  %v670_v31 = vld [vmem:[%s1660_s9 + $0xc68] sm:$0xff]  ;;  %v669_v32 = vld [vmem:[%s1660_s9 + $0xc60] sm:$0xff] }
  0xe1   : > { %1119 = vmatpush2.msra.mxu1 %v645_v33  ;;  %1051 = vmatprep.subr.mxu0 %v578_v34  ;;  %v668_v33 = vld [vmem:[%s1660_s9 + $0xc58] sm:$0xff]  ;;  %v667_v34 = vld [vmem:[%s1660_s9 + $0xc50] sm:$0xff] }
  0xe2   : > { %1120 = vmatprep.subr.mxu1 %v644_v35  ;;  %1052 = vmatpush2.msra.mxu0 %v577_v36  ;;  %v666_v35 = vld [vmem:[%s1660_s9 + $0xc48] sm:$0xff]  ;;  %v665_v36 = vld [vmem:[%s1660_s9 + $0xc40] sm:$0xff] }
  0xe3   : > { %1121 = vmatpush2.msra.mxu1 %v643_v37  ;;  %1053 = vmatprep.subr.mxu0 %v576_v38  ;;  %v664_v37 = vld [vmem:[%s1660_s9 + $0xc38] sm:$0xff]  ;;  %v663_v38 = vld [vmem:[%s1660_s9 + $0xc30] sm:$0xff] }
  0xe4   : > { %1122 = vmatprep.subr.mxu1 %v642_v39  ;;  %1054 = vmatpush2.msra.mxu0 %v575_v40  ;;  %v662_v39 = vld [vmem:[%s1660_s9 + $0xc28] sm:$0xff]  ;;  %v661_v40 = vld [vmem:[%s1660_s9 + $0xc20] sm:$0xff] }
  0xe5   : > { %1123 = vmatpush2.msra.mxu1 %v641_v41  ;;  %1055 = vmatprep.subr.mxu0 %v574_v42  ;;  %v660_v41 = vld [vmem:[%s1660_s9 + $0xc18] sm:$0xff]  ;;  %v659_v42 = vld [vmem:[%s1660_s9 + $0xc10] sm:$0xff] }
  0xe6   : > { %1124 = vmatprep.subr.mxu1 %v640_v43  ;;  %1056 = vmatpush2.msra.mxu0 %v573_v44  ;;  %v658_v43 = vld [vmem:[%s1660_s9 + $0xc08] sm:$0xff]  ;;  %v657_v44 = vld [vmem:[%s1660_s9 + $0xc00] sm:$0xff] }
  0xe7   : > { %1125 = vmatpush2.msra.mxu1 %v639_v45  ;;  %1057 = vmatprep.subr.mxu0 %v572_v46  ;;  %v720_v45 = vld [vmem:[%s1660_s9 + $0xdf8] sm:$0xff]  ;;  %v719_v46 = vld [vmem:[%s1660_s9 + $0xdf0] sm:$0xff] }
  0xe8   : > { %1126 = vmatprep.subr.mxu1 %v638_v47  ;;  %1058 = vmatpush2.msra.mxu0 %v571_v48  ;;  %v718_v47 = vld [vmem:[%s1660_s9 + $0xde8] sm:$0xff]  ;;  %v717_v48 = vld [vmem:[%s1660_s9 + $0xde0] sm:$0xff] }
  0xe9   : > { %1127 = vmatpush2.msra.mxu1 %v637_v49  ;;  %1059 = vmatprep.subr.mxu0 %v570_v50  ;;  %v716_v49 = vld [vmem:[%s1660_s9 + $0xdd8] sm:$0xff]  ;;  %v715_v50 = vld [vmem:[%s1660_s9 + $0xdd0] sm:$0xff] }
  0xea   : > { %1128 = vmatprep.subr.mxu1 %v636_v51  ;;  %1060 = vmatpush2.msra.mxu0 %v569_v52  ;;  %v714_v51 = vld [vmem:[%s1660_s9 + $0xdc8] sm:$0xff]  ;;  %v713_v52 = vld [vmem:[%s1660_s9 + $0xdc0] sm:$0xff] }
  0xeb   : > { %1129 = vmatpush2.msra.mxu1 %v635_v53  ;;  %1061 = vmatprep.subr.mxu0 %v568_v54  ;;  %v712_v53 = vld [vmem:[%s1660_s9 + $0xdb8] sm:$0xff]  ;;  %v711_v54 = vld [vmem:[%s1660_s9 + $0xdb0] sm:$0xff] }
  0xec   : > { %1130 = vmatprep.subr.mxu1 %v634_v55  ;;  %1062 = vmatpush2.msra.mxu0 %v567_v56  ;;  %v710_v55 = vld [vmem:[%s1660_s9 + $0xda8] sm:$0xff]  ;;  %v709_v56 = vld [vmem:[%s1660_s9 + $0xda0] sm:$0xff] }
  0xed   : > { %1131 = vmatpush2.msra.mxu1 %v633_v57  ;;  %1063 = vmatprep.subr.mxu0 %v566_v58  ;;  %v708_v57 = vld [vmem:[%s1660_s9 + $0xd98] sm:$0xff]  ;;  %v707_v58 = vld [vmem:[%s1660_s9 + $0xd90] sm:$0xff] }
  0xee   : > { %1132 = vmatprep.subr.mxu1 %v632_v59  ;;  %1064 = vmatpush2.msra.mxu0 %v565_v60  ;;  %v706_v59 = vld [vmem:[%s1660_s9 + $0xd88] sm:$0xff]  ;;  %v705_v60 = vld [vmem:[%s1660_s9 + $0xd80] sm:$0xff] }
  0xef   : > { %1133 = vmatpush2.msra.mxu1 %v631_v61  ;;  %1065 = vmatprep.subr.mxu0 %v564_v62  ;;  %v704_v61 = vld [vmem:[%s1660_s9 + $0xd78] sm:$0xff]  ;;  %v703_v62 = vld [vmem:[%s1660_s9 + $0xd70] sm:$0xff] }
  0xf0   : > { %1134 = vmatprep.subr.mxu1 %v630_v63  ;;  %1066 = vmatpush2.msra.mxu0 %v563_v0  ;;  %v702_v63 = vld [vmem:[%s1660_s9 + $0xd68] sm:$0xff]  ;;  %v701_v0 = vld [vmem:[%s1660_s9 + $0xd60] sm:$0xff] }
  0xf1   : > { %1135 = vmatpush2.msra.mxu1 %v629_v1  ;;  %1067 = vmatprep.subr.mxu0 %v562_v2  ;;  %v700_v1 = vld [vmem:[%s1660_s9 + $0xd58] sm:$0xff]  ;;  %v699_v2 = vld [vmem:[%s1660_s9 + $0xd50] sm:$0xff] }
  0xf2   : > { %1136 = vmatprep.subr.mxu1 %v628_v3  ;;  %1068 = vmatpush2.msra.mxu0 %v561_v4  ;;  %v698_v3 = vld [vmem:[%s1660_s9 + $0xd48] sm:$0xff]  ;;  %v697_v4 = vld [vmem:[%s1660_s9 + $0xd40] sm:$0xff] }
  0xf3   : > { %1069 = vmatprep.mubr.f32.mxu0 %v268_v5  ;;  %1137 = vmatpush2.msra.mxu1 %v627_v6  ;;  %v696_v5 = vld [vmem:[%s1660_s9 + $0xd38] sm:$0xff]  ;;  %v695_v6 = vld [vmem:[%s1660_s9 + $0xd30] sm:$0xff] }
  0xf4   : > { %1070 = vmatmul.mubr.f32.vlgmr.msra.gmra.mxu0 %v267_v7  ;;  %1138 = vmatprep.subr.mxu1 %v626_v8  ;;  %v694_v7 = vld [vmem:[%s1660_s9 + $0xd28] sm:$0xff]  ;;  %v693_v8 = vld [vmem:[%s1660_s9 + $0xd20] sm:$0xff] }
  0xf5   : > { %1147 = vmatprep.subr.mxu0 %v688_v9  ;;  %1139 = vmatpush2.msra.mxu1 %v625_v10  ;;  %v692_v9 = vld [vmem:[%s1660_s9 + $0xd18] sm:$0xff]  ;;  %v691_v10 = vld [vmem:[%s1660_s9 + $0xd10] sm:$0xff] }
  0xf6   : > { %1140 = vmatprep.mubr.f32.mxu1 %v270_v11  ;;  %1148 = vmatpush1.msra.mxu0 %v687_v12  ;;  %v690_v11 = vld [vmem:[%s1660_s9 + $0xd08] sm:$0xff]  ;;  %v689_v12 = vld [vmem:[%s1660_s9 + $0xd00] sm:$0xff] }
  0xf7   : > { %1141 = vmatmul.mubr.f32.vlgmr.msra.gmra.mxu1 %v269_v13  ;;  %1149 = vmatprep.subr.mxu0 %v686_v14  ;;  %v271_v13 = vld [vmem:[%s1798_s5 + $0x60] sm:$0xff] }
  0xf8   : > { %1211 = vmatprep.mubr.f32.mxu0 %v272_v15  ;;  %1150 = vmatpush1.msra.mxu0 %v685_v16 }
  0xf9   : > { %1151 = vmatprep.subr.mxu0 %v684_v17 }
  0xfa   : > { %1152 = vmatpush1.msra.mxu0 %v683_v18 }
  0xfb   : > { %1153 = vmatprep.subr.mxu0 %v682_v19 }
  0xfc   : > { %1154 = vmatpush1.msra.mxu0 %v681_v20 }
  0xfd   : > { %1155 = vmatprep.subr.mxu0 %v680_v21 }
  0xfe   : > { %1156 = vmatpush1.msra.mxu0 %v679_v22 }
  0xff   : > { %1157 = vmatprep.subr.mxu0 %v678_v23 }
 0x100   : > { %1158 = vmatpush1.msra.mxu0 %v677_v24 }
 0x101   : > { %1159 = vmatprep.subr.mxu0 %v676_v25 }
 0x102   : > { %1160 = vmatpush1.msra.mxu0 %v675_v26 }
 0x103   : > { %1161 = vmatprep.subr.mxu0 %v674_v27 }
 0x104   : > { %1162 = vmatpush1.msra.mxu0 %v673_v28 }
 0x105   : > { %1163 = vmatprep.subr.mxu0 %v672_v29 }
 0x106   : > { %1164 = vmatpush1.msra.mxu0 %v671_v30 }
 0x107   : > { %1165 = vmatprep.subr.mxu0 %v670_v31 }
 0x108   : > { %1166 = vmatpush1.msra.mxu0 %v669_v32 }
 0x109   : > { %1167 = vmatprep.subr.mxu0 %v668_v33 }
 0x10a   : > { %1168 = vmatpush1.msra.mxu0 %v667_v34 }
 0x10b   : > { %1169 = vmatprep.subr.mxu0 %v666_v35 }
 0x10c   : > { %1170 = vmatpush1.msra.mxu0 %v665_v36 }
 0x10d   : > { %1171 = vmatprep.subr.mxu0 %v664_v37 }
 0x10e   : > { %1172 = vmatpush1.msra.mxu0 %v663_v38 }
 0x10f   : > { %1173 = vmatprep.subr.mxu0 %v662_v39 }
 0x110   : > { %1174 = vmatpush1.msra.mxu0 %v661_v40 }
 0x111   : > { %1175 = vmatprep.subr.mxu0 %v660_v41 }
 0x112   : > { %1176 = vmatpush1.msra.mxu0 %v659_v42 }
 0x113   : > { %1177 = vmatprep.subr.mxu0 %v658_v43 }
 0x114   : > { %1178 = vmatpush1.msra.mxu0 %v657_v44 }
 0x115   : > { %1179 = vmatprep.subr.mxu0 %v720_v45 }
 0x116   : > { %1180 = vmatpush2.msra.mxu0 %v719_v46  ;;  %v1555_v46 = vmov 1966171168  }
 0x117   : > { %1181 = vmatprep.subr.mxu0 %v718_v47  ;;  %v1236_v47 = vunpack.c.l.s4 %v1555_v46 }
 0x118   : > { %1182 = vmatpush2.msra.mxu0 %v717_v48  ;;  %v1238_v48 = vlaneseq }
 0x119   : > { %1183 = vmatprep.subr.mxu0 %v716_v49 }
 0x11a   : > { %1184 = vmatpush2.msra.mxu0 %v715_v50  ;;  %vm1252_vm0 = vcmp.lt.s32.totalorder %v1238_v48, 256 }
 0x11b   : > { %1185 = vmatprep.subr.mxu0 %v714_v51 }
 0x11c   : > { %1186 = vmatpush2.msra.mxu0 %v713_v52 }
 0x11d   : > { %1187 = vmatprep.subr.mxu0 %v712_v53 }
 0x11e   : > { %1188 = vmatpush2.msra.mxu0 %v711_v54 }
 0x11f   : > { %1189 = vmatprep.subr.mxu0 %v710_v55 }
 0x120   : > { %1190 = vmatpush2.msra.mxu0 %v709_v56 }
 0x121   : > { %1191 = vmatprep.subr.mxu0 %v708_v57  ;;  %v1237_v57 = vunpack.c.0.s8 %v1236_v47 }
 0x122   : > { %1192 = vmatpush2.msra.mxu0 %v707_v58  ;;  %v1239_v58 = vshrl.u32 %v1238_v48, 7 }
 0x123   : > { %1193 = vmatprep.subr.mxu0 %v706_v59 }
 0x124   : > { %1194 = vmatpush2.msra.mxu0 %v705_v60 }
 0x125   : > { %1195 = vmatprep.subr.mxu0 %v704_v61 }
 0x126   : > { %1196 = vmatpush2.msra.mxu0 %v703_v62 }
 0x127   : > { %1197 = vmatprep.subr.mxu0 %v702_v63 }
 0x128   : > { %1198 = vmatpush2.msra.mxu0 %v701_v0 }
 0x129   : > { %1199 = vmatprep.subr.mxu0 %v700_v1 }
 0x12a   : > { %1200 = vmatpush2.msra.mxu0 %v699_v2 }
 0x12b   : > { %1201 = vmatprep.subr.mxu0 %v698_v3 }
 0x12c   : > { %1202 = vmatpush2.msra.mxu0 %v697_v4  ;;  %v1240_v4 = vsub.s32 %v1237_v57, %v1239_v58 }
 0x12d   : > { %1203 = vmatprep.subr.mxu0 %v696_v5 }
 0x12e   : > { %1204 = vmatpush2.msra.mxu0 %v695_v6 }
 0x12f   : > { %1205 = vmatprep.subr.mxu0 %v694_v7 }
 0x130   : > { %1206 = vmatpush2.msra.mxu0 %v693_v8 }
 0x131   : > { %1207 = vmatprep.subr.mxu0 %v692_v9  ;;  %v787_v14 = vpop.f32.mrf.mxu0 }
 0x132   : > { %1208 = vmatpush2.msra.mxu0 %v691_v10  ;;  %v858_v15 = vpop.f32.mrf.mxu1 }
 0x133   : > { %1209 = vmatprep.subr.mxu0 %v690_v11  ;;  %v789_v16 = vpop.f32.mrf.mxu0  ;;  %v859_v19 = vadd.f32 %v858_v15, %v787_v14 }
 0x134   : > { %1210 = vmatpush2.msra.mxu0 %v689_v12  ;;  %v860_v18 = vpop.f32.mrf.mxu1 }
 0x135   : > { %1212 = vmatmul.mubr.f32.vlgmr.msra.gmra.mxu0 %v271_v13  ;;  %v861_v22 = vadd.f32 %v860_v18, %v789_v16 }
 0x172   : > { %v929_v17 = vpop.f32.mrf.mxu0 }
 0x173   : > { %v930_v23 = vadd.f32 %v929_v17, %v859_v19 }
 0x174   : > { %v931_v20 = vpop.f32.mrf.mxu0 }
 0x175   : > { %v1000_v21 = vpop.f32.mrf.mxu1  ;;  %v932_v25 = vadd.f32 %v931_v20, %v861_v22 }
 0x176   : > { %v1001_v27 = vadd.f32 %v1000_v21, %v930_v23 }
 0x177   : > { %v1002_v26 = vpop.f32.mrf.mxu1 }
 0x178   : > { %v1003_v30 = vadd.f32 %v1002_v26, %v932_v25 }
 0x1b4   : > { %v1071_v24 = vpop.f32.mrf.mxu0 }
 0x1b5   : > { %v1072_v31 = vadd.f32 %v1071_v24, %v1001_v27 }
 0x1b6   : > { %v1073_v28 = vpop.f32.mrf.mxu0 }
 0x1b7   : > { %v1142_v29 = vpop.f32.mrf.mxu1  ;;  %v1074_v32 = vadd.f32 %v1073_v28, %v1003_v30 }
 0x1b8   : > { %v1143_v34 = vadd.f32 %v1142_v29, %v1072_v31 }
 0x1b9   : > { %v1144_v33 = vpop.f32.mrf.mxu1 }
 0x1ba   : > { %v1145_v36 = vadd.f32 %v1144_v33, %v1074_v32 }
 0x1f5   : > { %v1213_v35 = vpop.f32.mrf.mxu0 }
 0x1f6   : > { %v1214_v37 = vadd.f32 %v1213_v35, %v1143_v34 }
 0x1f7   : > { %v1215_v38 = vpop.f32.mrf.mxu0 }
 0x1f8   : > { %1218 = vst [vmem:[%s250_s11] sm:$0xff] %v1214_v37  ;;  %v1220_v39 = vrot.slane %v1214_v37, 4  ;;  %v1255_v40 = vmul.f32 %v1214_v37, %v1214_v37  ;;  %v1216_v41 = vadd.f32 %v1215_v38, %v1145_v36 }
 0x1fa   : > { %v1221_v42 = vadd.f32 %v1220_v39, %v1214_v37  ;;  %v1257_v43 = vrot.slane %v1255_v40, 4  ;;  %1219 = vst [vmem:[%s250_s11 + $0x8] sm:$0xff] %v1216_v41  ;;  %v1226_v44 = vrot.slane %v1216_v41, 4  ;;  %v1256_v45 = vmul.f32 %v1216_v41, %v1216_v41 }
 0x1fc   : > { %v1222_v49 = vrot.slane %v1221_v42, 2  ;;  %v1258_v50 = vadd.f32 %v1257_v43, %v1255_v40  ;;  %v1227_v51 = vadd.f32 %v1226_v44, %v1216_v41  ;;  %v1263_v52 = vrot.slane %v1256_v45, 4 }
 0x1fe   : > { %v1223_v53 = vadd.f32 %v1222_v49, %v1221_v42  ;;  %v1259_v54 = vrot.slane %v1258_v50, 2  ;;  %v1228_v55 = vrot.slane %v1227_v51, 2  ;;  %v1264_v56 = vadd.f32 %v1263_v52, %v1256_v45 }
 0x200   : > { %v1224_v59 = vrot.slane %v1223_v53, 1  ;;  %v1260_v60 = vadd.f32 %v1259_v54, %v1258_v50  ;;  %v1229_v61 = vadd.f32 %v1228_v55, %v1227_v51  ;;  %v1265_v62 = vrot.slane %v1264_v56, 2 }
 0x202   : > { %v1261_v63 = vrot.slane %v1260_v60, 1  ;;  %v1230_v0 = vrot.slane %v1229_v61, 1  ;;  %v1266_v1 = vadd.f32 %v1265_v62, %v1264_v56  ;;  %v1225_v2 = vadd.f32 %v1224_v59, %v1223_v53 }
 0x204   : > { %v1231_v3 = vadd.f32 %v1230_v0, %v1229_v61  ;;  %v1267_v5 = vrot.slane %v1266_v1, 1  ;;  %v1262_v6 = vadd.f32 %v1261_v63, %v1260_v60 }
 0x206   : > { %v1234_v7 = vcombine.low %v1225_v2, %v1231_v3  ;;  %v1268_v8 = vadd.f32 %v1267_v5, %v1266_v1 }
 0x208   : > { %v1241_v9 = vrot.slane %v1234_v7, %v1240_v4  ;;  %v1271_v10 = vcombine.low %v1262_v6, %v1268_v8 }
 0x20a   : > { %v1248_v11 = vrot.slane %v1241_v9, %v1240_v4  ;;  %v1278_v12 = vrot.slane %v1271_v10, %v1240_v4 }
 0x20c   : > { %1254 = vst.msk [vmem:[%s254_s15] sm:$0x3] %vm1252_vm0, %v1248_v11  ;;  %v1285_v13 = vrot.slane %v1278_v12, %v1240_v4 }
 0x20e   : > { %1287 = vst.msk [vmem:[%s258_s25] sm:$0x3] %vm1252_vm0, %v1285_v13 }
 0x20f PF: > { %p15_p9 = scmp.ge.s32.totalorder %s1603_s20, 6   ;;  %s2174_s15 = smov %s1542_s16 }
 0x210   : > { %s2175_s16 = smov %s1546_s17  ;;  %s2176_s17 = smov %s1613_s23 }
 0x211   : > { %s2177_s18 = smov %s1603_s20  ;;  %17 = sbr.rel (!%p15_p9) target bundleno = 3 (0x3), region = 95 }
 0x216   :  { %1337 = vsyncpa [#allocation3], 1 }
 0x217   :  { %1339 = vsyncpa [#allocation3 + $0x1], 1 }

// kernel: g_svhn_forward.10
= control target key start
LH: loop header
LB: loop body
LE: loop exit
PB: predicated region body
PF: predicated region fallthrough
CT: control target
= control target key end

     0   :  { %s309_s12 = smov 0   ;;  %s332_s0 = inlined_call_operand.vmem [shape: f32[4,8,256], index: 0, kind: input, shape index: {}]   ;;  %s333_s1 = inlined_call_operand.vmem [shape: f32[1,256], index: 1, kind: input, shape index: {}]   ;;  %s334_s2 = inlined_call_operand.vmem [shape: f32[1,256], index: 2, kind: input, shape index: {}]   ;;  %s335_s3 = inlined_call_operand.vmem [shape: f32[4,8,256], index: 3, kind: output, shape index: {}]  }
   0x1 LB: > { %s260_s13 = sadd.s32 4294967295, %s287_s12   ;;  %p264_p0 = scmp.ge.s32.totalorder %s287_s12, 1  ;;  %s287_s12 = sphi %s309_s12, %s13_s12  }
   0x2   : > { %p137_p1 = scmp.lt.s32.totalorder %s287_s12, 5 }
   0x4   : > { %p138_p2 = pnand %p264_p0, %p137_p1 }
   0x5   : > { %p161_p3 = scmp.lt.s32.totalorder (!%p138_p2), %s260_s13, 3 }
   0x6   : > { %141 = sbr.rel (%p138_p2) target bundleno = 26 (0x1a), region = 32 }
   0xb   : > { %v175_v0 = vlaneseq  ;;  %s337_s13 = smov (!%p161_p3, %s260_s13), 3  ;;  %v173_v2 = vld [vmem:[%s333_s1] sm:$0x3] }
   0xc   : > { %v187_v3 = vld [vmem:[%s334_s2] sm:$0x3]  ;;  %s271_s18 = sshll.u32 %s337_s13, 4 }
   0xd   : > { %v176_v1 = vshrl.u32 %v175_v0, 7  ;;  %s165_s21 = scalar_lea.vmem %s332_s0, %s271_s18  ;;  %s170_s24 = scalar_lea.vmem %s335_s3, %s271_s18 }
   0xe   : > { %v171_v6 = vld [vmem:[%s165_s21] sm:$0xff]  ;;  %v172_v7 = vld [vmem:[%s165_s21 + $0x8] sm:$0xff] }
   0xf   : > { %v177_v4 = vsub.s32 0, %v176_v1  ;;  %v181_v5 = vsub.s32 1, %v176_v1 }
  0x11   : > { %v178_v8 = vrot.slane %v173_v2, %v177_v4  ;;  %v192_v9 = vrot.slane %v187_v3, %v177_v4  ;;  %v182_v10 = vrot.slane %v173_v2, %v181_v5  ;;  %v196_v11 = vrot.slane %v187_v3, %v181_v5 }
  0x13   : > { %v185_v12 = vmul.f32 %v178_v8, %v171_v6  ;;  %v186_v13 = vmul.f32 %v182_v10, %v172_v7 }
  0x15   : > { %v199_v14 = vadd.f32 %v192_v9, %v185_v12  ;;  %v200_v15 = vadd.f32 %v196_v11, %v186_v13 }
  0x17   : > { %v201_v16 = vmax.f32 %v199_v14, 0.0  ;;  %v202_v17 = vmax.f32 %v200_v15, 0.0 }
  0x19   : > { %203 = vst [vmem:[%s170_s24] sm:$0xff] %v201_v16  ;;  %204 = vst [vmem:[%s170_s24 + $0x8] sm:$0xff] %v202_v17 }
  0x1a PF: > { %s13_s12 = sadd.s32 1, %s287_s12  }
  0x1b   : > { %p10_p4 = scmp.ge.s32.totalorder %s13_s12, 6  }
  0x1d   :  { %12 = sbr.rel (!%p10_p4) target bundleno = 1 (0x1), region = 62 }

// kernel: g_svhn_forward.7
= control target key start
LH: loop header
LB: loop body
LE: loop exit
PB: predicated region body
PF: predicated region fallthrough
CT: control target
= control target key end

     0   :  { %10 = vsyncpa [#allocation3], 0  ;;  %s1183_s0 = inlined_call_operand.vmem [shape: f32[4,2,168], index: 0, kind: input, shape index: {}]   ;;  %s1184_s1 = inlined_call_operand.hbm [shape: f32[4,168,448], index: 1, kind: input, shape index: {}]   ;;  %s1185_s2 = inlined_call_operand.vmem [shape: f32[4,2,448], index: 2, kind: output, shape index: {0}]   ;;  %s1186_s3 = inlined_call_operand.vmem [shape: f32[4,1,448], index: 3, kind: output, shape index: {1}]   ;;  %s1187_s4 = inlined_call_operand.vmem [shape: f32[4,1,448], index: 4, kind: output, shape index: {2}]  }
   0x1   :  { %12 = vsyncpa [#allocation3 + $0x1], 0  ;;  %s953_s15 = smov 0   ;;  %s955_s16 = smov 0  }
   0x2   :  { %s957_s17 = smov 0   ;;  %s959_s18 = smov 0  }
   0x3 LB: > { %s972_s19 = sadd.s32 4294967295, %s921_s18   ;;  %s975_s20 = sadd.s32 1, %s921_s18   ;;  %s921_s18 = sphi %s959_s18, %s1198_s18   ;;  %s917_s17 = sphi %s957_s17, %s1197_s17   ;;  %s913_s16 = sphi %s955_s16, %s1196_s16   ;;  %s909_s15 = sphi %s953_s15, %s1195_s15  }
   0x4   : > { %s48_s21 = ssub.s32 %s921_s18, %s975_s20  ;;  %s51_s22 = sadd.s32 1, %s917_s17 }
   0x5   : > { %p49_p0 = scmp.eq.s32.totalorder %s48_s21, 0  ;;  %p58_p1 = scmp.ne.s32.totalorder %s917_s17, %s913_s16 }
   0x6   : > { %p59_p2 = scmp.eq.s32.totalorder %s921_s18, 0  ;;  %p64_p3 = scmp.ne.s32.totalorder %s913_s16, %s909_s15 }
   0x7   : > { %s985_s23 = scalar_select %p49_p0, %s917_s17, %s51_s22  }
   0x8   : > { %p60_p4 = por %p59_p2, %p58_p1  ;;  %p65_p5 = scmp.eq.s32.totalorder %s972_s19, 0 }
   0x9   : > { %p822_p6 = scmp.lt.s32.totalorder %s921_s18, 4  ;;  %s174_s25 = sand.u32 1, %s917_s17  }
   0xa   : > { %p989_p7 = por %p65_p5, %p64_p3  ;;  %s813_s26 = smul.u32 672, %s174_s25 }
   0xb   : > { %s814_s27 = smul.u32 10752, %s921_s18  ;;  %p995_p8 = pnand %p822_p6, %p60_p4 }
   0xc   : > { %s1189_s24 = scalar_select %p989_p7, 1, 0 }
   0xd   : > { %s1002_s5 = scalar_lea.hbm %s1184_s1, %s814_s27  ;;  %s178_s6 = scalar_lea.vmem [#allocation2], %s813_s26 }
   0xe   : > { %s185_s7 = sshll.u32 %s178_s6, 4  ;;  %s1007_s8 = scalar_lea.sflag [#allocation3], %s174_s25  ;;  %s1004_s7 = int_to_ptr.vmem [resolvable:$true] %s185_s7 }
   0xf   : > { %s859_s9 = scalar_lea.hbm %s1002_s5, 10752  ;;  %p861_p11 = pneg %p995_p8 }
  0x10   : > { %p860_p10 = scmp.ne.s32.totalorder %s1002_s5, %s859_s9  ;;  %s864_s12 = scalar_lea.hbm %s1184_s1, 43008 }
  0x11   : > { %p865_p0 = scmp.lt.s32.totalorder %s1002_s5, %s1184_s1  ;;  %p866_p1 = scmp.lt.s32.totalorder %s864_s12, %s859_s9 }
  0x12   : > { %p862_p12 = pnand %p861_p11, %p860_p10 }
  0x13   : > { %p867_p2 = por %p866_p1, %p865_p0 }
  0x14   : > { %p863_p13 = pneg %p862_p12 }
  0x16   : > { %p868_p3 = pnand %p867_p2, %p863_p13 }
  0x18   : > { %871 = shalt.err (!%p868_p3)
}
  0x19   : > { %s872_s15 = scalar_lea.vmem %s1004_s7, 10752  ;;  %s923_s21 = smov [#allocation2]  }
  0x1a   : > { %p873_p4 = scmp.ne.s32.totalorder %s1004_s7, %s872_s15  ;;  %s877_s22 = sshll.u32 %s923_s21, 4  ;;  %s878_s22 = int_to_ptr.vmem [resolvable:$false] %s877_s22 }
  0x1b   : > { %s879_s25 = scalar_lea.vmem %s878_s22, 21504  ;;  %p880_p10 = scmp.lt.s32.totalorder %s1004_s7, %s878_s22 }
  0x1c   : > { %p875_p5 = pnand %p873_p4, %p861_p11  ;;  %p881_p12 = scmp.lt.s32.totalorder %s879_s25, %s872_s15 }
  0x1e   : > { %p876_p6 = pneg %p875_p5  ;;  %p882_p9 = por %p881_p12, %p880_p10 }
  0x20   : > { %p883_p7 = pnand %p882_p9, %p876_p6 }
  0x22   : > { %886 = shalt.err (!%p883_p7)
}
  0x23   : > { %s924_s26 = smov 512   ;;  %s925_s27 = smov 32  }
  0x24   : > { %821 = dma.hbm_to_vmem [thread:$0]  (!%p995_p8), %s1002_s5, 10752, %s1004_s7, %s1007_s8, %s924_s26, %s924_s26, %s925_s27  }
  0x25   : > { %p193_p11 = scmp.lt.s32.totalorder %s921_s18, 5  ;;  %p1191_p13 = scmp.ge.s32.totalorder %s921_s18, 1 }
  0x27   : > { %p194_p0 = pnand %p1191_p13, %p193_p11 }
  0x28   : > { %s199_s29 = sand.u32 (!%p194_p0), 1, %s913_s16   ;;  %p1192_p7 = scmp.ne.s32.totalorder (!%p194_p0), %s1189_s24, 0 }
  0x29   : > { %197 = sbr.rel (%p194_p0) target bundleno = 316 (0x13c), region = 28  ;;  %s200_s6 = scalar_lea.sflag (!%p194_p0), [#allocation3], %s199_s29 }
  0x2a   : > { %s815_s30 = smul.u32 (!%p194_p0), 672, %s199_s29 }
  0x2c   : > { %s1032_s9 = scalar_lea.vmem (!%p194_p0), [#allocation2], %s815_s30 }
  0x2e   : > { %904 = dma.done.wait (%p1192_p7), %s200_s6, 10752  }
  0x2f   : > { %906 = vsyncadd (%p1192_p7), %s200_s6, 4294956544  ;;  %v321_v0 = vld [vmem:[%s1032_s9 + $0x1e8] sm:$0xff]  ;;  %v323_v1 = vld [vmem:[%s1032_s9 + $0x1f8] sm:$0xff]  ;;  %p241_p8 = scmp.lt.s32.totalorder %s972_s19, 3  ;;  %vm354_vm0 = vcmask 326656   ;;  %vm521_vm1 = vcmask 1041408  }
  0x30   : > { %v320_v2 = vld [vmem:[%s1032_s9 + $0x1e0] sm:$0xff]  ;;  %357 = vmatprep.subr.mxu0 %v321_v0  ;;  %428 = vmatprep.subr.mxu1 %v323_v1  ;;  %v322_v3 = vld [vmem:[%s1032_s9 + $0x1f0] sm:$0xff]  ;;  %v317_v4 = vld [vmem:[%s1032_s9 + $0x1c8] sm:$0xff]  ;;  %vm522_vm2 = vcmask 1043458   ;;  %vm524_vm3 = vcmask 1045508   ;;  %vm550_vm4 = vcmask 517120  }
  0x31   : > { %v319_v5 = vld [vmem:[%s1032_s9 + $0x1d8] sm:$0xff]  ;;  %358 = vmatpush1.msra.mxu0 %v320_v2  ;;  %429 = vmatpush1.msra.mxu1 %v322_v3  ;;  %v316_v6 = vld [vmem:[%s1032_s9 + $0x1c0] sm:$0xff]  ;;  %v318_v7 = vld [vmem:[%s1032_s9 + $0x1d0] sm:$0xff]  ;;  %s1200_s19 = smov (!%p241_p8, %s972_s19), 3  ;;  %vm526_vm6 = vcmask 523270  }
  0x32   : > { %v313_v8 = vld [vmem:[%s1032_s9 + $0x1a8] sm:$0xff]  ;;  %359 = vmatprep.subr.mxu0 %v317_v4  ;;  %430 = vmatprep.subr.mxu1 %v319_v5  ;;  %v315_v9 = vld [vmem:[%s1032_s9 + $0x1b8] sm:$0xff]  ;;  %v312_v10 = vld [vmem:[%s1032_s9 + $0x1a0] sm:$0xff]  ;;  %s1109_s18 = sshll.u32 %s1200_s19, 2  ;;  %s812_s7 = sshll.u32 %s1200_s19, 3 }
  0x33   : > { %v314_v11 = vld [vmem:[%s1032_s9 + $0x1b0] sm:$0xff]  ;;  %360 = vmatpush1.msra.mxu0 %v316_v6  ;;  %431 = vmatpush1.msra.mxu1 %v318_v7  ;;  %v309_v12 = vld [vmem:[%s1032_s9 + $0x188] sm:$0xff]  ;;  %v311_v13 = vld [vmem:[%s1032_s9 + $0x198] sm:$0xff]  ;;  %s245_s5 = scalar_lea.vmem %s1183_s0, %s1109_s18  ;;  %s250_s19 = scalar_lea.vmem %s1185_s2, %s812_s7 }
  0x34   : > { %361 = vmatprep.subr.mxu0 %v313_v8  ;;  %432 = vmatprep.subr.mxu1 %v315_v9  ;;  %v308_v14 = vld [vmem:[%s1032_s9 + $0x180] sm:$0xff]  ;;  %v310_v15 = vld [vmem:[%s1032_s9 + $0x190] sm:$0xff]  ;;  %v305_v16 = vld [vmem:[%s1032_s9 + $0x168] sm:$0xff]  ;;  %s254_s13 = scalar_lea.vmem %s1186_s3, %s1109_s18  ;;  %s258_s21 = scalar_lea.vmem %s1187_s4, %s1109_s18 }
  0x35   : > { %362 = vmatpush1.msra.mxu0 %v312_v10  ;;  %433 = vmatpush1.msra.mxu1 %v314_v11  ;;  %v307_v17 = vld [vmem:[%s1032_s9 + $0x178] sm:$0xff]  ;;  %v304_v18 = vld [vmem:[%s1032_s9 + $0x160] sm:$0xff]  ;;  %v306_v19 = vld [vmem:[%s1032_s9 + $0x170] sm:$0xff] }
  0x36   : > { %363 = vmatprep.subr.mxu0 %v309_v12  ;;  %434 = vmatprep.subr.mxu1 %v311_v13  ;;  %v301_v20 = vld [vmem:[%s1032_s9 + $0x148] sm:$0xff]  ;;  %v303_v21 = vld [vmem:[%s1032_s9 + $0x158] sm:$0xff]  ;;  %v300_v22 = vld [vmem:[%s1032_s9 + $0x140] sm:$0xff] }
  0x37   : > { %364 = vmatpush1.msra.mxu0 %v308_v14  ;;  %435 = vmatpush1.msra.mxu1 %v310_v15  ;;  %v302_v23 = vld [vmem:[%s1032_s9 + $0x150] sm:$0xff]  ;;  %v297_v24 = vld [vmem:[%s1032_s9 + $0x128] sm:$0xff]  ;;  %v299_v25 = vld [vmem:[%s1032_s9 + $0x138] sm:$0xff] }
  0x38   : > { %365 = vmatprep.subr.mxu0 %v305_v16  ;;  %436 = vmatprep.subr.mxu1 %v307_v17  ;;  %v296_v26 = vld [vmem:[%s1032_s9 + $0x120] sm:$0xff]  ;;  %v298_v27 = vld [vmem:[%s1032_s9 + $0x130] sm:$0xff]  ;;  %v293_v28 = vld [vmem:[%s1032_s9 + $0x108] sm:$0xff] }
  0x39   : > { %366 = vmatpush1.msra.mxu0 %v304_v18  ;;  %437 = vmatpush1.msra.mxu1 %v306_v19  ;;  %v295_v29 = vld [vmem:[%s1032_s9 + $0x118] sm:$0xff]  ;;  %v292_v30 = vld [vmem:[%s1032_s9 + $0x100] sm:$0xff]  ;;  %v294_v31 = vld [vmem:[%s1032_s9 + $0x110] sm:$0xff] }
  0x3a   : > { %367 = vmatprep.subr.mxu0 %v301_v20  ;;  %438 = vmatprep.subr.mxu1 %v303_v21  ;;  %v289_v32 = vld [vmem:[%s1032_s9 + $0xe8] sm:$0xff]  ;;  %v291_v33 = vld [vmem:[%s1032_s9 + $0xf8] sm:$0xff]  ;;  %v288_v34 = vld [vmem:[%s1032_s9 + $0xe0] sm:$0xff] }
  0x3b   : > { %368 = vmatpush1.msra.mxu0 %v300_v22  ;;  %439 = vmatpush1.msra.mxu1 %v302_v23  ;;  %v290_v35 = vld [vmem:[%s1032_s9 + $0xf0] sm:$0xff]  ;;  %v285_v36 = vld [vmem:[%s1032_s9 + $0xc8] sm:$0xff]  ;;  %v287_v37 = vld [vmem:[%s1032_s9 + $0xd8] sm:$0xff]  ;;  %v926_v22 = vmov 1983009808  }
  0x3c   : > { %369 = vmatprep.subr.mxu0 %v297_v24  ;;  %440 = vmatprep.subr.mxu1 %v299_v25  ;;  %v284_v38 = vld [vmem:[%s1032_s9 + $0xc0] sm:$0xff]  ;;  %v286_v39 = vld [vmem:[%s1032_s9 + $0xd0] sm:$0xff]  ;;  %v281_v40 = vld [vmem:[%s1032_s9 + $0xa8] sm:$0xff]  ;;  %v506_v23 = vunpack.c.l.s4 %v926_v22  ;;  %v508_v24 = vlaneseq }
  0x3d   : > { %370 = vmatpush1.msra.mxu0 %v296_v26  ;;  %441 = vmatpush1.msra.mxu1 %v298_v27  ;;  %v283_v41 = vld [vmem:[%s1032_s9 + $0xb8] sm:$0xff]  ;;  %v280_v42 = vld [vmem:[%s1032_s9 + $0xa0] sm:$0xff]  ;;  %v282_v43 = vld [vmem:[%s1032_s9 + $0xb0] sm:$0xff] }
  0x3e   : > { %371 = vmatprep.subr.mxu0 %v293_v28  ;;  %442 = vmatprep.subr.mxu1 %v295_v29  ;;  %v277_v44 = vld [vmem:[%s1032_s9 + $0x88] sm:$0xff]  ;;  %v279_v45 = vld [vmem:[%s1032_s9 + $0x98] sm:$0xff]  ;;  %v276_v46 = vld [vmem:[%s1032_s9 + $0x80] sm:$0xff]  ;;  %v507_v25 = vunpack.c.0.s8 %v506_v23  ;;  %v1136_v26 = vshrl.u32 %v508_v24, 7  ;;  %vm589_vm9 = vcmp.lt.s32.totalorder %v508_v24, 448 }
  0x3f   : > { %372 = vmatpush1.msra.mxu0 %v292_v30  ;;  %443 = vmatpush1.msra.mxu1 %v294_v31  ;;  %v278_v47 = vld [vmem:[%s1032_s9 + $0x90] sm:$0xff]  ;;  %v273_v48 = vld [vmem:[%s1032_s9 + $0x68] sm:$0xff]  ;;  %v275_v49 = vld [vmem:[%s1032_s9 + $0x78] sm:$0xff] }
  0x40   : > { %373 = vmatprep.subr.mxu0 %v289_v32  ;;  %444 = vmatprep.subr.mxu1 %v291_v33  ;;  %v272_v50 = vld [vmem:[%s1032_s9 + $0x60] sm:$0xff]  ;;  %v274_v51 = vld [vmem:[%s1032_s9 + $0x70] sm:$0xff]  ;;  %v269_v52 = vld [vmem:[%s1032_s9 + $0x48] sm:$0xff]  ;;  %v510_v29 = vsub.s32 %v507_v25, %v1136_v26 }
  0x41   : > { %374 = vmatpush1.msra.mxu0 %v288_v34  ;;  %445 = vmatpush1.msra.mxu1 %v290_v35  ;;  %v271_v53 = vld [vmem:[%s1032_s9 + $0x58] sm:$0xff]  ;;  %v268_v54 = vld [vmem:[%s1032_s9 + $0x40] sm:$0xff]  ;;  %v270_v55 = vld [vmem:[%s1032_s9 + $0x50] sm:$0xff] }
  0x42   : > { %375 = vmatprep.subr.mxu0 %v285_v36  ;;  %446 = vmatprep.subr.mxu1 %v287_v37  ;;  %v265_v56 = vld [vmem:[%s1032_s9 + $0x28] sm:$0xff]  ;;  %v267_v57 = vld [vmem:[%s1032_s9 + $0x38] sm:$0xff]  ;;  %v264_v58 = vld [vmem:[%s1032_s9 + $0x20] sm:$0xff] }
  0x43   : > { %376 = vmatpush1.msra.mxu0 %v284_v38  ;;  %447 = vmatpush1.msra.mxu1 %v286_v39  ;;  %v266_v59 = vld [vmem:[%s1032_s9 + $0x30] sm:$0xff]  ;;  %v261_v60 = vld [vmem:[%s1032_s9 + $0x8] sm:$0xff]  ;;  %v263_v61 = vld [vmem:[%s1032_s9 + $0x18] sm:$0xff] }
  0x44   : > { %377 = vmatprep.subr.mxu0 %v281_v40  ;;  %448 = vmatprep.subr.mxu1 %v283_v41  ;;  %v260_v62 = vld [vmem:[%s1032_s9] sm:$0xff]  ;;  %v262_v63 = vld [vmem:[%s1032_s9 + $0x10] sm:$0xff]  ;;  %v341_v0 = vld [vmem:[%s1032_s9 + $0x288] sm:$0xff] }
  0x45   : > { %378 = vmatpush1.msra.mxu0 %v280_v42  ;;  %449 = vmatpush1.msra.mxu1 %v282_v43  ;;  %v343_v1 = vld [vmem:[%s1032_s9 + $0x298] sm:$0xff]  ;;  %v340_v2 = vld [vmem:[%s1032_s9 + $0x280] sm:$0xff]  ;;  %v342_v3 = vld [vmem:[%s1032_s9 + $0x290] sm:$0xff] }
  0x46   : > { %379 = vmatprep.subr.mxu0 %v277_v44  ;;  %450 = vmatprep.subr.mxu1 %v279_v45  ;;  %v337_v4 = vld [vmem:[%s1032_s9 + $0x268] sm:$0xff]  ;;  %v339_v5 = vld [vmem:[%s1032_s9 + $0x278] sm:$0xff]  ;;  %v336_v6 = vld [vmem:[%s1032_s9 + $0x260] sm:$0xff] }
  0x47   : > { %380 = vmatpush1.msra.mxu0 %v276_v46  ;;  %451 = vmatpush1.msra.mxu1 %v278_v47  ;;  %v338_v7 = vld [vmem:[%s1032_s9 + $0x270] sm:$0xff]  ;;  %v333_v8 = vld [vmem:[%s1032_s9 + $0x248] sm:$0xff]  ;;  %v335_v9 = vld [vmem:[%s1032_s9 + $0x258] sm:$0xff] }
  0x48   : > { %381 = vmatprep.subr.mxu0 %v273_v48  ;;  %452 = vmatprep.subr.mxu1 %v275_v49  ;;  %v332_v10 = vld [vmem:[%s1032_s9 + $0x240] sm:$0xff]  ;;  %v334_v11 = vld [vmem:[%s1032_s9 + $0x250] sm:$0xff]  ;;  %v329_v13 = vld [vmem:[%s1032_s9 + $0x228] sm:$0xff] }
  0x49   : > { %382 = vmatpush1.msra.mxu0 %v272_v50  ;;  %453 = vmatpush1.msra.mxu1 %v274_v51  ;;  %v806_v12 = vld.sshfl [vmem:[%s245_s5] sm:$0x33 pattern:$0x76325410]  ;;  %v331_v14 = vld [vmem:[%s1032_s9 + $0x238] sm:$0xff]  ;;  %v330_v16 = vld [vmem:[%s1032_s9 + $0x230] sm:$0xff] }
  0x4a   : > { %383 = vmatprep.subr.mxu0 %v269_v52  ;;  %454 = vmatprep.subr.mxu1 %v271_v53  ;;  %v328_v15 = vld [vmem:[%s1032_s9 + $0x220] sm:$0xff]  ;;  %v325_v17 = vld [vmem:[%s1032_s9 + $0x208] sm:$0xff]  ;;  %v327_v18 = vld [vmem:[%s1032_s9 + $0x218] sm:$0xff]  ;;  %v352_v19 = vcombine.high %v806_v12, %v806_v12 }
  0x4b   : > { %384 = vmatpush1.msra.mxu0 %v268_v54  ;;  %455 = vmatpush1.msra.mxu1 %v270_v55  ;;  %v324_v20 = vld [vmem:[%s1032_s9 + $0x200] sm:$0xff]  ;;  %v326_v21 = vld [vmem:[%s1032_s9 + $0x210] sm:$0xff]  ;;  %vm1142_vm5 = vmor %vm522_vm2, %vm521_vm1 }
  0x4c   : > { %385 = vmatprep.subr.mxu0 %v265_v56  ;;  %456 = vmatprep.subr.mxu1 %v267_v57  ;;  %vm525_vm7 = vmor %vm524_vm3, %vm1142_vm5 }
  0x4d   : > { %386 = vmatpush1.msra.mxu0 %v264_v58  ;;  %457 = vmatpush1.msra.mxu1 %v266_v59  ;;  %vm527_vm8 = vmor %vm526_vm6, %vm525_vm7 }
  0x4e   : > { %387 = vmatprep.subr.mxu0 %v261_v60  ;;  %458 = vmatprep.subr.mxu1 %v263_v61  ;;  %v927_v61 = vmov 1966171168  }
  0x4f   : > { %388 = vmatpush1.msra.mxu0 %v260_v62  ;;  %459 = vmatpush1.msra.mxu1 %v262_v63  ;;  %v565_v62 = vunpack.c.l.s4 %v927_v61 }
  0x50   : > { %411 = vmatprep.subr.mxu0 %v341_v0  ;;  %482 = vmatprep.subr.mxu1 %v343_v1 }
  0x51   : > { %412 = vmatpush2.msra.mxu0 %v340_v2  ;;  %483 = vmatpush2.msra.mxu1 %v342_v3 }
  0x52   : > { %413 = vmatprep.subr.mxu0 %v337_v4  ;;  %484 = vmatprep.subr.mxu1 %v339_v5 }
  0x53   : > { %414 = vmatpush2.msra.mxu0 %v336_v6  ;;  %485 = vmatpush2.msra.mxu1 %v338_v7 }
  0x54   : > { %415 = vmatprep.subr.mxu0 %v333_v8  ;;  %486 = vmatprep.subr.mxu1 %v335_v9 }
  0x55   : > { %416 = vmatpush2.msra.mxu0 %v332_v10  ;;  %487 = vmatpush2.msra.mxu1 %v334_v11  ;;  %v566_v11 = vunpack.c.0.s8 %v565_v62 }
  0x56   : > { %417 = vmatprep.subr.mxu0 %v329_v13  ;;  %488 = vmatprep.subr.mxu1 %v331_v14 }
  0x57   : > { %418 = vmatpush2.msra.mxu0 %v328_v15  ;;  %489 = vmatpush2.msra.mxu1 %v330_v16 }
  0x58   : > { %419 = vmatprep.subr.mxu0 %v325_v17  ;;  %490 = vmatprep.subr.mxu1 %v327_v18 }
  0x59   : > { %420 = vmatpush2.msra.mxu0 %v324_v20  ;;  %807 = vmatprep.mubr.msk.f32.mxu0 %vm354_vm0, %v352_v19 }
  0x5a   : > { %491 = vmatpush2.msra.mxu1 %v326_v21  ;;  %808 = vmatprep.mubr.msk.f32.mxu1 %vm354_vm0, %v352_v19 }
  0x5b   : > { %422 = vmatmul.mubr.f32.vlgmr.msra.gmra.mxu0 %v806_v12  ;;  %493 = vmatmul.mubr.f32.vlgmr.msra.gmra.mxu1 %v806_v12 }
 0x11b   : > { %v423_v27 = vpop.f32.mrf.mxu0  ;;  %v494_v28 = vpop.f32.mrf.mxu1 }
 0x11c   : > { %v529_v30 = vsel %vm521_vm1, %v423_v27, 0.0  ;;  %v592_v31 = vmul.f32 %v423_v27, %v423_v27  ;;  %v543_v32 = vsel %vm521_vm1, %v494_v28, 0.0  ;;  %v594_v33 = vmul.f32 %v494_v28, %v494_v28 }
 0x11d   : > { %v530_v34 = vrot.slane %v529_v30, 4  ;;  %v544_v35 = vrot.slane %v543_v32, 4  ;;  %v425_v36 = vpop.f32.mrf.mxu0  ;;  %v496_v37 = vpop.f32.mrf.mxu1 }
 0x11e   : > { %v596_v39 = vsel %vm521_vm1, %v592_v31, 0.0  ;;  %v610_v40 = vsel %vm521_vm1, %v594_v33, 0.0  ;;  %v503_v41 = vcombine.low %v423_v27, %v425_v36  ;;  %v536_v42 = vsel %vm521_vm1, %v425_v36, 0.0 }
 0x11f   : > { %v531_v43 = vadd.f32 %v530_v34, %v529_v30  ;;  %v597_v44 = vrot.slane %v596_v39, 4  ;;  %v545_v45 = vadd.f32 %v544_v35, %v543_v32  ;;  %v611_v46 = vrot.slane %v610_v40, 4 }
 0x120   : > { %v511_v47 = vrot.slane %v503_v41, %v510_v29  ;;  %v537_v48 = vrot.slane %v536_v42, 4  ;;  %v593_v49 = vmul.f32 %v425_v36, %v425_v36  ;;  %v504_v50 = vcombine.low %v494_v28, %v496_v37 }
 0x121   : > { %v532_v51 = vrot.slane %v531_v43, 2  ;;  %v598_v52 = vadd.f32 %v597_v44, %v596_v39  ;;  %v546_v53 = vrot.slane %v545_v45, 2  ;;  %v551_v57 = vsel %vm550_vm4, %v496_v37, 0.0 }
 0x122   : > { %v538_v54 = vadd.f32 %v537_v48, %v536_v42  ;;  %v603_v55 = vsel %vm521_vm1, %v593_v49, 0.0  ;;  %v518_v56 = vrot.slane %v504_v50, %v510_v29  ;;  %v612_v60 = vadd.f32 %v611_v46, %v610_v40 }
 0x123   : > { %v533_v58 = vadd.f32 %v532_v51, %v531_v43  ;;  %v599_v59 = vrot.slane %v598_v52, 2  ;;  %v604_v0 = vrot.slane %v603_v55, 4  ;;  %v552_v2 = vrot.slane %v551_v57, 4 }
 0x124   : > { %v539_v63 = vrot.slane %v538_v54, 2  ;;  %v519_v1 = vcombine.low %v511_v47, %v518_v56  ;;  %v547_v4 = vadd.f32 %v546_v53, %v545_v45  ;;  %v595_v8 = vmul.f32 %v496_v37, %v496_v37 }
 0x125   : > { %v534_v3 = vrot.slane %v533_v58, 1  ;;  %v605_v6 = vadd.f32 %v604_v0, %v603_v55  ;;  %v553_v7 = vadd.f32 %v552_v2, %v551_v57  ;;  %v600_v9 = vadd.f32 %v599_v59, %v598_v52 }
 0x126   : > { %v540_v5 = vadd.f32 %v539_v63, %v538_v54  ;;  %528 = vst.msk [vmem:[%s250_s19] sm:$0xff] %vm527_vm8, %v519_v1  ;;  %v613_v10 = vrot.slane %v612_v60, 2  ;;  %v617_v15 = vsel %vm550_vm4, %v595_v8, 0.0  ;;  %v548_v16 = vrot.slane %v547_v4, 1 }
 0x127   : > { %v606_v13 = vrot.slane %v605_v6, 2  ;;  %v554_v14 = vrot.slane %v553_v7, 2  ;;  %v618_v17 = vrot.slane %v617_v15, 4  ;;  %v535_v18 = vadd.f32 %v534_v3, %v533_v58 }
 0x128   : > { %v541_v12 = vrot.slane %v540_v5, 1  ;;  %v601_v22 = vrot.slane %v600_v9, 1  ;;  %v614_v23 = vadd.f32 %v613_v10, %v612_v60  ;;  %v569_v28 = vsub.s32 %v566_v11, %v1136_v26 }
 0x129   : > { %v607_v20 = vadd.f32 %v606_v13, %v605_v6  ;;  %v555_v21 = vadd.f32 %v554_v14, %v553_v7  ;;  %v619_v25 = vadd.f32 %v618_v17, %v617_v15  ;;  %v549_v32 = vadd.f32 %v548_v16, %v547_v4 }
 0x12a   : > { %v542_v19 = vadd.f32 %v541_v12, %v540_v5  ;;  %v602_v35 = vadd.f32 %v601_v22, %v600_v9  ;;  %v615_v36 = vrot.slane %v614_v23, 1 }
 0x12b   : > { %v608_v29 = vrot.slane %v607_v20, 1  ;;  %v556_v30 = vrot.slane %v555_v21, 1  ;;  %v620_v31 = vrot.slane %v619_v25, 2 }
 0x12c   : > { %v562_v27 = vcombine.low %v535_v18, %v542_v19  ;;  %v616_v43 = vadd.f32 %v615_v36, %v614_v23 }
 0x12d   : > { %v609_v33 = vadd.f32 %v608_v29, %v607_v20  ;;  %v557_v34 = vadd.f32 %v556_v30, %v555_v21  ;;  %v621_v37 = vadd.f32 %v620_v31, %v619_v25 }
 0x12e   : > { %v570_v38 = vrot.slane %v562_v27, %v569_v28 }
 0x12f   : > { %v563_v39 = vcombine.low %v549_v32, %v557_v34  ;;  %v628_v40 = vcombine.low %v602_v35, %v609_v33  ;;  %v622_v41 = vrot.slane %v621_v37, 1 }
 0x131   : > { %v577_v42 = vrot.slane %v563_v39, %v569_v28  ;;  %v623_v44 = vadd.f32 %v622_v41, %v621_v37  ;;  %v636_v26 = vrot.slane %v628_v40, %v569_v28 }
 0x133   : > { %v578_v45 = vcombine.low %v570_v38, %v577_v42  ;;  %v629_v46 = vcombine.low %v616_v43, %v623_v44 }
 0x135   : > { %v585_v47 = vrot.slane %v578_v45, %v569_v28  ;;  %v643_v48 = vrot.slane %v629_v46, %v569_v28 }
 0x137   : > { %591 = vst.msk [vmem:[%s254_s13] sm:$0xf] %vm589_vm9, %v585_v47  ;;  %v644_v49 = vcombine.low %v636_v26, %v643_v48 }
 0x139   : > { %v651_v50 = vrot.slane %v644_v49, %v569_v28 }
 0x13b   : > { %653 = vst.msk [vmem:[%s258_s21] sm:$0xf] %vm589_vm9, %v651_v50 }
 0x13c PF: > { %p15_p9 = scmp.ge.s32.totalorder %s975_s20, 6   ;;  %s1195_s15 = smov %s913_s16 }
 0x13d   : > { %s1196_s16 = smov %s917_s17  ;;  %s1197_s17 = smov %s985_s23 }
 0x13e   : > { %s1198_s18 = smov %s975_s20  ;;  %17 = sbr.rel (!%p15_p9) target bundleno = 3 (0x3), region = 95 }
 0x143   :  { %703 = vsyncpa [#allocation3], 1 }
 0x144   :  { %705 = vsyncpa [#allocation3 + $0x1], 1 }

// kernel: g_svhn_forward.11
= control target key start
LH: loop header
LB: loop body
LE: loop exit
PB: predicated region body
PF: predicated region fallthrough
CT: control target
= control target key end

     0   :  { %s1456_s9 = smov 0   ;;  %s1458_s10 = smov 0   ;;  %s1587_s0 = inlined_call_operand.vmem [shape: bf16[4,32,1024], index: 0, kind: input, shape index: {}]   ;;  %s1588_s1 = inlined_call_operand.vmem [shape: bf16[4,1024,128], index: 1, kind: input, shape index: {}]   ;;  %s1589_s2 = inlined_call_operand.vmem [shape: f32[4,32,128], index: 2, kind: output, shape index: {}]  }
   0x1   :  { %s1460_s11 = smov 0  }
   0x2 LB: > { %s24_s12 = sadd.s32 1, %s1435_s10  ;;  %p1125_p0 = scmp.ge.s32.totalorder %s1439_s11, 1  ;;  %s1439_s11 = sphi %s1460_s11, %s12_s11   ;;  %s1435_s10 = sphi %s1458_s10, %s1591_s10   ;;  %s1431_s9 = sphi %s1456_s9, %s1590_s9  }
   0x3   : > { %p26_p1 = scmp.ge.s32.totalorder %s24_s12, 4  ;;  %p144_p2 = scmp.lt.s32.totalorder %s1439_s11, 5 }
   0x5   : > { %s1593_s12 = smov (%p26_p1, %s24_s12), 0  ;;  %p145_p3 = pnand %p1125_p0, %p144_p2 }
   0x6   : > { %p181_p4 = scmp.lt.s32.totalorder (!%p145_p3), %s1431_s9, 3 }
   0x7   : > { %148 = sbr.rel (%p145_p3) target bundleno = 297 (0x129), region = 28 }
   0xc   : > { %s1595_s9 = smov (!%p181_p4, %s1431_s9), 3 }
   0xd   : > { %s1215_s13 = sshll.u32 %s1595_s9, 9  ;;  %s1214_s17 = sshll.u32 %s1595_s9, 7 }
   0xe   : > { %s1480_s16 = scalar_lea.vmem %s1588_s1, %s1215_s13  ;;  %s1516_s20 = scalar_lea.vmem %s1587_s0, %s1214_s17 }
   0xf   : > { %v1353_v0 = vld [vmem:[%s1480_s16 + $0x78] sm:$0xff]   ;;  %v1357_v4 = vld [vmem:[%s1480_s16 + $0x70] sm:$0xff]   ;;  %v1361_v8 = vld [vmem:[%s1480_s16 + $0x68] sm:$0xff]   ;;  %s1216_s21 = sshll.u32 %s1595_s9, 5 }
  0x10   : > { %v1354_v1 = vld [vmem:[%s1480_s16 + $0xf8] sm:$0xff]   ;;  %1217 = vmatprep.subr.bf16.mxu0 %v1353_v0  ;;  %v1358_v5 = vld [vmem:[%s1480_s16 + $0xf0] sm:$0xff]   ;;  %v1362_v9 = vld [vmem:[%s1480_s16 + $0xe8] sm:$0xff]   ;;  %s1572_s24 = scalar_lea.vmem %s1589_s2, %s1216_s21 }
  0x11   : > { %v1355_v2 = vld [vmem:[%s1480_s16 + $0x38] sm:$0xff]   ;;  %1245 = vmatprep.subr.bf16.mxu1 %v1354_v1  ;;  %v1359_v6 = vld [vmem:[%s1480_s16 + $0x30] sm:$0xff]   ;;  %v1363_v10 = vld [vmem:[%s1480_s16 + $0x28] sm:$0xff]  }
  0x12   : > { %v1356_v3 = vld [vmem:[%s1480_s16 + $0xb8] sm:$0xff]   ;;  %1218 = vmatpush3.bf16.msra.mxu0 %v1355_v2  ;;  %v1360_v7 = vld [vmem:[%s1480_s16 + $0xb0] sm:$0xff]   ;;  %v1364_v11 = vld [vmem:[%s1480_s16 + $0xa8] sm:$0xff]  }
  0x13   : > { %1246 = vmatpush3.bf16.msra.mxu1 %v1356_v3  ;;  %1219 = vmatprep.subr.bf16.mxu0 %v1357_v4  ;;  %v1365_v12 = vld [vmem:[%s1480_s16 + $0x60] sm:$0xff]   ;;  %v1369_v16 = vld [vmem:[%s1480_s16 + $0x58] sm:$0xff]   ;;  %v1373_v20 = vld [vmem:[%s1480_s16 + $0x50] sm:$0xff]  }
  0x14   : > { %1247 = vmatprep.subr.bf16.mxu1 %v1358_v5  ;;  %v1366_v13 = vld [vmem:[%s1480_s16 + $0xe0] sm:$0xff]   ;;  %v1370_v17 = vld [vmem:[%s1480_s16 + $0xd8] sm:$0xff]   ;;  %v1374_v21 = vld [vmem:[%s1480_s16 + $0xd0] sm:$0xff]  }
  0x15   : > { %v1367_v14 = vld [vmem:[%s1480_s16 + $0x20] sm:$0xff]   ;;  %v1371_v18 = vld [vmem:[%s1480_s16 + $0x18] sm:$0xff]   ;;  %v1375_v22 = vld [vmem:[%s1480_s16 + $0x10] sm:$0xff]  }
  0x16   : > { %1220 = vmatpush3.bf16.msra.mxu0 %v1359_v6  ;;  %v1368_v15 = vld [vmem:[%s1480_s16 + $0xa0] sm:$0xff]   ;;  %v1372_v19 = vld [vmem:[%s1480_s16 + $0x98] sm:$0xff]   ;;  %v1376_v23 = vld [vmem:[%s1480_s16 + $0x90] sm:$0xff]  }
  0x17   : > { %1248 = vmatpush3.bf16.msra.mxu1 %v1360_v7  ;;  %1221 = vmatprep.subr.bf16.mxu0 %v1361_v8  ;;  %v1377_v24 = vld [vmem:[%s1480_s16 + $0x48] sm:$0xff]   ;;  %v1381_v28 = vld [vmem:[%s1480_s16 + $0x40] sm:$0xff]   ;;  %v1385_v40 = vld [vmem:[%s1480_s16 + $0x178] sm:$0xff]  }
  0x18   : > { %1249 = vmatprep.subr.bf16.mxu1 %v1362_v9  ;;  %v1378_v25 = vld [vmem:[%s1480_s16 + $0xc8] sm:$0xff]   ;;  %v1382_v29 = vld [vmem:[%s1480_s16 + $0xc0] sm:$0xff]   ;;  %v1386_v41 = vld [vmem:[%s1480_s16 + $0x1f8] sm:$0xff]  }
  0x19   : > { %v1379_v26 = vld [vmem:[%s1480_s16 + $0x8] sm:$0xff]   ;;  %v1383_v30 = vld [vmem:[%s1480_s16] sm:$0xff]   ;;  %v1387_v42 = vld [vmem:[%s1480_s16 + $0x138] sm:$0xff]  }
  0x1a   : > { %1222 = vmatpush3.bf16.msra.mxu0 %v1363_v10  ;;  %v1380_v27 = vld [vmem:[%s1480_s16 + $0x88] sm:$0xff]   ;;  %v1384_v31 = vld [vmem:[%s1480_s16 + $0x80] sm:$0xff]   ;;  %v1388_v43 = vld [vmem:[%s1480_s16 + $0x1b8] sm:$0xff]  }
  0x1b   : > { %1250 = vmatpush3.bf16.msra.mxu1 %v1364_v11  ;;  %1223 = vmatprep.subr.bf16.mxu0 %v1365_v12  ;;  %v207_v32 = vld [vmem:[%s1516_s20] sm:$0xff]  ;;  %v208_v34 = vld [vmem:[%s1516_s20 + $0x8] sm:$0xff]  ;;  %v1389_v44 = vld [vmem:[%s1480_s16 + $0x170] sm:$0xff]  }
  0x1c   : > { %1251 = vmatprep.subr.bf16.mxu1 %v1366_v13  ;;  %v211_v33 = vld [vmem:[%s1516_s20 + $0x20] sm:$0xff]  ;;  %v212_v37 = vld [vmem:[%s1516_s20 + $0x28] sm:$0xff]  ;;  %v1390_v45 = vld [vmem:[%s1480_s16 + $0x1f0] sm:$0xff]  }
  0x1d   : > { %v1132_v35 = vcombine.low %v207_v32, %v211_v33  ;;  %v1133_v36 = vcombine.high %v207_v32, %v211_v33  ;;  %v1134_v38 = vcombine.low %v208_v34, %v212_v37  ;;  %v1135_v39 = vcombine.high %v208_v34, %v212_v37  ;;  %v1391_v46 = vld [vmem:[%s1480_s16 + $0x130] sm:$0xff]   ;;  %v1393_v48 = vld [vmem:[%s1480_s16 + $0x168] sm:$0xff]   ;;  %v1397_v52 = vld [vmem:[%s1480_s16 + $0x160] sm:$0xff]  }
  0x1e   : > { %1224 = vmatpush3.bf16.msra.mxu0 %v1367_v14  ;;  %v1392_v47 = vld [vmem:[%s1480_s16 + $0x1b0] sm:$0xff]   ;;  %v1394_v49 = vld [vmem:[%s1480_s16 + $0x1e8] sm:$0xff]   ;;  %v1398_v53 = vld [vmem:[%s1480_s16 + $0x1e0] sm:$0xff]  }
  0x1f   : > { %1252 = vmatpush3.bf16.msra.mxu1 %v1368_v15  ;;  %1225 = vmatprep.subr.bf16.mxu0 %v1369_v16  ;;  %v1395_v50 = vld [vmem:[%s1480_s16 + $0x128] sm:$0xff]   ;;  %v1399_v54 = vld [vmem:[%s1480_s16 + $0x120] sm:$0xff]   ;;  %v1401_v56 = vld [vmem:[%s1480_s16 + $0x158] sm:$0xff]  }
  0x20   : > { %1253 = vmatprep.subr.bf16.mxu1 %v1370_v17  ;;  %847 = vmatprep.mubr.bf16.mxu0 %v1133_v36  ;;  %v1396_v51 = vld [vmem:[%s1480_s16 + $0x1a8] sm:$0xff]   ;;  %v1400_v55 = vld [vmem:[%s1480_s16 + $0x1a0] sm:$0xff]   ;;  %v1402_v57 = vld [vmem:[%s1480_s16 + $0x1d8] sm:$0xff]  }
  0x21   : > { %896 = vmatprep.mubr.bf16.mxu1 %v1135_v39  ;;  %v215_v58 = vld [vmem:[%s1516_s20 + $0x40] sm:$0xff]  ;;  %v216_v61 = vld [vmem:[%s1516_s20 + $0x48] sm:$0xff]  ;;  %v1403_v1 = vld [vmem:[%s1480_s16 + $0x118] sm:$0xff]  }
  0x22   : > { %1226 = vmatpush3.bf16.msra.mxu0 %v1371_v18  ;;  %v219_v59 = vld [vmem:[%s1516_s20 + $0x60] sm:$0xff]  ;;  %v220_v62 = vld [vmem:[%s1516_s20 + $0x68] sm:$0xff]  ;;  %v1404_v3 = vld [vmem:[%s1480_s16 + $0x198] sm:$0xff]  }
  0x23   : > { %1254 = vmatpush3.bf16.msra.mxu1 %v1372_v19  ;;  %1227 = vmatprep.subr.bf16.mxu0 %v1373_v20  ;;  %v1141_v60 = vcombine.high %v215_v58, %v219_v59  ;;  %v1140_v63 = vcombine.low %v215_v58, %v219_v59  ;;  %v1143_v0 = vcombine.high %v216_v61, %v220_v62  ;;  %v1405_v4 = vld [vmem:[%s1480_s16 + $0x150] sm:$0xff]   ;;  %v1409_v8 = vld [vmem:[%s1480_s16 + $0x148] sm:$0xff]   ;;  %v1413_v12 = vld [vmem:[%s1480_s16 + $0x140] sm:$0xff]  }
  0x24   : > { %1255 = vmatprep.subr.bf16.mxu1 %v1374_v21  ;;  %v1142_v2 = vcombine.low %v216_v61, %v220_v62  ;;  %v1406_v5 = vld [vmem:[%s1480_s16 + $0x1d0] sm:$0xff]   ;;  %v1410_v9 = vld [vmem:[%s1480_s16 + $0x1c8] sm:$0xff]   ;;  %v1414_v13 = vld [vmem:[%s1480_s16 + $0x1c0] sm:$0xff]  }
  0x25   : > { %v1407_v6 = vld [vmem:[%s1480_s16 + $0x110] sm:$0xff]   ;;  %v1411_v10 = vld [vmem:[%s1480_s16 + $0x108] sm:$0xff]   ;;  %v1415_v14 = vld [vmem:[%s1480_s16 + $0x100] sm:$0xff]  }
  0x26   : > { %1228 = vmatpush3.bf16.msra.mxu0 %v1375_v22  ;;  %v1408_v7 = vld [vmem:[%s1480_s16 + $0x190] sm:$0xff]   ;;  %v1412_v11 = vld [vmem:[%s1480_s16 + $0x188] sm:$0xff]   ;;  %v1416_v15 = vld [vmem:[%s1480_s16 + $0x180] sm:$0xff]  }
  0x27   : > { %1256 = vmatpush3.bf16.msra.mxu1 %v1376_v23  ;;  %1229 = vmatprep.subr.bf16.mxu0 %v1377_v24  ;;  %v209_v16 = vld [vmem:[%s1516_s20 + $0x10] sm:$0xff]  ;;  %v210_v18 = vld [vmem:[%s1516_s20 + $0x18] sm:$0xff] }
  0x28   : > { %1257 = vmatprep.subr.bf16.mxu1 %v1378_v25  ;;  %v213_v17 = vld [vmem:[%s1516_s20 + $0x30] sm:$0xff]  ;;  %v214_v19 = vld [vmem:[%s1516_s20 + $0x38] sm:$0xff] }
  0x29   : > { %v1136_v20 = vcombine.low %v209_v16, %v213_v17  ;;  %v1137_v21 = vcombine.high %v209_v16, %v213_v17  ;;  %v1138_v22 = vcombine.low %v210_v18, %v214_v19  ;;  %v1139_v23 = vcombine.high %v210_v18, %v214_v19  ;;  %v217_v24 = vld [vmem:[%s1516_s20 + $0x50] sm:$0xff] }
  0x2a   : > { %1230 = vmatpush3.bf16.msra.mxu0 %v1379_v26  ;;  %v221_v25 = vld [vmem:[%s1516_s20 + $0x70] sm:$0xff]  ;;  %v218_v26 = vld [vmem:[%s1516_s20 + $0x58] sm:$0xff] }
  0x2b   : > { %1258 = vmatpush3.bf16.msra.mxu1 %v1380_v27  ;;  %1231 = vmatprep.subr.bf16.mxu0 %v1381_v28  ;;  %v1145_v27 = vcombine.high %v217_v24, %v221_v25  ;;  %v222_v28 = vld [vmem:[%s1516_s20 + $0x78] sm:$0xff] }
  0x2c   : > { %1259 = vmatprep.subr.bf16.mxu1 %v1382_v29  ;;  %v1147_v29 = vcombine.high %v218_v26, %v222_v28 }
  0x2e   : > { %1232 = vmatpush3.bf16.msra.mxu0 %v1383_v30  ;;  %v1144_v30 = vcombine.low %v217_v24, %v221_v25 }
  0x2f   : > { %1260 = vmatpush3.bf16.msra.mxu1 %v1384_v31  ;;  %1273 = vmatprep.subr.bf16.mxu0 %v1385_v40  ;;  %v1146_v31 = vcombine.low %v218_v26, %v222_v28 }
  0x30   : > { %1301 = vmatprep.subr.bf16.mxu1 %v1386_v41 }
  0x31   : > { %848 = vmatmul.mubr.bf16.vlgmr.msra.gmra.mxu0 %v1132_v35 }
  0x32   : > { %897 = vmatmul.mubr.bf16.vlgmr.msra.gmra.mxu1 %v1134_v38  ;;  %1274 = vmatpush3.bf16.msra.mxu0 %v1387_v42 }
  0x33   : > { %1302 = vmatpush3.bf16.msra.mxu1 %v1388_v43  ;;  %1275 = vmatprep.subr.bf16.mxu0 %v1389_v44 }
  0x34   : > { %1303 = vmatprep.subr.bf16.mxu1 %v1390_v45  ;;  %855 = vmatprep.mubr.bf16.mxu0 %v1141_v60 }
  0x35   : > { %904 = vmatprep.mubr.bf16.mxu1 %v1143_v0 }
  0x36   : > { %1276 = vmatpush3.bf16.msra.mxu0 %v1391_v46 }
  0x37   : > { %1304 = vmatpush3.bf16.msra.mxu1 %v1392_v47  ;;  %1277 = vmatprep.subr.bf16.mxu0 %v1393_v48 }
  0x38   : > { %1305 = vmatprep.subr.bf16.mxu1 %v1394_v49 }
  0x39   : > { %856 = vmatmul.mubr.bf16.gmra.mxu0 %v1140_v63 }
  0x3a   : > { %1278 = vmatpush3.bf16.msra.mxu0 %v1395_v50  ;;  %905 = vmatmul.mubr.bf16.gmra.mxu1 %v1142_v2 }
  0x3b   : > { %1306 = vmatpush3.bf16.msra.mxu1 %v1396_v51  ;;  %1279 = vmatprep.subr.bf16.mxu0 %v1397_v52 }
  0x3c   : > { %1307 = vmatprep.subr.bf16.mxu1 %v1398_v53  ;;  %945 = vmatprep.mubr.bf16.mxu0 %v1137_v21 }
  0x3d   : > { %994 = vmatprep.mubr.bf16.mxu1 %v1139_v23 }
  0x3e   : > { %1280 = vmatpush3.bf16.msra.mxu0 %v1399_v54 }
  0x3f   : > { %1308 = vmatpush3.bf16.msra.mxu1 %v1400_v55  ;;  %1281 = vmatprep.subr.bf16.mxu0 %v1401_v56 }
  0x40   : > { %1309 = vmatprep.subr.bf16.mxu1 %v1402_v57 }
  0x42   : > { %1282 = vmatpush3.bf16.msra.mxu0 %v1403_v1 }
  0x43   : > { %1310 = vmatpush3.bf16.msra.mxu1 %v1404_v3  ;;  %1283 = vmatprep.subr.bf16.mxu0 %v1405_v4 }
  0x44   : > { %1311 = vmatprep.subr.bf16.mxu1 %v1406_v5 }
  0x46   : > { %1284 = vmatpush3.bf16.msra.mxu0 %v1407_v6 }
  0x47   : > { %1312 = vmatpush3.bf16.msra.mxu1 %v1408_v7  ;;  %1285 = vmatprep.subr.bf16.mxu0 %v1409_v8 }
  0x48   : > { %1313 = vmatprep.subr.bf16.mxu1 %v1410_v9 }
  0x4a   : > { %1286 = vmatpush3.bf16.msra.mxu0 %v1411_v10 }
  0x4b   : > { %1314 = vmatpush3.bf16.msra.mxu1 %v1412_v11  ;;  %1287 = vmatprep.subr.bf16.mxu0 %v1413_v12 }
  0x4c   : > { %1315 = vmatprep.subr.bf16.mxu1 %v1414_v13 }
  0x4e   : > { %1288 = vmatpush3.bf16.msra.mxu0 %v1415_v14 }
  0x4f   : > { %1316 = vmatpush3.bf16.msra.mxu1 %v1416_v15 }
  0x51   : > { %946 = vmatmul.mubr.bf16.vlgmr.msra.gmra.mxu0 %v1136_v20 }
  0x52   : > { %995 = vmatmul.mubr.bf16.vlgmr.msra.gmra.mxu1 %v1138_v22  ;;  %953 = vmatprep.mubr.bf16.mxu0 %v1145_v27 }
  0x53   : > { %1002 = vmatprep.mubr.bf16.mxu1 %v1147_v29 }
  0x59   : > { %954 = vmatmul.mubr.bf16.gmra.mxu0 %v1144_v30 }
  0x5a   : > { %1003 = vmatmul.mubr.bf16.gmra.mxu1 %v1146_v31 }
  0xf1   : > { %v1233_v32 = vpop.f32.mrf.mxu0 }
  0xf2   : > { %v1261_v33 = vpop.f32.mrf.mxu1 }
  0xf3   : > { %v1234_v34 = vpop.f32.mrf.mxu0 }
  0xf4   : > { %v1262_v35 = vpop.f32.mrf.mxu1  ;;  %v1235_v48 = vadd.f32 %v1234_v34, %v1233_v32 }
  0xf5   : > { %v1236_v36 = vpop.f32.mrf.mxu0  ;;  %v1263_v49 = vadd.f32 %v1262_v35, %v1261_v33 }
  0xf6   : > { %v1264_v37 = vpop.f32.mrf.mxu1 }
  0xf7   : > { %v1237_v38 = vpop.f32.mrf.mxu0  ;;  %v899_v54 = vadd.f32 %v1263_v49, %v1235_v48 }
  0xf8   : > { %v1265_v39 = vpop.f32.mrf.mxu1  ;;  %v1238_v55 = vadd.f32 %v1237_v38, %v1236_v36 }
  0xf9   : > { %v1239_v40 = vpop.f32.mrf.mxu0  ;;  %v1266_v56 = vadd.f32 %v1265_v39, %v1264_v37 }
  0xfa   : > { %v1267_v41 = vpop.f32.mrf.mxu1 }
  0xfb   : > { %v1240_v42 = vpop.f32.mrf.mxu0  ;;  %v902_v2 = vadd.f32 %v1266_v56, %v1238_v55 }
  0xfc   : > { %v1268_v43 = vpop.f32.mrf.mxu1  ;;  %v1241_v62 = vadd.f32 %v1240_v42, %v1239_v40 }
  0xfd   : > { %v1242_v44 = vpop.f32.mrf.mxu0  ;;  %v1269_v63 = vadd.f32 %v1268_v43, %v1267_v41 }
  0xfe   : > { %v1270_v45 = vpop.f32.mrf.mxu1 }
  0xff   : > { %v1243_v46 = vpop.f32.mrf.mxu0  ;;  %v907_v10 = vadd.f32 %v1269_v63, %v1241_v62 }
 0x100   : > { %v1271_v47 = vpop.f32.mrf.mxu1  ;;  %v1244_v13 = vadd.f32 %v1243_v46, %v1242_v44 }
 0x101   : > { %v1272_v14 = vadd.f32 %v1271_v47, %v1270_v45 }
 0x103   : > { %v910_v24 = vadd.f32 %v1272_v14, %v1244_v13 }
 0x111   : > { %v1289_v50 = vpop.f32.mrf.mxu0 }
 0x112   : > { %v1317_v51 = vpop.f32.mrf.mxu1 }
 0x113   : > { %v1290_v52 = vpop.f32.mrf.mxu0 }
 0x114   : > { %v1318_v53 = vpop.f32.mrf.mxu1  ;;  %v1291_v57 = vadd.f32 %v1290_v52, %v1289_v50 }
 0x115   : > { %v1292_v58 = vpop.f32.mrf.mxu0  ;;  %v1319_v61 = vadd.f32 %v1318_v53, %v1317_v51 }
 0x116   : > { %v1320_v59 = vpop.f32.mrf.mxu1  ;;  %v948_v60 = vadd.f32 %v1291_v57, %v899_v54 }
 0x117   : > { %v1293_v0 = vpop.f32.mrf.mxu0 }
 0x118   : > { %v1321_v1 = vpop.f32.mrf.mxu1  ;;  %v997_v3 = vadd.f32 %v1319_v61, %v948_v60  ;;  %v1294_v4 = vadd.f32 %v1293_v0, %v1292_v58 }
 0x119   : > { %v1295_v5 = vpop.f32.mrf.mxu0  ;;  %v1322_v9 = vadd.f32 %v1321_v1, %v1320_v59 }
 0x11a   : > { %v1323_v6 = vpop.f32.mrf.mxu1  ;;  %v1011_v7 = vmax.f32 %v997_v3, 0.0  ;;  %v951_v8 = vadd.f32 %v1294_v4, %v902_v2 }
 0x11b   : > { %v1296_v11 = vpop.f32.mrf.mxu0 }
 0x11c   : > { %v1324_v12 = vpop.f32.mrf.mxu1  ;;  %1015 = vst [vmem:[%s1572_s24] sm:$0xff] %v1011_v7  ;;  %v1000_v15 = vadd.f32 %v1322_v9, %v951_v8  ;;  %v1297_v16 = vadd.f32 %v1296_v11, %v1295_v5 }
 0x11d   : > { %v1298_v17 = vpop.f32.mrf.mxu0  ;;  %v1325_v21 = vadd.f32 %v1324_v12, %v1323_v6 }
 0x11e   : > { %v1326_v18 = vpop.f32.mrf.mxu1  ;;  %v1012_v19 = vmax.f32 %v1000_v15, 0.0  ;;  %v956_v20 = vadd.f32 %v1297_v16, %v907_v10 }
 0x11f   : > { %v1299_v22 = vpop.f32.mrf.mxu0 }
 0x120   : > { %v1327_v23 = vpop.f32.mrf.mxu1  ;;  %1016 = vst [vmem:[%s1572_s24 + $0x8] sm:$0xff] %v1012_v19  ;;  %v1005_v25 = vadd.f32 %v1325_v21, %v956_v20  ;;  %v1300_v26 = vadd.f32 %v1299_v22, %v1298_v17 }
 0x121   : > { %v1328_v29 = vadd.f32 %v1327_v23, %v1326_v18 }
 0x122   : > { %v1013_v27 = vmax.f32 %v1005_v25, 0.0  ;;  %v959_v28 = vadd.f32 %v1300_v26, %v910_v24 }
 0x124   : > { %1017 = vst [vmem:[%s1572_s24 + $0x10] sm:$0xff] %v1013_v27  ;;  %v1008_v30 = vadd.f32 %v1328_v29, %v959_v28 }
 0x126   : > { %v1014_v31 = vmax.f32 %v1008_v30, 0.0 }
 0x128   : > { %1018 = vst [vmem:[%s1572_s24 + $0x18] sm:$0xff] %v1014_v31 }
 0x129 PF: > { %s12_s11 = sadd.s32 1, %s1439_s11   ;;  %s1590_s9 = smov %s1435_s10 }
 0x12a   : > { %p9_p5 = scmp.ge.s32.totalorder %s12_s11, 6   ;;  %s1591_s10 = smov %s1593_s12 }
 0x12c   :  { %11 = sbr.rel (!%p9_p5) target bundleno = 2 (0x2), region = 61 }

// kernel: g_svhn_forward.12
= control target key start
LH: loop header
LB: loop body
LE: loop exit
PB: predicated region body
PF: predicated region fallthrough
CT: control target
= control target key end

     0   :  { %s1334_s9 = smov 0   ;;  %s1336_s10 = smov 0   ;;  %s1464_s0 = inlined_call_operand.vmem [shape: bf16[4,128,512], index: 0, kind: input, shape index: {}]   ;;  %s1465_s1 = inlined_call_operand.vmem [shape: bf16[4,512,128], index: 1, kind: input, shape index: {}]   ;;  %s1466_s2 = inlined_call_operand.vmem [shape: f32[4,128,128], index: 2, kind: output, shape index: {}]  }
   0x1   :  { %s1338_s11 = smov 0  }
   0x2 LB: > { %s24_s12 = sadd.s32 1, %s1313_s10  ;;  %p987_p0 = scmp.ge.s32.totalorder %s1317_s11, 1  ;;  %s1317_s11 = sphi %s1338_s11, %s12_s11   ;;  %s1313_s10 = sphi %s1336_s10, %s1468_s10   ;;  %s1309_s9 = sphi %s1334_s9, %s1467_s9  }
   0x3   : > { %p26_p1 = scmp.ge.s32.totalorder %s24_s12, 4  ;;  %p144_p2 = scmp.lt.s32.totalorder %s1317_s11, 5 }
   0x5   : > { %s1470_s12 = smov (%p26_p1, %s24_s12), 0  ;;  %p145_p3 = pnand %p987_p0, %p144_p2 }
   0x6   : > { %p181_p4 = scmp.lt.s32.totalorder (!%p145_p3), %s1309_s9, 3 }
   0x7   : > { %148 = sbr.rel (%p145_p3) target bundleno = 312 (0x138), region = 28 }
   0xc   : > { %s1472_s9 = smov (!%p181_p4, %s1309_s9), 3 }
   0xd   : > { %s1060_s13 = sshll.u32 %s1472_s9, 8  ;;  %s1062_s20 = sshll.u32 %s1472_s9, 7 }
   0xe   : > { %s1360_s16 = scalar_lea.vmem %s1465_s1, %s1060_s13  ;;  %s1397_s19 = scalar_lea.vmem %s1464_s0, %s1060_s13 }
   0xf   : > { %v1215_v0 = vld [vmem:[%s1360_s16 + $0x78] sm:$0xff]   ;;  %v1219_v4 = vld [vmem:[%s1360_s16 + $0x70] sm:$0xff]   ;;  %v1223_v8 = vld [vmem:[%s1360_s16 + $0x68] sm:$0xff]   ;;  %s1437_s23 = scalar_lea.vmem %s1466_s2, %s1062_s20 }
  0x10   : > { %v1216_v1 = vld [vmem:[%s1360_s16 + $0xf8] sm:$0xff]   ;;  %1063 = vmatprep.subr.bf16.mxu0 %v1215_v0  ;;  %v1220_v5 = vld [vmem:[%s1360_s16 + $0xf0] sm:$0xff]   ;;  %v1224_v9 = vld [vmem:[%s1360_s16 + $0xe8] sm:$0xff]  }
  0x11   : > { %v1217_v2 = vld [vmem:[%s1360_s16 + $0x38] sm:$0xff]   ;;  %1127 = vmatprep.subr.bf16.mxu1 %v1216_v1  ;;  %v1221_v6 = vld [vmem:[%s1360_s16 + $0x30] sm:$0xff]   ;;  %v1225_v10 = vld [vmem:[%s1360_s16 + $0x28] sm:$0xff]  }
  0x12   : > { %v1218_v3 = vld [vmem:[%s1360_s16 + $0xb8] sm:$0xff]   ;;  %1064 = vmatpush3.bf16.msra.mxu0 %v1217_v2  ;;  %v1222_v7 = vld [vmem:[%s1360_s16 + $0xb0] sm:$0xff]   ;;  %v1226_v11 = vld [vmem:[%s1360_s16 + $0xa8] sm:$0xff]  }
  0x13   : > { %1128 = vmatpush3.bf16.msra.mxu1 %v1218_v3  ;;  %1065 = vmatprep.subr.bf16.mxu0 %v1219_v4  ;;  %v1227_v12 = vld [vmem:[%s1360_s16 + $0x60] sm:$0xff]   ;;  %v1231_v16 = vld [vmem:[%s1360_s16 + $0x58] sm:$0xff]   ;;  %v1235_v20 = vld [vmem:[%s1360_s16 + $0x50] sm:$0xff]  }
  0x14   : > { %1129 = vmatprep.subr.bf16.mxu1 %v1220_v5  ;;  %v1228_v13 = vld [vmem:[%s1360_s16 + $0xe0] sm:$0xff]   ;;  %v1232_v17 = vld [vmem:[%s1360_s16 + $0xd8] sm:$0xff]   ;;  %v1236_v21 = vld [vmem:[%s1360_s16 + $0xd0] sm:$0xff]  }
  0x15   : > { %v1229_v14 = vld [vmem:[%s1360_s16 + $0x20] sm:$0xff]   ;;  %v1233_v18 = vld [vmem:[%s1360_s16 + $0x18] sm:$0xff]   ;;  %v1237_v22 = vld [vmem:[%s1360_s16 + $0x10] sm:$0xff]  }
  0x16   : > { %1066 = vmatpush3.bf16.msra.mxu0 %v1221_v6  ;;  %v1230_v15 = vld [vmem:[%s1360_s16 + $0xa0] sm:$0xff]   ;;  %v1234_v19 = vld [vmem:[%s1360_s16 + $0x98] sm:$0xff]   ;;  %v1238_v23 = vld [vmem:[%s1360_s16 + $0x90] sm:$0xff]  }
  0x17   : > { %1130 = vmatpush3.bf16.msra.mxu1 %v1222_v7  ;;  %1067 = vmatprep.subr.bf16.mxu0 %v1223_v8  ;;  %v1239_v24 = vld [vmem:[%s1360_s16 + $0x48] sm:$0xff]   ;;  %v1243_v28 = vld [vmem:[%s1360_s16 + $0x40] sm:$0xff]  }
  0x18   : > { %1131 = vmatprep.subr.bf16.mxu1 %v1224_v9  ;;  %v1240_v25 = vld [vmem:[%s1360_s16 + $0xc8] sm:$0xff]   ;;  %v1244_v29 = vld [vmem:[%s1360_s16 + $0xc0] sm:$0xff]  }
  0x19   : > { %v1241_v26 = vld [vmem:[%s1360_s16 + $0x8] sm:$0xff]   ;;  %v1245_v30 = vld [vmem:[%s1360_s16] sm:$0xff]  }
  0x1a   : > { %1068 = vmatpush3.bf16.msra.mxu0 %v1225_v10  ;;  %v1242_v27 = vld [vmem:[%s1360_s16 + $0x88] sm:$0xff]   ;;  %v1246_v31 = vld [vmem:[%s1360_s16 + $0x80] sm:$0xff]  }
  0x1b   : > { %1132 = vmatpush3.bf16.msra.mxu1 %v1226_v11  ;;  %1069 = vmatprep.subr.bf16.mxu0 %v1227_v12  ;;  %v1247_v32 = vld [vmem:[%s1397_s19] ss:$16 sps:$4 sm:$0xff]   ;;  %v1249_v33 = vld [vmem:[%s1397_s19 + $0x4] ss:$16 sps:$4 sm:$0xff]   ;;  %v1250_v34 = vld [vmem:[%s1397_s19 + $0x8] ss:$16 sps:$4 sm:$0xff]  }
  0x1c   : > { %1133 = vmatprep.subr.bf16.mxu1 %v1228_v13  ;;  %v1252_v35 = vld [vmem:[%s1397_s19 + $0xc] ss:$16 sps:$4 sm:$0xff]   ;;  %687 = vmatprep.mubr.bf16.mxu0 %v1249_v33  ;;  %v1253_v36 = vld [vmem:[%s1397_s19 + $0x24] ss:$16 sps:$4 sm:$0xff]   ;;  %v1257_v38 = vld [vmem:[%s1397_s19 + $0x20] ss:$16 sps:$4 sm:$0xff]  }
  0x1d   : > { %784 = vmatprep.mubr.bf16.mxu1 %v1252_v35  ;;  %v1255_v37 = vld [vmem:[%s1397_s19 + $0x2c] ss:$16 sps:$4 sm:$0xff]   ;;  %v1258_v39 = vld [vmem:[%s1397_s19 + $0x28] ss:$16 sps:$4 sm:$0xff]   ;;  %v1259_v40 = vld [vmem:[%s1397_s19 + $0x44] ss:$16 sps:$4 sm:$0xff]  }
  0x1e   : > { %1070 = vmatpush3.bf16.msra.mxu0 %v1229_v14  ;;  %v1261_v41 = vld [vmem:[%s1397_s19 + $0x4c] ss:$16 sps:$4 sm:$0xff]   ;;  %v1263_v42 = vld [vmem:[%s1397_s19 + $0x40] ss:$16 sps:$4 sm:$0xff]   ;;  %v1264_v43 = vld [vmem:[%s1397_s19 + $0x48] ss:$16 sps:$4 sm:$0xff]  }
  0x1f   : > { %1134 = vmatpush3.bf16.msra.mxu1 %v1230_v15  ;;  %1071 = vmatprep.subr.bf16.mxu0 %v1231_v16  ;;  %v1265_v44 = vld [vmem:[%s1397_s19 + $0x64] ss:$16 sps:$4 sm:$0xff]   ;;  %v1267_v45 = vld [vmem:[%s1397_s19 + $0x6c] ss:$16 sps:$4 sm:$0xff]   ;;  %v1269_v46 = vld [vmem:[%s1397_s19 + $0x60] ss:$16 sps:$4 sm:$0xff]  }
  0x20   : > { %1135 = vmatprep.subr.bf16.mxu1 %v1232_v17  ;;  %v1270_v47 = vld [vmem:[%s1397_s19 + $0x68] ss:$16 sps:$4 sm:$0xff]   ;;  %v1271_v48 = vld [vmem:[%s1397_s19 + $0x84] ss:$16 sps:$4 sm:$0xff]   ;;  %v1273_v49 = vld [vmem:[%s1397_s19 + $0x8c] ss:$16 sps:$4 sm:$0xff]  }
  0x21   : > { %v1275_v50 = vld [vmem:[%s1397_s19 + $0x80] ss:$16 sps:$4 sm:$0xff]   ;;  %v1276_v51 = vld [vmem:[%s1397_s19 + $0x88] ss:$16 sps:$4 sm:$0xff]   ;;  %v1277_v52 = vld [vmem:[%s1397_s19 + $0xa4] ss:$16 sps:$4 sm:$0xff]  }
  0x22   : > { %1072 = vmatpush3.bf16.msra.mxu0 %v1233_v18  ;;  %v1279_v53 = vld [vmem:[%s1397_s19 + $0xac] ss:$16 sps:$4 sm:$0xff]   ;;  %v1281_v54 = vld [vmem:[%s1397_s19 + $0xa0] ss:$16 sps:$4 sm:$0xff]   ;;  %v1282_v55 = vld [vmem:[%s1397_s19 + $0xa8] ss:$16 sps:$4 sm:$0xff]  }
  0x23   : > { %1136 = vmatpush3.bf16.msra.mxu1 %v1234_v19  ;;  %1073 = vmatprep.subr.bf16.mxu0 %v1235_v20  ;;  %v1283_v56 = vld [vmem:[%s1397_s19 + $0xc4] ss:$16 sps:$4 sm:$0xff]   ;;  %v1285_v57 = vld [vmem:[%s1397_s19 + $0xcc] ss:$16 sps:$4 sm:$0xff]   ;;  %v1287_v58 = vld [vmem:[%s1397_s19 + $0xc0] ss:$16 sps:$4 sm:$0xff]  }
  0x24   : > { %1137 = vmatprep.subr.bf16.mxu1 %v1236_v21  ;;  %v1288_v59 = vld [vmem:[%s1397_s19 + $0xc8] ss:$16 sps:$4 sm:$0xff]   ;;  %v1289_v60 = vld [vmem:[%s1397_s19 + $0xe4] ss:$16 sps:$4 sm:$0xff]   ;;  %v1291_v61 = vld [vmem:[%s1397_s19 + $0xec] ss:$16 sps:$4 sm:$0xff]  }
  0x25   : > { %v1293_v62 = vld [vmem:[%s1397_s19 + $0xe0] ss:$16 sps:$4 sm:$0xff]   ;;  %v1294_v63 = vld [vmem:[%s1397_s19 + $0xe8] ss:$16 sps:$4 sm:$0xff]  }
  0x26   : > { %1074 = vmatpush3.bf16.msra.mxu0 %v1237_v22 }
  0x27   : > { %1138 = vmatpush3.bf16.msra.mxu1 %v1238_v23  ;;  %1075 = vmatprep.subr.bf16.mxu0 %v1239_v24 }
  0x28   : > { %1139 = vmatprep.subr.bf16.mxu1 %v1240_v25 }
  0x2a   : > { %1076 = vmatpush3.bf16.msra.mxu0 %v1241_v26 }
  0x2b   : > { %1140 = vmatpush3.bf16.msra.mxu1 %v1242_v27  ;;  %1077 = vmatprep.subr.bf16.mxu0 %v1243_v28 }
  0x2c   : > { %1141 = vmatprep.subr.bf16.mxu1 %v1244_v29 }
  0x2e   : > { %1078 = vmatpush3.bf16.msra.mxu0 %v1245_v30 }
  0x2f   : > { %1142 = vmatpush3.bf16.msra.mxu1 %v1246_v31 }
  0x31   : > { %688 = vmatmul.mubr.bf16.vlgmr.msra.gmra.mxu0 %v1247_v32 }
  0x32   : > { %785 = vmatmul.mubr.bf16.vlgmr.msra.gmra.mxu1 %v1250_v34  ;;  %695 = vmatprep.mubr.bf16.mxu0 %v1253_v36 }
  0x33   : > { %792 = vmatprep.mubr.bf16.mxu1 %v1255_v37 }
  0x39   : > { %696 = vmatmul.mubr.bf16.gmra.mxu0 %v1257_v38 }
  0x3a   : > { %793 = vmatmul.mubr.bf16.gmra.mxu1 %v1258_v39  ;;  %703 = vmatprep.mubr.bf16.mxu0 %v1259_v40 }
  0x3b   : > { %800 = vmatprep.mubr.bf16.mxu1 %v1261_v41 }
  0x41   : > { %704 = vmatmul.mubr.bf16.gmra.mxu0 %v1263_v42 }
  0x42   : > { %801 = vmatmul.mubr.bf16.gmra.mxu1 %v1264_v43  ;;  %711 = vmatprep.mubr.bf16.mxu0 %v1265_v44 }
  0x43   : > { %808 = vmatprep.mubr.bf16.mxu1 %v1267_v45 }
  0x49   : > { %712 = vmatmul.mubr.bf16.gmra.mxu0 %v1269_v46 }
  0x4a   : > { %809 = vmatmul.mubr.bf16.gmra.mxu1 %v1270_v47  ;;  %719 = vmatprep.mubr.bf16.mxu0 %v1271_v48 }
  0x4b   : > { %816 = vmatprep.mubr.bf16.mxu1 %v1273_v49 }
  0x51   : > { %720 = vmatmul.mubr.bf16.gmra.mxu0 %v1275_v50 }
  0x52   : > { %817 = vmatmul.mubr.bf16.gmra.mxu1 %v1276_v51  ;;  %727 = vmatprep.mubr.bf16.mxu0 %v1277_v52 }
  0x53   : > { %824 = vmatprep.mubr.bf16.mxu1 %v1279_v53 }
  0x59   : > { %728 = vmatmul.mubr.bf16.gmra.mxu0 %v1281_v54 }
  0x5a   : > { %825 = vmatmul.mubr.bf16.gmra.mxu1 %v1282_v55  ;;  %735 = vmatprep.mubr.bf16.mxu0 %v1283_v56 }
  0x5b   : > { %832 = vmatprep.mubr.bf16.mxu1 %v1285_v57 }
  0x61   : > { %736 = vmatmul.mubr.bf16.gmra.mxu0 %v1287_v58 }
  0x62   : > { %833 = vmatmul.mubr.bf16.gmra.mxu1 %v1288_v59  ;;  %743 = vmatprep.mubr.bf16.mxu0 %v1289_v60 }
  0x63   : > { %840 = vmatprep.mubr.bf16.mxu1 %v1291_v61 }
  0x69   : > { %744 = vmatmul.mubr.bf16.gmra.mxu0 %v1293_v62 }
  0x6a   : > { %841 = vmatmul.mubr.bf16.gmra.mxu1 %v1294_v63 }
  0xf1   : > { %v1079_v0 = vpop.f32.mrf.mxu0 }
  0xf2   : > { %v1143_v1 = vpop.f32.mrf.mxu1 }
  0xf3   : > { %v1080_v2 = vpop.f32.mrf.mxu0 }
  0xf4   : > { %v1081_v3 = vadd.f32 %v1080_v2, %v1079_v0  ;;  %v1144_v4 = vpop.f32.mrf.mxu1 }
  0xf5   : > { %v1145_v5 = vadd.f32 %v1144_v4, %v1143_v1  ;;  %v1082_v6 = vpop.f32.mrf.mxu0 }
  0xf6   : > { %v1146_v7 = vpop.f32.mrf.mxu1 }
  0xf7   : > { %v787_v8 = vadd.f32 %v1145_v5, %v1081_v3  ;;  %v1083_v9 = vpop.f32.mrf.mxu0 }
  0xf8   : > { %v1084_v10 = vadd.f32 %v1083_v9, %v1082_v6  ;;  %v1147_v11 = vpop.f32.mrf.mxu1 }
  0xf9   : > { %v849_v12 = vmax.f32 %v787_v8, 0.0  ;;  %v1148_v13 = vadd.f32 %v1147_v11, %v1146_v7  ;;  %v1085_v14 = vpop.f32.mrf.mxu0 }
  0xfa   : > { %v1149_v15 = vpop.f32.mrf.mxu1 }
  0xfb   : > { %865 = vst [vmem:[%s1437_s23] sm:$0xff] %v849_v12  ;;  %v790_v16 = vadd.f32 %v1148_v13, %v1084_v10  ;;  %v1086_v17 = vpop.f32.mrf.mxu0 }
  0xfc   : > { %v1087_v18 = vadd.f32 %v1086_v17, %v1085_v14  ;;  %v1150_v19 = vpop.f32.mrf.mxu1 }
  0xfd   : > { %v850_v20 = vmax.f32 %v790_v16, 0.0  ;;  %v1151_v21 = vadd.f32 %v1150_v19, %v1149_v15  ;;  %v1088_v22 = vpop.f32.mrf.mxu0 }
  0xfe   : > { %v1152_v23 = vpop.f32.mrf.mxu1 }
  0xff   : > { %866 = vst [vmem:[%s1437_s23 + $0x8] sm:$0xff] %v850_v20  ;;  %v795_v24 = vadd.f32 %v1151_v21, %v1087_v18  ;;  %v1089_v25 = vpop.f32.mrf.mxu0 }
 0x100   : > { %v1090_v26 = vadd.f32 %v1089_v25, %v1088_v22  ;;  %v1153_v27 = vpop.f32.mrf.mxu1 }
 0x101   : > { %v851_v28 = vmax.f32 %v795_v24, 0.0  ;;  %v1154_v29 = vadd.f32 %v1153_v27, %v1152_v23  ;;  %v1091_v30 = vpop.f32.mrf.mxu0 }
 0x102   : > { %v1155_v31 = vpop.f32.mrf.mxu1 }
 0x103   : > { %867 = vst [vmem:[%s1437_s23 + $0x10] sm:$0xff] %v851_v28  ;;  %v798_v32 = vadd.f32 %v1154_v29, %v1090_v26  ;;  %v1092_v33 = vpop.f32.mrf.mxu0 }
 0x104   : > { %v1093_v34 = vadd.f32 %v1092_v33, %v1091_v30  ;;  %v1156_v35 = vpop.f32.mrf.mxu1 }
 0x105   : > { %v852_v36 = vmax.f32 %v798_v32, 0.0  ;;  %v1157_v37 = vadd.f32 %v1156_v35, %v1155_v31  ;;  %v1094_v38 = vpop.f32.mrf.mxu0 }
 0x106   : > { %v1158_v39 = vpop.f32.mrf.mxu1 }
 0x107   : > { %868 = vst [vmem:[%s1437_s23 + $0x18] sm:$0xff] %v852_v36  ;;  %v803_v40 = vadd.f32 %v1157_v37, %v1093_v34  ;;  %v1095_v41 = vpop.f32.mrf.mxu0 }
 0x108   : > { %v1096_v42 = vadd.f32 %v1095_v41, %v1094_v38  ;;  %v1159_v43 = vpop.f32.mrf.mxu1 }
 0x109   : > { %v853_v44 = vmax.f32 %v803_v40, 0.0  ;;  %v1160_v45 = vadd.f32 %v1159_v43, %v1158_v39  ;;  %v1097_v46 = vpop.f32.mrf.mxu0 }
 0x10a   : > { %v1161_v47 = vpop.f32.mrf.mxu1 }
 0x10b   : > { %869 = vst [vmem:[%s1437_s23 + $0x20] sm:$0xff] %v853_v44  ;;  %v806_v48 = vadd.f32 %v1160_v45, %v1096_v42  ;;  %v1098_v49 = vpop.f32.mrf.mxu0 }
 0x10c   : > { %v1099_v50 = vadd.f32 %v1098_v49, %v1097_v46  ;;  %v1162_v51 = vpop.f32.mrf.mxu1 }
 0x10d   : > { %v854_v52 = vmax.f32 %v806_v48, 0.0  ;;  %v1163_v53 = vadd.f32 %v1162_v51, %v1161_v47  ;;  %v1100_v54 = vpop.f32.mrf.mxu0 }
 0x10e   : > { %v1164_v55 = vpop.f32.mrf.mxu1 }
 0x10f   : > { %870 = vst [vmem:[%s1437_s23 + $0x28] sm:$0xff] %v854_v52  ;;  %v811_v56 = vadd.f32 %v1163_v53, %v1099_v50  ;;  %v1101_v57 = vpop.f32.mrf.mxu0 }
 0x110   : > { %v1102_v58 = vadd.f32 %v1101_v57, %v1100_v54  ;;  %v1165_v59 = vpop.f32.mrf.mxu1 }
 0x111   : > { %v855_v60 = vmax.f32 %v811_v56, 0.0  ;;  %v1166_v61 = vadd.f32 %v1165_v59, %v1164_v55  ;;  %v1103_v62 = vpop.f32.mrf.mxu0 }
 0x112   : > { %v1167_v63 = vpop.f32.mrf.mxu1 }
 0x113   : > { %871 = vst [vmem:[%s1437_s23 + $0x30] sm:$0xff] %v855_v60  ;;  %v814_v0 = vadd.f32 %v1166_v61, %v1102_v58  ;;  %v1104_v1 = vpop.f32.mrf.mxu0 }
 0x114   : > { %v1105_v2 = vadd.f32 %v1104_v1, %v1103_v62  ;;  %v1168_v3 = vpop.f32.mrf.mxu1 }
 0x115   : > { %v856_v4 = vmax.f32 %v814_v0, 0.0  ;;  %v1169_v5 = vadd.f32 %v1168_v3, %v1167_v63  ;;  %v1106_v6 = vpop.f32.mrf.mxu0 }
 0x116   : > { %v1170_v7 = vpop.f32.mrf.mxu1 }
 0x117   : > { %872 = vst [vmem:[%s1437_s23 + $0x38] sm:$0xff] %v856_v4  ;;  %v819_v8 = vadd.f32 %v1169_v5, %v1105_v2  ;;  %v1107_v9 = vpop.f32.mrf.mxu0 }
 0x118   : > { %v1108_v10 = vadd.f32 %v1107_v9, %v1106_v6  ;;  %v1171_v11 = vpop.f32.mrf.mxu1 }
 0x119   : > { %v857_v12 = vmax.f32 %v819_v8, 0.0  ;;  %v1172_v13 = vadd.f32 %v1171_v11, %v1170_v7  ;;  %v1109_v14 = vpop.f32.mrf.mxu0 }
 0x11a   : > { %v1173_v15 = vpop.f32.mrf.mxu1 }
 0x11b   : > { %873 = vst [vmem:[%s1437_s23 + $0x40] sm:$0xff] %v857_v12  ;;  %v822_v16 = vadd.f32 %v1172_v13, %v1108_v10  ;;  %v1110_v17 = vpop.f32.mrf.mxu0 }
 0x11c   : > { %v1111_v18 = vadd.f32 %v1110_v17, %v1109_v14  ;;  %v1174_v19 = vpop.f32.mrf.mxu1 }
 0x11d   : > { %v858_v20 = vmax.f32 %v822_v16, 0.0  ;;  %v1175_v21 = vadd.f32 %v1174_v19, %v1173_v15  ;;  %v1112_v22 = vpop.f32.mrf.mxu0 }
 0x11e   : > { %v1176_v23 = vpop.f32.mrf.mxu1 }
 0x11f   : > { %874 = vst [vmem:[%s1437_s23 + $0x48] sm:$0xff] %v858_v20  ;;  %v827_v24 = vadd.f32 %v1175_v21, %v1111_v18  ;;  %v1113_v25 = vpop.f32.mrf.mxu0 }
 0x120   : > { %v1114_v26 = vadd.f32 %v1113_v25, %v1112_v22  ;;  %v1177_v27 = vpop.f32.mrf.mxu1 }
 0x121   : > { %v859_v28 = vmax.f32 %v827_v24, 0.0  ;;  %v1178_v29 = vadd.f32 %v1177_v27, %v1176_v23  ;;  %v1115_v30 = vpop.f32.mrf.mxu0 }
 0x122   : > { %v1179_v31 = vpop.f32.mrf.mxu1 }
 0x123   : > { %875 = vst [vmem:[%s1437_s23 + $0x50] sm:$0xff] %v859_v28  ;;  %v830_v32 = vadd.f32 %v1178_v29, %v1114_v26  ;;  %v1116_v33 = vpop.f32.mrf.mxu0 }
 0x124   : > { %v1117_v34 = vadd.f32 %v1116_v33, %v1115_v30  ;;  %v1180_v35 = vpop.f32.mrf.mxu1 }
 0x125   : > { %v860_v36 = vmax.f32 %v830_v32, 0.0  ;;  %v1181_v37 = vadd.f32 %v1180_v35, %v1179_v31  ;;  %v1118_v38 = vpop.f32.mrf.mxu0 }
 0x126   : > { %v1182_v39 = vpop.f32.mrf.mxu1 }
 0x127   : > { %876 = vst [vmem:[%s1437_s23 + $0x58] sm:$0xff] %v860_v36  ;;  %v835_v40 = vadd.f32 %v1181_v37, %v1117_v34  ;;  %v1119_v41 = vpop.f32.mrf.mxu0 }
 0x128   : > { %v1120_v42 = vadd.f32 %v1119_v41, %v1118_v38  ;;  %v1183_v43 = vpop.f32.mrf.mxu1 }
 0x129   : > { %v861_v44 = vmax.f32 %v835_v40, 0.0  ;;  %v1184_v45 = vadd.f32 %v1183_v43, %v1182_v39  ;;  %v1121_v46 = vpop.f32.mrf.mxu0 }
 0x12a   : > { %v1185_v47 = vpop.f32.mrf.mxu1 }
 0x12b   : > { %877 = vst [vmem:[%s1437_s23 + $0x60] sm:$0xff] %v861_v44  ;;  %v838_v48 = vadd.f32 %v1184_v45, %v1120_v42  ;;  %v1122_v49 = vpop.f32.mrf.mxu0 }
 0x12c   : > { %v1123_v50 = vadd.f32 %v1122_v49, %v1121_v46  ;;  %v1186_v51 = vpop.f32.mrf.mxu1 }
 0x12d   : > { %v862_v52 = vmax.f32 %v838_v48, 0.0  ;;  %v1187_v53 = vadd.f32 %v1186_v51, %v1185_v47  ;;  %v1124_v54 = vpop.f32.mrf.mxu0 }
 0x12e   : > { %v1188_v55 = vpop.f32.mrf.mxu1 }
 0x12f   : > { %878 = vst [vmem:[%s1437_s23 + $0x68] sm:$0xff] %v862_v52  ;;  %v843_v56 = vadd.f32 %v1187_v53, %v1123_v50  ;;  %v1125_v57 = vpop.f32.mrf.mxu0 }
 0x130   : > { %v1126_v58 = vadd.f32 %v1125_v57, %v1124_v54  ;;  %v1189_v59 = vpop.f32.mrf.mxu1 }
 0x131   : > { %v863_v60 = vmax.f32 %v843_v56, 0.0  ;;  %v1190_v61 = vadd.f32 %v1189_v59, %v1188_v55 }
 0x133   : > { %879 = vst [vmem:[%s1437_s23 + $0x70] sm:$0xff] %v863_v60  ;;  %v846_v62 = vadd.f32 %v1190_v61, %v1126_v58 }
 0x135   : > { %v864_v63 = vmax.f32 %v846_v62, 0.0 }
 0x137   : > { %880 = vst [vmem:[%s1437_s23 + $0x78] sm:$0xff] %v864_v63 }
 0x138 PF: > { %s12_s11 = sadd.s32 1, %s1317_s11   ;;  %s1467_s9 = smov %s1313_s10 }
 0x139   : > { %p9_p5 = scmp.ge.s32.totalorder %s12_s11, 6   ;;  %s1468_s10 = smov %s1470_s12 }
 0x13b   :  { %11 = sbr.rel (!%p9_p5) target bundleno = 2 (0x2), region = 61 }

// kernel: g_svhn_forward.13
= control target key start
LH: loop header
LB: loop body
LE: loop exit
PB: predicated region body
PF: predicated region fallthrough
CT: control target
= control target key end

     0   :  { %s1671_s9 = smov 0   ;;  %s1673_s10 = smov 0   ;;  %s1897_s0 = inlined_call_operand.vmem [shape: bf16[4,512,256], index: 0, kind: input, shape index: {}]   ;;  %s1898_s1 = inlined_call_operand.vmem [shape: bf16[4,256,128], index: 1, kind: input, shape index: {}]   ;;  %s1899_s2 = inlined_call_operand.vmem [shape: f32[4,512,128], index: 2, kind: output, shape index: {}]  }
   0x1   :  { %s1675_s11 = smov 0  }
   0x2 LB: > { %s24_s12 = sadd.s32 1, %s1649_s10  ;;  %p1242_p0 = scmp.ge.s32.totalorder %s1653_s11, 1  ;;  %s1653_s11 = sphi %s1675_s11, %s12_s11   ;;  %s1649_s10 = sphi %s1673_s10, %s1901_s10   ;;  %s1645_s9 = sphi %s1671_s9, %s1900_s9  }
   0x3   : > { %p26_p1 = scmp.ge.s32.totalorder %s24_s12, 4  ;;  %p144_p2 = scmp.lt.s32.totalorder %s1653_s11, 5 }
   0x5   : > { %s1903_s12 = smov (%p26_p1, %s24_s12), 0  ;;  %p145_p3 = pnand %p1242_p0, %p144_p2 }
   0x6   : > { %p181_p4 = scmp.lt.s32.totalorder (!%p145_p3), %s1645_s9, 3 }
   0x7   : > { %148 = sbr.rel (%p145_p3) target bundleno = 412 (0x19c), region = 28 }
   0xc   : > { %v1655_v0 = vmov 0   ;;  %s1905_s9 = smov (!%p181_p4, %s1645_s9), 3 }
   0xd   : > { %719 = vmatprep.subr.bf16.mxu0 %v1655_v0  ;;  %1334 = vmatprep.subr.bf16.mxu1 %v1655_v0  ;;  %s1332_s13 = sshll.u32 %s1905_s9, 7  ;;  %s1331_s17 = sshll.u32 %s1905_s9, 9 }
   0xe   : > { %s1697_s16 = scalar_lea.vmem %s1898_s1, %s1332_s13  ;;  %s1716_s20 = scalar_lea.vmem %s1897_s0, %s1331_s17 }
   0xf   : > { %v1391_v1 = vld [vmem:[%s1697_s16 + $0x38] sm:$0xff]   ;;  %v1392_v2 = vld [vmem:[%s1697_s16 + $0x30] sm:$0xff]   ;;  %v1393_v3 = vld [vmem:[%s1697_s16 + $0x28] sm:$0xff]   ;;  %s1822_s23 = scalar_lea.vmem %s1899_s2, %s1331_s17 }
  0x10   : > { %720 = vmatpush1.bf16.msra.mxu0 %v1391_v1  ;;  %1350 = vmatpush1.bf16.msra.mxu1 %v1391_v1  ;;  %v1394_v4 = vld [vmem:[%s1697_s16 + $0x20] sm:$0xff]   ;;  %v1395_v5 = vld [vmem:[%s1697_s16 + $0x18] sm:$0xff]   ;;  %v1396_v7 = vld [vmem:[%s1697_s16 + $0x10] sm:$0xff]  }
  0x11   : > { %721 = vmatprep.subr.bf16.mxu0 %v1655_v0  ;;  %1335 = vmatprep.subr.bf16.mxu1 %v1655_v0  ;;  %v1409_v6 = vld [vmem:[%s1716_s20 + $0x4] ss:$8 sps:$4 sm:$0xff]   ;;  %v1399_v11 = vld [vmem:[%s1697_s16 + $0x78] sm:$0xff]   ;;  %v1400_v12 = vld [vmem:[%s1697_s16 + $0x70] sm:$0xff]  }
  0x12   : > { %v1412_v8 = vld [vmem:[%s1716_s20 + $0x104] ss:$8 sps:$4 sm:$0xff]   ;;  %751 = vmatprep.mubr.bf16.mxu0 %v1409_v6  ;;  %v1403_v15 = vld [vmem:[%s1697_s16 + $0x58] sm:$0xff]   ;;  %v1404_v16 = vld [vmem:[%s1697_s16 + $0x50] sm:$0xff]  }
  0x13   : > { %879 = vmatprep.mubr.bf16.mxu1 %v1412_v8  ;;  %v1397_v9 = vld [vmem:[%s1697_s16 + $0x8] sm:$0xff]   ;;  %v1398_v10 = vld [vmem:[%s1697_s16] sm:$0xff]   ;;  %v1413_v21 = vld [vmem:[%s1716_s20 + $0x14] ss:$8 sps:$4 sm:$0xff]  }
  0x14   : > { %722 = vmatpush1.bf16.msra.mxu0 %v1392_v2  ;;  %1351 = vmatpush1.bf16.msra.mxu1 %v1392_v2  ;;  %v1401_v13 = vld [vmem:[%s1697_s16 + $0x68] sm:$0xff]   ;;  %v1402_v14 = vld [vmem:[%s1697_s16 + $0x60] sm:$0xff]   ;;  %v1415_v22 = vld [vmem:[%s1716_s20 + $0x114] ss:$8 sps:$4 sm:$0xff]  }
  0x15   : > { %723 = vmatprep.subr.bf16.mxu0 %v1655_v0  ;;  %1336 = vmatprep.subr.bf16.mxu1 %v1655_v0  ;;  %v1405_v17 = vld [vmem:[%s1697_s16 + $0x48] sm:$0xff]   ;;  %v1406_v18 = vld [vmem:[%s1697_s16 + $0x40] sm:$0xff]   ;;  %v1417_v23 = vld [vmem:[%s1716_s20 + $0x10] ss:$8 sps:$4 sm:$0xff]  }
  0x16   : > { %v1407_v19 = vld [vmem:[%s1716_s20] ss:$8 sps:$4 sm:$0xff]   ;;  %v1418_v24 = vld [vmem:[%s1716_s20 + $0x110] ss:$8 sps:$4 sm:$0xff]   ;;  %v1419_v25 = vld [vmem:[%s1716_s20 + $0x24] ss:$8 sps:$4 sm:$0xff]  }
  0x17   : > { %v1410_v20 = vld [vmem:[%s1716_s20 + $0x100] ss:$8 sps:$4 sm:$0xff]   ;;  %v1421_v26 = vld [vmem:[%s1716_s20 + $0x124] ss:$8 sps:$4 sm:$0xff]   ;;  %v1425_v29 = vld [vmem:[%s1716_s20 + $0x34] ss:$8 sps:$4 sm:$0xff]  }
  0x18   : > { %724 = vmatpush1.bf16.msra.mxu0 %v1393_v3  ;;  %1352 = vmatpush1.bf16.msra.mxu1 %v1393_v3  ;;  %v1423_v27 = vld [vmem:[%s1716_s20 + $0x20] ss:$8 sps:$4 sm:$0xff]   ;;  %v1427_v30 = vld [vmem:[%s1716_s20 + $0x134] ss:$8 sps:$4 sm:$0xff]   ;;  %v1429_v31 = vld [vmem:[%s1716_s20 + $0x30] ss:$8 sps:$4 sm:$0xff]  }
  0x19   : > { %725 = vmatprep.subr.bf16.mxu0 %v1655_v0  ;;  %1337 = vmatprep.subr.bf16.mxu1 %v1655_v0  ;;  %v1424_v28 = vld [vmem:[%s1716_s20 + $0x120] ss:$8 sps:$4 sm:$0xff]   ;;  %v1430_v32 = vld [vmem:[%s1716_s20 + $0x130] ss:$8 sps:$4 sm:$0xff]   ;;  %v1431_v33 = vld [vmem:[%s1716_s20 + $0x44] ss:$8 sps:$4 sm:$0xff]  }
  0x1a   : > { %v1433_v34 = vld [vmem:[%s1716_s20 + $0x144] ss:$8 sps:$4 sm:$0xff]   ;;  %v1435_v35 = vld [vmem:[%s1716_s20 + $0x40] ss:$8 sps:$4 sm:$0xff]   ;;  %v1437_v37 = vld [vmem:[%s1716_s20 + $0x54] ss:$8 sps:$4 sm:$0xff]  }
  0x1b   : > { %v1436_v36 = vld [vmem:[%s1716_s20 + $0x140] ss:$8 sps:$4 sm:$0xff]   ;;  %v1439_v38 = vld [vmem:[%s1716_s20 + $0x154] ss:$8 sps:$4 sm:$0xff]   ;;  %v1441_v39 = vld [vmem:[%s1716_s20 + $0x50] ss:$8 sps:$4 sm:$0xff]  }
  0x1c   : > { %726 = vmatpush1.bf16.msra.mxu0 %v1394_v4  ;;  %1353 = vmatpush1.bf16.msra.mxu1 %v1394_v4  ;;  %v1442_v40 = vld [vmem:[%s1716_s20 + $0x150] ss:$8 sps:$4 sm:$0xff]   ;;  %v1443_v41 = vld [vmem:[%s1716_s20 + $0x64] ss:$8 sps:$4 sm:$0xff]   ;;  %v1447_v43 = vld [vmem:[%s1716_s20 + $0x60] ss:$8 sps:$4 sm:$0xff]  }
  0x1d   : > { %727 = vmatprep.subr.bf16.mxu0 %v1655_v0  ;;  %1338 = vmatprep.subr.bf16.mxu1 %v1655_v0  ;;  %v1445_v42 = vld [vmem:[%s1716_s20 + $0x164] ss:$8 sps:$4 sm:$0xff]   ;;  %v1448_v44 = vld [vmem:[%s1716_s20 + $0x160] ss:$8 sps:$4 sm:$0xff]   ;;  %v1449_v45 = vld [vmem:[%s1716_s20 + $0x74] ss:$8 sps:$4 sm:$0xff]  }
  0x1e   : > { %v1451_v46 = vld [vmem:[%s1716_s20 + $0x174] ss:$8 sps:$4 sm:$0xff]   ;;  %v1453_v47 = vld [vmem:[%s1716_s20 + $0x70] ss:$8 sps:$4 sm:$0xff]   ;;  %v1455_v49 = vld [vmem:[%s1716_s20 + $0x84] ss:$8 sps:$4 sm:$0xff]  }
  0x1f   : > { %v1454_v48 = vld [vmem:[%s1716_s20 + $0x170] ss:$8 sps:$4 sm:$0xff]   ;;  %v1457_v50 = vld [vmem:[%s1716_s20 + $0x184] ss:$8 sps:$4 sm:$0xff]   ;;  %v1459_v51 = vld [vmem:[%s1716_s20 + $0x80] ss:$8 sps:$4 sm:$0xff]  }
  0x20   : > { %728 = vmatpush1.bf16.msra.mxu0 %v1395_v5  ;;  %1354 = vmatpush1.bf16.msra.mxu1 %v1395_v5  ;;  %v1460_v52 = vld [vmem:[%s1716_s20 + $0x180] ss:$8 sps:$4 sm:$0xff]   ;;  %v1461_v53 = vld [vmem:[%s1716_s20 + $0x94] ss:$8 sps:$4 sm:$0xff]   ;;  %v1465_v55 = vld [vmem:[%s1716_s20 + $0x90] ss:$8 sps:$4 sm:$0xff]  }
  0x21   : > { %729 = vmatprep.subr.bf16.mxu0 %v1655_v0  ;;  %1339 = vmatprep.subr.bf16.mxu1 %v1655_v0  ;;  %v1463_v54 = vld [vmem:[%s1716_s20 + $0x194] ss:$8 sps:$4 sm:$0xff]   ;;  %v1466_v56 = vld [vmem:[%s1716_s20 + $0x190] ss:$8 sps:$4 sm:$0xff]   ;;  %v1467_v57 = vld [vmem:[%s1716_s20 + $0xa4] ss:$8 sps:$4 sm:$0xff]  }
  0x22   : > { %v1469_v58 = vld [vmem:[%s1716_s20 + $0x1a4] ss:$8 sps:$4 sm:$0xff]   ;;  %v1471_v59 = vld [vmem:[%s1716_s20 + $0xa0] ss:$8 sps:$4 sm:$0xff]   ;;  %v1473_v61 = vld [vmem:[%s1716_s20 + $0xb4] ss:$8 sps:$4 sm:$0xff]  }
  0x23   : > { %v1472_v60 = vld [vmem:[%s1716_s20 + $0x1a0] ss:$8 sps:$4 sm:$0xff]   ;;  %v1475_v62 = vld [vmem:[%s1716_s20 + $0x1b4] ss:$8 sps:$4 sm:$0xff]   ;;  %v1477_v63 = vld [vmem:[%s1716_s20 + $0xb0] ss:$8 sps:$4 sm:$0xff]  }
  0x24   : > { %730 = vmatpush1.bf16.msra.mxu0 %v1396_v7  ;;  %1355 = vmatpush1.bf16.msra.mxu1 %v1396_v7  ;;  %v1479_v1 = vld [vmem:[%s1716_s20 + $0xc4] ss:$8 sps:$4 sm:$0xff]   ;;  %v1483_v3 = vld [vmem:[%s1716_s20 + $0xc0] ss:$8 sps:$4 sm:$0xff]   ;;  %v1485_v5 = vld [vmem:[%s1716_s20 + $0xd4] ss:$8 sps:$4 sm:$0xff]  }
  0x25   : > { %731 = vmatprep.subr.bf16.mxu0 %v1655_v0  ;;  %1340 = vmatprep.subr.bf16.mxu1 %v1655_v0  ;;  %v1481_v2 = vld [vmem:[%s1716_s20 + $0x1c4] ss:$8 sps:$4 sm:$0xff]   ;;  %v1484_v4 = vld [vmem:[%s1716_s20 + $0x1c0] ss:$8 sps:$4 sm:$0xff]   ;;  %v1487_v6 = vld [vmem:[%s1716_s20 + $0x1d4] ss:$8 sps:$4 sm:$0xff]  }
  0x26   : > { %v1489_v7 = vld [vmem:[%s1716_s20 + $0xd0] ss:$8 sps:$4 sm:$0xff]  }
  0x27   : > { %v1490_v8 = vld [vmem:[%s1716_s20 + $0x1d0] ss:$8 sps:$4 sm:$0xff]  }
  0x28   : > { %732 = vmatpush1.bf16.msra.mxu0 %v1397_v9  ;;  %1356 = vmatpush1.bf16.msra.mxu1 %v1397_v9  ;;  %v1491_v9 = vld [vmem:[%s1716_s20 + $0xe4] ss:$8 sps:$4 sm:$0xff]  }
  0x29   : > { %733 = vmatprep.subr.bf16.mxu0 %v1655_v0  ;;  %1341 = vmatprep.subr.bf16.mxu1 %v1655_v0 }
  0x2c   : > { %734 = vmatpush1.bf16.msra.mxu0 %v1398_v10  ;;  %1357 = vmatpush1.bf16.msra.mxu1 %v1398_v10  ;;  %v1493_v10 = vld [vmem:[%s1716_s20 + $0x1e4] ss:$8 sps:$4 sm:$0xff]  }
  0x2d   : > { %735 = vmatprep.subr.bf16.mxu0 %v1655_v0  ;;  %1342 = vmatprep.subr.bf16.mxu1 %v1655_v0 }
  0x30   : > { %736 = vmatpush2.bf16.msra.mxu0 %v1399_v11  ;;  %1358 = vmatpush2.bf16.msra.mxu1 %v1399_v11  ;;  %v1495_v11 = vld [vmem:[%s1716_s20 + $0xe0] ss:$8 sps:$4 sm:$0xff]  }
  0x31   : > { %737 = vmatprep.subr.bf16.mxu0 %v1655_v0  ;;  %1343 = vmatprep.subr.bf16.mxu1 %v1655_v0 }
  0x34   : > { %738 = vmatpush2.bf16.msra.mxu0 %v1400_v12  ;;  %1359 = vmatpush2.bf16.msra.mxu1 %v1400_v12  ;;  %v1496_v12 = vld [vmem:[%s1716_s20 + $0x1e0] ss:$8 sps:$4 sm:$0xff]  }
  0x35   : > { %739 = vmatprep.subr.bf16.mxu0 %v1655_v0  ;;  %1344 = vmatprep.subr.bf16.mxu1 %v1655_v0 }
  0x38   : > { %740 = vmatpush2.bf16.msra.mxu0 %v1401_v13  ;;  %1360 = vmatpush2.bf16.msra.mxu1 %v1401_v13  ;;  %v1497_v13 = vld [vmem:[%s1716_s20 + $0xf4] ss:$8 sps:$4 sm:$0xff]  }
  0x39   : > { %741 = vmatprep.subr.bf16.mxu0 %v1655_v0  ;;  %1345 = vmatprep.subr.bf16.mxu1 %v1655_v0 }
  0x3c   : > { %742 = vmatpush2.bf16.msra.mxu0 %v1402_v14  ;;  %1361 = vmatpush2.bf16.msra.mxu1 %v1402_v14  ;;  %v1499_v14 = vld [vmem:[%s1716_s20 + $0x1f4] ss:$8 sps:$4 sm:$0xff]  }
  0x3d   : > { %743 = vmatprep.subr.bf16.mxu0 %v1655_v0  ;;  %1346 = vmatprep.subr.bf16.mxu1 %v1655_v0 }
  0x40   : > { %744 = vmatpush2.bf16.msra.mxu0 %v1403_v15  ;;  %1362 = vmatpush2.bf16.msra.mxu1 %v1403_v15  ;;  %v1501_v15 = vld [vmem:[%s1716_s20 + $0xf0] ss:$8 sps:$4 sm:$0xff]  }
  0x41   : > { %745 = vmatprep.subr.bf16.mxu0 %v1655_v0  ;;  %1347 = vmatprep.subr.bf16.mxu1 %v1655_v0 }
  0x44   : > { %746 = vmatpush2.bf16.msra.mxu0 %v1404_v16  ;;  %1363 = vmatpush2.bf16.msra.mxu1 %v1404_v16  ;;  %v1502_v16 = vld [vmem:[%s1716_s20 + $0x1f0] ss:$8 sps:$4 sm:$0xff]  }
  0x45   : > { %747 = vmatprep.subr.bf16.mxu0 %v1655_v0  ;;  %1348 = vmatprep.subr.bf16.mxu1 %v1655_v0 }
  0x48   : > { %748 = vmatpush2.bf16.msra.mxu0 %v1405_v17  ;;  %1364 = vmatpush2.bf16.msra.mxu1 %v1405_v17 }
  0x49   : > { %749 = vmatprep.subr.bf16.mxu0 %v1655_v0  ;;  %1349 = vmatprep.subr.bf16.mxu1 %v1655_v0  ;;  %v1478_v0 = vld [vmem:[%s1716_s20 + $0x1b0] ss:$8 sps:$4 sm:$0xff]  }
  0x4c   : > { %750 = vmatpush2.bf16.msra.mxu0 %v1406_v18  ;;  %1365 = vmatpush2.bf16.msra.mxu1 %v1406_v18 }
  0x4f   : > { %752 = vmatmul.mubr.bf16.vlgmr.msra.gmra.mxu0 %v1407_v19  ;;  %880 = vmatmul.mubr.bf16.vlgmr.msra.gmra.mxu1 %v1410_v20 }
  0x50   : > { %759 = vmatprep.mubr.bf16.mxu0 %v1413_v21  ;;  %887 = vmatprep.mubr.bf16.mxu1 %v1415_v22 }
  0x57   : > { %760 = vmatmul.mubr.bf16.gmra.mxu0 %v1417_v23  ;;  %888 = vmatmul.mubr.bf16.gmra.mxu1 %v1418_v24 }
  0x58   : > { %767 = vmatprep.mubr.bf16.mxu0 %v1419_v25  ;;  %895 = vmatprep.mubr.bf16.mxu1 %v1421_v26 }
  0x5f   : > { %768 = vmatmul.mubr.bf16.gmra.mxu0 %v1423_v27  ;;  %896 = vmatmul.mubr.bf16.gmra.mxu1 %v1424_v28 }
  0x60   : > { %775 = vmatprep.mubr.bf16.mxu0 %v1425_v29  ;;  %903 = vmatprep.mubr.bf16.mxu1 %v1427_v30 }
  0x67   : > { %776 = vmatmul.mubr.bf16.gmra.mxu0 %v1429_v31  ;;  %904 = vmatmul.mubr.bf16.gmra.mxu1 %v1430_v32 }
  0x68   : > { %783 = vmatprep.mubr.bf16.mxu0 %v1431_v33  ;;  %911 = vmatprep.mubr.bf16.mxu1 %v1433_v34 }
  0x6f   : > { %784 = vmatmul.mubr.bf16.gmra.mxu0 %v1435_v35  ;;  %912 = vmatmul.mubr.bf16.gmra.mxu1 %v1436_v36 }
  0x70   : > { %791 = vmatprep.mubr.bf16.mxu0 %v1437_v37  ;;  %919 = vmatprep.mubr.bf16.mxu1 %v1439_v38 }
  0x77   : > { %792 = vmatmul.mubr.bf16.gmra.mxu0 %v1441_v39  ;;  %920 = vmatmul.mubr.bf16.gmra.mxu1 %v1442_v40 }
  0x78   : > { %799 = vmatprep.mubr.bf16.mxu0 %v1443_v41  ;;  %927 = vmatprep.mubr.bf16.mxu1 %v1445_v42 }
  0x7f   : > { %800 = vmatmul.mubr.bf16.gmra.mxu0 %v1447_v43  ;;  %928 = vmatmul.mubr.bf16.gmra.mxu1 %v1448_v44 }
  0x80   : > { %807 = vmatprep.mubr.bf16.mxu0 %v1449_v45  ;;  %935 = vmatprep.mubr.bf16.mxu1 %v1451_v46 }
  0x87   : > { %808 = vmatmul.mubr.bf16.gmra.mxu0 %v1453_v47  ;;  %936 = vmatmul.mubr.bf16.gmra.mxu1 %v1454_v48 }
  0x88   : > { %815 = vmatprep.mubr.bf16.mxu0 %v1455_v49  ;;  %943 = vmatprep.mubr.bf16.mxu1 %v1457_v50 }
  0x8f   : > { %816 = vmatmul.mubr.bf16.gmra.mxu0 %v1459_v51  ;;  %944 = vmatmul.mubr.bf16.gmra.mxu1 %v1460_v52 }
  0x90   : > { %823 = vmatprep.mubr.bf16.mxu0 %v1461_v53  ;;  %951 = vmatprep.mubr.bf16.mxu1 %v1463_v54 }
  0x97   : > { %824 = vmatmul.mubr.bf16.gmra.mxu0 %v1465_v55  ;;  %952 = vmatmul.mubr.bf16.gmra.mxu1 %v1466_v56 }
  0x98   : > { %831 = vmatprep.mubr.bf16.mxu0 %v1467_v57  ;;  %959 = vmatprep.mubr.bf16.mxu1 %v1469_v58 }
  0x9f   : > { %832 = vmatmul.mubr.bf16.gmra.mxu0 %v1471_v59  ;;  %960 = vmatmul.mubr.bf16.gmra.mxu1 %v1472_v60 }
  0xa0   : > { %839 = vmatprep.mubr.bf16.mxu0 %v1473_v61  ;;  %967 = vmatprep.mubr.bf16.mxu1 %v1475_v62 }
  0xa7   : > { %840 = vmatmul.mubr.bf16.gmra.mxu0 %v1477_v63  ;;  %968 = vmatmul.mubr.bf16.gmra.mxu1 %v1478_v0 }
  0xa8   : > { %847 = vmatprep.mubr.bf16.mxu0 %v1479_v1  ;;  %975 = vmatprep.mubr.bf16.mxu1 %v1481_v2 }
  0xaf   : > { %848 = vmatmul.mubr.bf16.gmra.mxu0 %v1483_v3  ;;  %976 = vmatmul.mubr.bf16.gmra.mxu1 %v1484_v4 }
  0xb0   : > { %855 = vmatprep.mubr.bf16.mxu0 %v1485_v5  ;;  %983 = vmatprep.mubr.bf16.mxu1 %v1487_v6 }
  0xb7   : > { %856 = vmatmul.mubr.bf16.gmra.mxu0 %v1489_v7  ;;  %984 = vmatmul.mubr.bf16.gmra.mxu1 %v1490_v8 }
  0xb8   : > { %863 = vmatprep.mubr.bf16.mxu0 %v1491_v9  ;;  %991 = vmatprep.mubr.bf16.mxu1 %v1493_v10 }
  0xbf   : > { %864 = vmatmul.mubr.bf16.gmra.mxu0 %v1495_v11  ;;  %992 = vmatmul.mubr.bf16.gmra.mxu1 %v1496_v12 }
  0xc0   : > { %871 = vmatprep.mubr.bf16.mxu0 %v1497_v13  ;;  %999 = vmatprep.mubr.bf16.mxu1 %v1499_v14 }
  0xc7   : > { %872 = vmatmul.mubr.bf16.gmra.mxu0 %v1501_v15  ;;  %1000 = vmatmul.mubr.bf16.gmra.mxu1 %v1502_v16 }
 0x10f   : > { %v753_v17 = vpop.f32.mrf.mxu0  ;;  %v881_v18 = vpop.f32.mrf.mxu1 }
 0x110   : > { %1503 = vtanh.f32 %v753_v17 }
 0x111   : > { %1505 = vtanh.f32 %v881_v18  ;;  %v755_v19 = vpop.f32.mrf.mxu0  ;;  %v883_v20 = vpop.f32.mrf.mxu1 }
 0x113   : > { %v756_v21 = vpop.f32.mrf.mxu0  ;;  %v884_v22 = vpop.f32.mrf.mxu1 }
 0x114   : > { %1507 = vtanh.f32 %v756_v21 }
 0x115   : > { %1509 = vtanh.f32 %v884_v22  ;;  %v758_v23 = vpop.f32.mrf.mxu0  ;;  %v886_v24 = vpop.f32.mrf.mxu1 }
 0x117   : > { %v761_v25 = vpop.f32.mrf.mxu0  ;;  %v889_v26 = vpop.f32.mrf.mxu1 }
 0x118   : > { %1511 = vtanh.f32 %v761_v25 }
 0x119   : > { %1513 = vtanh.f32 %v889_v26  ;;  %v763_v27 = vpop.f32.mrf.mxu0  ;;  %v891_v28 = vpop.f32.mrf.mxu1 }
 0x11b   : > { %v764_v29 = vpop.f32.mrf.mxu0  ;;  %v892_v30 = vpop.f32.mrf.mxu1 }
 0x11c   : > { %1515 = vtanh.f32 %v764_v29 }
 0x11d   : > { %v1504_v31 = vpop.eup %1503  ;;  %1517 = vtanh.f32 %v892_v30  ;;  %v766_v32 = vpop.f32.mrf.mxu0 }
 0x11e   : > { %v894_v33 = vpop.f32.mrf.mxu1  ;;  %v1506_v34 = vpop.eup %1505  ;;  %1072 = vst [vmem:[%s1822_s23] sm:$0xff] %v1504_v31 }
 0x11f   : > { %1104 = vst [vmem:[%s1822_s23 + $0x100] sm:$0xff] %v1506_v34  ;;  %v769_v35 = vpop.f32.mrf.mxu0 }
 0x120   : > { %v897_v36 = vpop.f32.mrf.mxu1  ;;  %1519 = vtanh.f32 %v769_v35 }
 0x121   : > { %v1508_v37 = vpop.eup %1507  ;;  %1521 = vtanh.f32 %v897_v36  ;;  %v771_v38 = vpop.f32.mrf.mxu0 }
 0x122   : > { %v899_v39 = vpop.f32.mrf.mxu1  ;;  %v1510_v40 = vpop.eup %1509  ;;  %1073 = vst [vmem:[%s1822_s23 + $0x8] sm:$0xff] %v1508_v37 }
 0x123   : > { %1105 = vst [vmem:[%s1822_s23 + $0x108] sm:$0xff] %v1510_v40  ;;  %v772_v41 = vpop.f32.mrf.mxu0 }
 0x124   : > { %v900_v42 = vpop.f32.mrf.mxu1  ;;  %1523 = vtanh.f32 %v772_v41 }
 0x125   : > { %v1512_v43 = vpop.eup %1511  ;;  %1525 = vtanh.f32 %v900_v42  ;;  %v774_v44 = vpop.f32.mrf.mxu0 }
 0x126   : > { %v902_v45 = vpop.f32.mrf.mxu1  ;;  %v1514_v46 = vpop.eup %1513  ;;  %1074 = vst [vmem:[%s1822_s23 + $0x10] sm:$0xff] %v1512_v43 }
 0x127   : > { %1106 = vst [vmem:[%s1822_s23 + $0x110] sm:$0xff] %v1514_v46  ;;  %v777_v47 = vpop.f32.mrf.mxu0 }
 0x128   : > { %v905_v48 = vpop.f32.mrf.mxu1  ;;  %1527 = vtanh.f32 %v777_v47 }
 0x129   : > { %v1516_v49 = vpop.eup %1515  ;;  %1529 = vtanh.f32 %v905_v48  ;;  %v779_v50 = vpop.f32.mrf.mxu0 }
 0x12a   : > { %v907_v51 = vpop.f32.mrf.mxu1  ;;  %v1518_v52 = vpop.eup %1517  ;;  %1075 = vst [vmem:[%s1822_s23 + $0x18] sm:$0xff] %v1516_v49 }
 0x12b   : > { %1107 = vst [vmem:[%s1822_s23 + $0x118] sm:$0xff] %v1518_v52  ;;  %v780_v53 = vpop.f32.mrf.mxu0 }
 0x12c   : > { %v908_v54 = vpop.f32.mrf.mxu1  ;;  %1531 = vtanh.f32 %v780_v53 }
 0x12d   : > { %v1520_v55 = vpop.eup %1519  ;;  %1533 = vtanh.f32 %v908_v54  ;;  %v782_v56 = vpop.f32.mrf.mxu0 }
 0x12e   : > { %v910_v57 = vpop.f32.mrf.mxu1  ;;  %v1522_v58 = vpop.eup %1521  ;;  %1076 = vst [vmem:[%s1822_s23 + $0x20] sm:$0xff] %v1520_v55 }
 0x12f   : > { %1108 = vst [vmem:[%s1822_s23 + $0x120] sm:$0xff] %v1522_v58  ;;  %v785_v59 = vpop.f32.mrf.mxu0 }
 0x130   : > { %v913_v60 = vpop.f32.mrf.mxu1  ;;  %1535 = vtanh.f32 %v785_v59 }
 0x131   : > { %v1524_v61 = vpop.eup %1523  ;;  %1537 = vtanh.f32 %v913_v60  ;;  %v787_v62 = vpop.f32.mrf.mxu0 }
 0x132   : > { %v915_v63 = vpop.f32.mrf.mxu1  ;;  %v1526_v0 = vpop.eup %1525  ;;  %1077 = vst [vmem:[%s1822_s23 + $0x28] sm:$0xff] %v1524_v61 }
 0x133   : > { %1109 = vst [vmem:[%s1822_s23 + $0x128] sm:$0xff] %v1526_v0  ;;  %v788_v1 = vpop.f32.mrf.mxu0 }
 0x134   : > { %v916_v2 = vpop.f32.mrf.mxu1  ;;  %1539 = vtanh.f32 %v788_v1 }
 0x135   : > { %v1528_v3 = vpop.eup %1527  ;;  %1541 = vtanh.f32 %v916_v2  ;;  %v790_v4 = vpop.f32.mrf.mxu0 }
 0x136   : > { %v918_v5 = vpop.f32.mrf.mxu1  ;;  %v1530_v6 = vpop.eup %1529  ;;  %1078 = vst [vmem:[%s1822_s23 + $0x30] sm:$0xff] %v1528_v3 }
 0x137   : > { %1110 = vst [vmem:[%s1822_s23 + $0x130] sm:$0xff] %v1530_v6  ;;  %v793_v7 = vpop.f32.mrf.mxu0 }
 0x138   : > { %v921_v8 = vpop.f32.mrf.mxu1  ;;  %1543 = vtanh.f32 %v793_v7 }
 0x139   : > { %v1532_v9 = vpop.eup %1531  ;;  %1545 = vtanh.f32 %v921_v8  ;;  %v795_v10 = vpop.f32.mrf.mxu0 }
 0x13a   : > { %v923_v11 = vpop.f32.mrf.mxu1  ;;  %v1534_v12 = vpop.eup %1533  ;;  %1079 = vst [vmem:[%s1822_s23 + $0x38] sm:$0xff] %v1532_v9 }
 0x13b   : > { %1111 = vst [vmem:[%s1822_s23 + $0x138] sm:$0xff] %v1534_v12  ;;  %v796_v13 = vpop.f32.mrf.mxu0 }
 0x13c   : > { %v924_v14 = vpop.f32.mrf.mxu1  ;;  %1547 = vtanh.f32 %v796_v13 }
 0x13d   : > { %v1536_v15 = vpop.eup %1535  ;;  %1549 = vtanh.f32 %v924_v14  ;;  %v798_v16 = vpop.f32.mrf.mxu0 }
 0x13e   : > { %v926_v17 = vpop.f32.mrf.mxu1  ;;  %v1538_v18 = vpop.eup %1537  ;;  %1080 = vst [vmem:[%s1822_s23 + $0x40] sm:$0xff] %v1536_v15 }
 0x13f   : > { %1112 = vst [vmem:[%s1822_s23 + $0x140] sm:$0xff] %v1538_v18  ;;  %v801_v19 = vpop.f32.mrf.mxu0 }
 0x140   : > { %v929_v20 = vpop.f32.mrf.mxu1  ;;  %1551 = vtanh.f32 %v801_v19 }
 0x141   : > { %v1540_v21 = vpop.eup %1539  ;;  %1553 = vtanh.f32 %v929_v20  ;;  %v803_v22 = vpop.f32.mrf.mxu0 }
 0x142   : > { %v931_v23 = vpop.f32.mrf.mxu1  ;;  %v1542_v24 = vpop.eup %1541  ;;  %1081 = vst [vmem:[%s1822_s23 + $0x48] sm:$0xff] %v1540_v21 }
 0x143   : > { %1113 = vst [vmem:[%s1822_s23 + $0x148] sm:$0xff] %v1542_v24  ;;  %v804_v25 = vpop.f32.mrf.mxu0 }
 0x144   : > { %v932_v26 = vpop.f32.mrf.mxu1  ;;  %1555 = vtanh.f32 %v804_v25 }
 0x145   : > { %v1544_v27 = vpop.eup %1543  ;;  %1557 = vtanh.f32 %v932_v26  ;;  %v806_v28 = vpop.f32.mrf.mxu0 }
 0x146   : > { %v934_v29 = vpop.f32.mrf.mxu1  ;;  %v1546_v30 = vpop.eup %1545  ;;  %1082 = vst [vmem:[%s1822_s23 + $0x50] sm:$0xff] %v1544_v27 }
 0x147   : > { %1114 = vst [vmem:[%s1822_s23 + $0x150] sm:$0xff] %v1546_v30  ;;  %v809_v31 = vpop.f32.mrf.mxu0 }
 0x148   : > { %v937_v32 = vpop.f32.mrf.mxu1  ;;  %1559 = vtanh.f32 %v809_v31 }
 0x149   : > { %v1548_v33 = vpop.eup %1547  ;;  %1561 = vtanh.f32 %v937_v32  ;;  %v811_v34 = vpop.f32.mrf.mxu0 }
 0x14a   : > { %v939_v35 = vpop.f32.mrf.mxu1  ;;  %v1550_v36 = vpop.eup %1549  ;;  %1083 = vst [vmem:[%s1822_s23 + $0x58] sm:$0xff] %v1548_v33 }
 0x14b   : > { %1115 = vst [vmem:[%s1822_s23 + $0x158] sm:$0xff] %v1550_v36  ;;  %v812_v37 = vpop.f32.mrf.mxu0 }
 0x14c   : > { %v940_v38 = vpop.f32.mrf.mxu1  ;;  %1563 = vtanh.f32 %v812_v37 }
 0x14d   : > { %v1552_v39 = vpop.eup %1551  ;;  %1565 = vtanh.f32 %v940_v38  ;;  %v814_v40 = vpop.f32.mrf.mxu0 }
 0x14e   : > { %v942_v41 = vpop.f32.mrf.mxu1  ;;  %v1554_v42 = vpop.eup %1553  ;;  %1084 = vst [vmem:[%s1822_s23 + $0x60] sm:$0xff] %v1552_v39 }
 0x14f   : > { %1116 = vst [vmem:[%s1822_s23 + $0x160] sm:$0xff] %v1554_v42  ;;  %v817_v43 = vpop.f32.mrf.mxu0 }
 0x150   : > { %v945_v44 = vpop.f32.mrf.mxu1  ;;  %1567 = vtanh.f32 %v817_v43 }
 0x151   : > { %v1556_v45 = vpop.eup %1555  ;;  %1569 = vtanh.f32 %v945_v44  ;;  %v819_v46 = vpop.f32.mrf.mxu0 }
 0x152   : > { %v947_v47 = vpop.f32.mrf.mxu1  ;;  %v1558_v48 = vpop.eup %1557  ;;  %1085 = vst [vmem:[%s1822_s23 + $0x68] sm:$0xff] %v1556_v45 }
 0x153   : > { %1117 = vst [vmem:[%s1822_s23 + $0x168] sm:$0xff] %v1558_v48  ;;  %v820_v49 = vpop.f32.mrf.mxu0 }
 0x154   : > { %v948_v50 = vpop.f32.mrf.mxu1  ;;  %1571 = vtanh.f32 %v820_v49 }
 0x155   : > { %v1560_v51 = vpop.eup %1559  ;;  %1573 = vtanh.f32 %v948_v50  ;;  %v822_v52 = vpop.f32.mrf.mxu0 }
 0x156   : > { %v950_v53 = vpop.f32.mrf.mxu1  ;;  %v1562_v54 = vpop.eup %1561  ;;  %1086 = vst [vmem:[%s1822_s23 + $0x70] sm:$0xff] %v1560_v51 }
 0x157   : > { %1118 = vst [vmem:[%s1822_s23 + $0x170] sm:$0xff] %v1562_v54  ;;  %v825_v55 = vpop.f32.mrf.mxu0 }
 0x158   : > { %v953_v56 = vpop.f32.mrf.mxu1  ;;  %1575 = vtanh.f32 %v825_v55 }
 0x159   : > { %v1564_v57 = vpop.eup %1563  ;;  %1577 = vtanh.f32 %v953_v56  ;;  %v827_v58 = vpop.f32.mrf.mxu0 }
 0x15a   : > { %v955_v59 = vpop.f32.mrf.mxu1  ;;  %v1566_v60 = vpop.eup %1565  ;;  %1087 = vst [vmem:[%s1822_s23 + $0x78] sm:$0xff] %v1564_v57 }
 0x15b   : > { %1119 = vst [vmem:[%s1822_s23 + $0x178] sm:$0xff] %v1566_v60  ;;  %v828_v61 = vpop.f32.mrf.mxu0 }
 0x15c   : > { %v956_v62 = vpop.f32.mrf.mxu1  ;;  %1579 = vtanh.f32 %v828_v61 }
 0x15d   : > { %v1568_v63 = vpop.eup %1567  ;;  %1581 = vtanh.f32 %v956_v62  ;;  %v830_v0 = vpop.f32.mrf.mxu0 }
 0x15e   : > { %v958_v1 = vpop.f32.mrf.mxu1  ;;  %v1570_v2 = vpop.eup %1569  ;;  %1088 = vst [vmem:[%s1822_s23 + $0x80] sm:$0xff] %v1568_v63 }
 0x15f   : > { %1120 = vst [vmem:[%s1822_s23 + $0x180] sm:$0xff] %v1570_v2  ;;  %v833_v3 = vpop.f32.mrf.mxu0 }
 0x160   : > { %v961_v4 = vpop.f32.mrf.mxu1  ;;  %1583 = vtanh.f32 %v833_v3 }
 0x161   : > { %v1572_v5 = vpop.eup %1571  ;;  %1585 = vtanh.f32 %v961_v4  ;;  %v835_v6 = vpop.f32.mrf.mxu0 }
 0x162   : > { %v963_v7 = vpop.f32.mrf.mxu1  ;;  %v1574_v8 = vpop.eup %1573  ;;  %1089 = vst [vmem:[%s1822_s23 + $0x88] sm:$0xff] %v1572_v5 }
 0x163   : > { %1121 = vst [vmem:[%s1822_s23 + $0x188] sm:$0xff] %v1574_v8  ;;  %v836_v9 = vpop.f32.mrf.mxu0 }
 0x164   : > { %v964_v10 = vpop.f32.mrf.mxu1  ;;  %1587 = vtanh.f32 %v836_v9 }
 0x165   : > { %v1576_v11 = vpop.eup %1575  ;;  %1589 = vtanh.f32 %v964_v10  ;;  %v838_v12 = vpop.f32.mrf.mxu0 }
 0x166   : > { %v966_v13 = vpop.f32.mrf.mxu1  ;;  %v1578_v14 = vpop.eup %1577  ;;  %1090 = vst [vmem:[%s1822_s23 + $0x90] sm:$0xff] %v1576_v11 }
 0x167   : > { %1122 = vst [vmem:[%s1822_s23 + $0x190] sm:$0xff] %v1578_v14  ;;  %v841_v15 = vpop.f32.mrf.mxu0 }
 0x168   : > { %v969_v16 = vpop.f32.mrf.mxu1  ;;  %1591 = vtanh.f32 %v841_v15 }
 0x169   : > { %v1580_v17 = vpop.eup %1579  ;;  %1593 = vtanh.f32 %v969_v16  ;;  %v843_v18 = vpop.f32.mrf.mxu0 }
 0x16a   : > { %v971_v19 = vpop.f32.mrf.mxu1  ;;  %v1582_v20 = vpop.eup %1581  ;;  %1091 = vst [vmem:[%s1822_s23 + $0x98] sm:$0xff] %v1580_v17 }
 0x16b   : > { %1123 = vst [vmem:[%s1822_s23 + $0x198] sm:$0xff] %v1582_v20  ;;  %v844_v21 = vpop.f32.mrf.mxu0 }
 0x16c   : > { %v972_v22 = vpop.f32.mrf.mxu1  ;;  %1595 = vtanh.f32 %v844_v21 }
 0x16d   : > { %v1584_v23 = vpop.eup %1583  ;;  %1597 = vtanh.f32 %v972_v22  ;;  %v846_v24 = vpop.f32.mrf.mxu0 }
 0x16e   : > { %v974_v25 = vpop.f32.mrf.mxu1  ;;  %v1586_v26 = vpop.eup %1585  ;;  %1092 = vst [vmem:[%s1822_s23 + $0xa0] sm:$0xff] %v1584_v23 }
 0x16f   : > { %1124 = vst [vmem:[%s1822_s23 + $0x1a0] sm:$0xff] %v1586_v26  ;;  %v849_v27 = vpop.f32.mrf.mxu0 }
 0x170   : > { %v977_v28 = vpop.f32.mrf.mxu1  ;;  %1599 = vtanh.f32 %v849_v27 }
 0x171   : > { %v1588_v29 = vpop.eup %1587  ;;  %1601 = vtanh.f32 %v977_v28  ;;  %v851_v30 = vpop.f32.mrf.mxu0 }
 0x172   : > { %v979_v31 = vpop.f32.mrf.mxu1  ;;  %v1590_v32 = vpop.eup %1589  ;;  %1093 = vst [vmem:[%s1822_s23 + $0xa8] sm:$0xff] %v1588_v29 }
 0x173   : > { %1125 = vst [vmem:[%s1822_s23 + $0x1a8] sm:$0xff] %v1590_v32  ;;  %v852_v33 = vpop.f32.mrf.mxu0 }
 0x174   : > { %v980_v34 = vpop.f32.mrf.mxu1  ;;  %1603 = vtanh.f32 %v852_v33 }
 0x175   : > { %v1592_v35 = vpop.eup %1591  ;;  %1605 = vtanh.f32 %v980_v34  ;;  %v854_v36 = vpop.f32.mrf.mxu0 }
 0x176   : > { %v982_v37 = vpop.f32.mrf.mxu1  ;;  %v1594_v38 = vpop.eup %1593  ;;  %1094 = vst [vmem:[%s1822_s23 + $0xb0] sm:$0xff] %v1592_v35 }
 0x177   : > { %1126 = vst [vmem:[%s1822_s23 + $0x1b0] sm:$0xff] %v1594_v38  ;;  %v857_v39 = vpop.f32.mrf.mxu0 }
 0x178   : > { %v985_v40 = vpop.f32.mrf.mxu1  ;;  %1607 = vtanh.f32 %v857_v39 }
 0x179   : > { %v1596_v41 = vpop.eup %1595  ;;  %1609 = vtanh.f32 %v985_v40  ;;  %v859_v42 = vpop.f32.mrf.mxu0 }
 0x17a   : > { %v987_v43 = vpop.f32.mrf.mxu1  ;;  %v1598_v44 = vpop.eup %1597  ;;  %1095 = vst [vmem:[%s1822_s23 + $0xb8] sm:$0xff] %v1596_v41 }
 0x17b   : > { %1127 = vst [vmem:[%s1822_s23 + $0x1b8] sm:$0xff] %v1598_v44  ;;  %v860_v45 = vpop.f32.mrf.mxu0 }
 0x17c   : > { %v988_v46 = vpop.f32.mrf.mxu1  ;;  %1611 = vtanh.f32 %v860_v45 }
 0x17d   : > { %v1600_v47 = vpop.eup %1599  ;;  %1613 = vtanh.f32 %v988_v46  ;;  %v862_v48 = vpop.f32.mrf.mxu0 }
 0x17e   : > { %v990_v49 = vpop.f32.mrf.mxu1  ;;  %v1602_v50 = vpop.eup %1601  ;;  %1096 = vst [vmem:[%s1822_s23 + $0xc0] sm:$0xff] %v1600_v47 }
 0x17f   : > { %1128 = vst [vmem:[%s1822_s23 + $0x1c0] sm:$0xff] %v1602_v50  ;;  %v865_v51 = vpop.f32.mrf.mxu0 }
 0x180   : > { %v993_v52 = vpop.f32.mrf.mxu1  ;;  %1615 = vtanh.f32 %v865_v51 }
 0x181   : > { %v1604_v53 = vpop.eup %1603  ;;  %1617 = vtanh.f32 %v993_v52  ;;  %v867_v54 = vpop.f32.mrf.mxu0 }
 0x182   : > { %v995_v55 = vpop.f32.mrf.mxu1  ;;  %v1606_v56 = vpop.eup %1605  ;;  %1097 = vst [vmem:[%s1822_s23 + $0xc8] sm:$0xff] %v1604_v53 }
 0x183   : > { %1129 = vst [vmem:[%s1822_s23 + $0x1c8] sm:$0xff] %v1606_v56  ;;  %v868_v57 = vpop.f32.mrf.mxu0 }
 0x184   : > { %v996_v58 = vpop.f32.mrf.mxu1  ;;  %1619 = vtanh.f32 %v868_v57 }
 0x185   : > { %v1608_v59 = vpop.eup %1607  ;;  %1621 = vtanh.f32 %v996_v58  ;;  %v870_v60 = vpop.f32.mrf.mxu0 }
 0x186   : > { %v998_v61 = vpop.f32.mrf.mxu1  ;;  %v1610_v62 = vpop.eup %1609  ;;  %1098 = vst [vmem:[%s1822_s23 + $0xd0] sm:$0xff] %v1608_v59 }
 0x187   : > { %1130 = vst [vmem:[%s1822_s23 + $0x1d0] sm:$0xff] %v1610_v62  ;;  %v873_v63 = vpop.f32.mrf.mxu0 }
 0x188   : > { %v1001_v0 = vpop.f32.mrf.mxu1  ;;  %1623 = vtanh.f32 %v873_v63 }
 0x189   : > { %v1612_v1 = vpop.eup %1611  ;;  %1625 = vtanh.f32 %v1001_v0  ;;  %v875_v2 = vpop.f32.mrf.mxu0 }
 0x18a   : > { %v1003_v3 = vpop.f32.mrf.mxu1  ;;  %v1614_v4 = vpop.eup %1613  ;;  %1099 = vst [vmem:[%s1822_s23 + $0xd8] sm:$0xff] %v1612_v1 }
 0x18b   : > { %1131 = vst [vmem:[%s1822_s23 + $0x1d8] sm:$0xff] %v1614_v4  ;;  %v876_v5 = vpop.f32.mrf.mxu0 }
 0x18c   : > { %v1004_v6 = vpop.f32.mrf.mxu1  ;;  %1627 = vtanh.f32 %v876_v5 }
 0x18d   : > { %v1616_v7 = vpop.eup %1615  ;;  %1629 = vtanh.f32 %v1004_v6  ;;  %v878_v8 = vpop.f32.mrf.mxu0 }
 0x18e   : > { %v1006_v9 = vpop.f32.mrf.mxu1  ;;  %v1618_v10 = vpop.eup %1617  ;;  %1100 = vst [vmem:[%s1822_s23 + $0xe0] sm:$0xff] %v1616_v7 }
 0x18f   : > { %1132 = vst [vmem:[%s1822_s23 + $0x1e0] sm:$0xff] %v1618_v10 }
 0x191   : > { %v1620_v11 = vpop.eup %1619 }
 0x192   : > { %v1622_v12 = vpop.eup %1621  ;;  %1101 = vst [vmem:[%s1822_s23 + $0xe8] sm:$0xff] %v1620_v11 }
 0x193   : > { %1133 = vst [vmem:[%s1822_s23 + $0x1e8] sm:$0xff] %v1622_v12 }
 0x195   : > { %v1624_v13 = vpop.eup %1623 }
 0x196   : > { %v1626_v14 = vpop.eup %1625  ;;  %1102 = vst [vmem:[%s1822_s23 + $0xf0] sm:$0xff] %v1624_v13 }
 0x197   : > { %1134 = vst [vmem:[%s1822_s23 + $0x1f0] sm:$0xff] %v1626_v14 }
 0x199   : > { %v1628_v15 = vpop.eup %1627 }
 0x19a   : > { %v1630_v16 = vpop.eup %1629  ;;  %1103 = vst [vmem:[%s1822_s23 + $0xf8] sm:$0xff] %v1628_v15 }
 0x19b   : > { %1135 = vst [vmem:[%s1822_s23 + $0x1f8] sm:$0xff] %v1630_v16 }
 0x19c PF: > { %s12_s11 = sadd.s32 1, %s1653_s11   ;;  %s1900_s9 = smov %s1649_s10 }
 0x19d   : > { %p9_p5 = scmp.ge.s32.totalorder %s12_s11, 6   ;;  %s1901_s10 = smov %s1903_s12 }
 0x19f   :  { %11 = sbr.rel (!%p9_p5) target bundleno = 2 (0x2), region = 61 }

</bundles_post_ra>
